<compile_context>
chip_gen: v5e
topology: v5e:2x2
jax: 0.10.0
libtpu: 0.0.40
codegen_flags: <defaults>
</compile_context>

<pallas_src>
import functools

import jax
import jax.numpy as jnp
from jax import lax
from jax.experimental import pallas as pl
from jax.experimental.pallas import tpu as pltpu

LANES = 128
SUBLANES = 8


def _round_up(n, m):
    return (n + m - 1) // m * m


def _sigmoid(x):
    # Explicit exp-based sigmoid (EUP exp + VPU) — guaranteed Mosaic lowering.
    return 1.0 / (1.0 + jnp.exp(-x))


def _lstm_cell(gates, c_prev, H):
    """gates: (B, 4H) pre-activation, PyTorch gate order (i, f, g, o).

    NOTE: the sigmoid pass intentionally sweeps all 4H lanes (one EUP pass);
    the g block's sigmoid output is discarded and tanh is applied to the raw
    pre-activation slice instead — do not "fix" by slicing before the sigmoid.
    """
    sig = _sigmoid(gates)
    i_g = sig[:, 0 * H:1 * H]
    f_g = sig[:, 1 * H:2 * H]
    o_g = sig[:, 3 * H:4 * H]
    g_g = jnp.tanh(gates[:, 2 * H:3 * H])
    c_new = f_g * c_prev + i_g * g_g
    h_new = o_g * jnp.tanh(c_new)
    return h_new, c_new


def seq2seq_kernel(x_ref, y_ref, w_ref, out_ref, enc_ref, fc_ref, *,
                   B, T, Lm1, H, F_pad, V_pad, G, WOUT, offs):
    """Fused encoder LSTM + embedding + decoder LSTM/attention + fc.

    x_ref:   (T*B, F_pad)  time-major features (row t*B + b), feat dim zero-padded
    y_ref:   (Lm1*B, 1)    int32 target tokens y[:, :-1], time-major rows
    w_ref:   (rows, W)     packed parameter slab (layout: see pack_params)
    out_ref: (Lm1*B, WOUT) time-major logits, lane-padded to a multiple of 128
    enc_ref: (B*T, H)      scratch — encoder hidden states, batch-major (row b*T+t)
    fc_ref:  (Lm1*B, H)    scratch — decoder (ox + sx) rows, time-major
    """
    f32 = jnp.float32
    (o_ewih, o_ewhh, o_eb, o_emb, o_dwc, o_db, o_fcw, o_fcb) = offs

    # ---- hoisted loop-invariant weight loads (static, 8-aligned slab slices) -
    enc_whh = w_ref[o_ewhh:o_ewhh + H, :G]                        # (H, 4H)
    dec_wcat = w_ref[o_dwc:o_dwc + 2 * H, :G]                     # (2H, 4H) = [W_ih; W_hh]

    # ---- encoder: input projection for ALL T steps in one MXU matmul --------
    xp = (jnp.dot(x_ref[...], w_ref[o_ewih:o_ewih + F_pad, :G],
                  preferred_element_type=f32)
          + w_ref[o_eb:o_eb + 1, :G])                             # (T*B, 4H)

    h = jnp.zeros((B, H), f32)
    c = jnp.zeros((B, H), f32)
    for t in range(T):                       # fully unrolled recurrent loop
        gates = xp[t * B:(t + 1) * B, :] + jnp.dot(
            h, enc_whh, preferred_element_type=f32)
        h, c = _lstm_cell(gates, c, H)
        for b in range(B):                   # batch-major scratch rows (b*T + t)
            enc_ref[b * T + t:b * T + t + 1, :] = h[b:b + 1, :]

    # ---- decoder: embedding lookup pre-folded through W_ih (one MXU matmul) -
    ids = y_ref[...]                                              # (Lm1*B, 1) i32
    onehot = (ids == lax.broadcasted_iota(jnp.int32, (Lm1 * B, V_pad), 1)
              ).astype(f32)
    # NOTE: out-of-range ids silently yield a zero embedding (PyTorch would raise).
    demb = (jnp.dot(onehot, w_ref[o_emb:o_emb + V_pad, :G],
                    preferred_element_type=f32)
            + w_ref[o_db:o_db + 1, :G])                           # (Lm1*B, 4H)

    h = jnp.zeros((B, H), f32)
    c = jnp.zeros((B, H), f32)
    sx = jnp.zeros((B, H), f32)   # zero context reproduces "sx is None" at t==0
    for t in range(Lm1):                      # fully unrolled decode loop
        # gates = (emb_t + sx) @ W_ih + h @ W_hh + b, with emb_t@W_ih + b hoisted
        # and the two per-step matmuls fused via [sx, h] @ [W_ih; W_hh].
        zh = jnp.concatenate([sx, h], axis=1)                     # (B, 2H)
        gates = demb[t * B:(t + 1) * B, :] + jnp.dot(
            zh, dec_wcat, preferred_element_type=f32)
        ox, c = _lstm_cell(gates, c, H)

        # Dot-product attention on the MXU (per batch element, B=2 unrolled):
        # scores (1,T) = ox_b @ enc_b^T, softmax over 16 lanes, ctx = p @ enc_b.
        sx_rows = []
        for b in range(B):
            enc_b = enc_ref[b * T:(b + 1) * T, :]                 # (T, H) contiguous
            s = lax.dot_general(ox[b:b + 1, :], enc_b,
                                (((1,), (1,)), ((), ())),
                                preferred_element_type=f32)       # (1, T)
            s = s - jnp.max(s, axis=1, keepdims=True)
            e = jnp.exp(s)
            # approx reciprocal on EUP (~1e-3 rel. error in attention weights)
            p = e * pl.reciprocal(jnp.sum(e, axis=1, keepdims=True), approx=True)
            sx_rows.append(jnp.dot(p, enc_b, preferred_element_type=f32))
        sx = jnp.concatenate(sx_rows, axis=0)                     # (B, H)

        fc_ref[t * B:(t + 1) * B, :] = ox + sx                    # time-major rows
        h = ox

    # ---- fc hoisted out of the loop: one matmul + one lane-dense 128 store --
    out_ref[...] = (jnp.dot(fc_ref[...], w_ref[o_fcw:o_fcw + H, :WOUT],
                            preferred_element_type=f32)
                    + w_ref[o_fcb:o_fcb + 1, :WOUT])              # (Lm1*B, WOUT)

    # TODO(synk): scheduled sampling (sample_prob > 0) needs torch.max over live
    # outputs + host RNG; not reproduced since sample_prob = 0 in this config.
    # TODO(synk): scaled configs (B>=32, T~1000, H>=512, vocab~10k): bf16 MXU
    # operands (elementwise stays f32 on v5e), tile enc over T with a grid axis
    # instead of full-VMEM residency (v7x has only 64 MiB VMEM), add a parallel
    # batch grid axis / core_map for v7x's 2nd TensorCore, and size matmul tiles
    # to the 256-wide MXU on v6e/v7x (128 on v5e).


def init_params(key, feat_dim, vocab_size, hidden):
    """Deterministic init mirroring the PyTorch module's shapes (weights stored
    pre-transposed for x @ W; LSTM biases b_ih + b_hh folded into one row)."""
    ks = jax.random.split(key, 9)
    H = hidden

    def u(k, shape, fan):
        s = 1.0 / (fan ** 0.5)
        return jax.random.uniform(k, shape, jnp.float32, -s, s)

    return dict(
        enc_wih_t=u(ks[0], (feat_dim, 4 * H), H),
        enc_whh_t=u(ks[1], (H, 4 * H), H),
        enc_b=u(ks[2], (1, 4 * H), H),
        embedding=jax.random.normal(ks[3], (vocab_size, H), jnp.float32),
        dec_wih_t=u(ks[4], (H, 4 * H), H),
        dec_whh_t=u(ks[5], (H, 4 * H), H),
        dec_b=u(ks[6], (1, 4 * H), H),
        fc_w_t=u(ks[7], (H, vocab_size - 1), H),
        fc_b=u(ks[8], (1, vocab_size - 1), H),
    )


def pack_params(params):
    """Pack everything into a single (rows, W) f32 slab (one input DMA).

    dec_wih/dec_whh are pre-concatenated into [W_ih; W_hh] and the embedding is
    pre-folded through the decoder input projection (emb @ W_ih) — done once
    here, not per kernel call.  Every section starts on an 8-row boundary; the
    slab is lane-padded to W = max(4H, round_up(V-1, 128))."""
    F = params["enc_wih_t"].shape[0]
    H = params["enc_whh_t"].shape[0]
    V = params["embedding"].shape[0]
    Vm1 = params["fc_w_t"].shape[1]
    G = 4 * H
    F_pad = _round_up(F, SUBLANES)
    V_pad = _round_up(V, SUBLANES)
    WOUT = _round_up(Vm1, LANES)
    W = max(G, WOUT)

    def pad2(a, rows, cols):
        return jnp.pad(a.astype(jnp.float32),
                       ((0, rows - a.shape[0]), (0, cols - a.shape[1])))

    emb_wih = params["embedding"] @ params["dec_wih_t"]            # (V, 4H)
    dec_wcat = jnp.concatenate([params["dec_wih_t"], params["dec_whh_t"]], axis=0)

    sections = [
        pad2(params["enc_wih_t"], F_pad, W),
        pad2(params["enc_whh_t"], H, W),
        pad2(params["enc_b"], SUBLANES, W),
        pad2(emb_wih, V_pad, W),
        pad2(dec_wcat, 2 * H, W),
        pad2(params["dec_b"], SUBLANES, W),
        pad2(params["fc_w_t"], H, W),
        pad2(params["fc_b"], SUBLANES, W),
    ]
    offs, row = [], 0
    for sec in sections:
        offs.append(row)
        row += sec.shape[0]
    w_slab = jnp.concatenate(sections, axis=0)

    info = dict(H=H, V=V, Vm1=Vm1, F=F, F_pad=F_pad, V_pad=V_pad,
                G=G, WOUT=WOUT, W=W, offs=tuple(offs))
    return w_slab, info


def seq2seq_forward(w_slab, x, y, info):
    """Forward pass: x (B, T, feat) f32, y (B, L) i32 -> logits (B, L-1, V-1)."""
    B, T, F = x.shape
    L = y.shape[1]
    Lm1 = L - 1
    H, Vm1, F_pad = info["H"], info["Vm1"], info["F_pad"]

    # Time-major row layout (row = t*B + b): every per-step slice inside the
    # kernel is a contiguous static slab.  (Tiny XLA transposes at the boundary.)
    x_tm = jnp.transpose(x.astype(jnp.float32), (1, 0, 2)).reshape(T * B, F)
    x_tm = jnp.pad(x_tm, ((0, 0), (0, F_pad - F)))
    y_tm = jnp.transpose(y[:, :Lm1].astype(jnp.int32), (1, 0)).reshape(Lm1 * B, 1)

    kernel = functools.partial(
        seq2seq_kernel, B=B, T=T, Lm1=Lm1, H=H, F_pad=F_pad,
        V_pad=info["V_pad"], G=info["G"], WOUT=info["WOUT"], offs=info["offs"])

    vmem = pl.BlockSpec(memory_space=pltpu.MemorySpace.VMEM)
    out_tm = pl.pallas_call(
        kernel,
        out_shape=jax.ShapeDtypeStruct((Lm1 * B, info["WOUT"]), jnp.float32),
        in_specs=[vmem, vmem, vmem],
        out_specs=vmem,
        scratch_shapes=[
            pltpu.VMEM((B * T, H), jnp.float32),     # encoder hidden states
            pltpu.VMEM((Lm1 * B, H), jnp.float32),   # decoder (ox + sx) rows
        ],
    )(x_tm, y_tm, w_slab)

    # time-major rows (t*B + b) -> (B, L-1, V-1), matching torch.cat(out, dim=1)
    logits = out_tm[:, :Vm1].reshape(Lm1, B, Vm1)
    return jnp.transpose(logits, (1, 0, 2))


if __name__ == "__main__":
    B, T, FEAT = 2, 16, 13        # batch, acoustic frames, MFCC dim
    L = 8                         # label sequence length (decoder runs L-1 steps)
    H = 32                        # encoder/decoder hidden size (4H = 128)
    VOCAB = 11                    # vocab size (digits + end token)

    key = jax.random.PRNGKey(0)
    kp, kx, ky = jax.random.split(key, 3)
    params = init_params(kp, FEAT, VOCAB, H)
    w_slab, info = pack_params(params)      # packed once, outside the jit
    x = jax.random.normal(kx, (B, T, FEAT), jnp.float32)
    y = jax.random.randint(ky, (B, L), 0, VOCAB, dtype=jnp.int32)

    fwd = jax.jit(functools.partial(seq2seq_forward, info=info))
    out = fwd(w_slab, x, y)
    jax.block_until_ready(out)
    assert out.shape == (B, L - 1, VOCAB - 1), out.shape
    assert out.dtype == jnp.float32
    print("KERNEL_OK")
</pallas_src>

<mosaic_0001>
module attributes {stable_mosaic.version = 11 : i64} {
  func.func @seq2seq_kernel(%arg0: memref<32x16xf32, #tpu.memory_space<vmem>>, %arg1: memref<14x1xi32, #tpu.memory_space<vmem>>, %arg2: memref<184x128xf32, #tpu.memory_space<vmem>>, %arg3: memref<14x128xf32, #tpu.memory_space<vmem>>, %arg4: memref<32x32xf32, #tpu.memory_space<vmem>>, %arg5: memref<14x32xf32, #tpu.memory_space<vmem>>) attributes {dimension_semantics = [], scalar_prefetch = 0 : i64, scratch_operands = 2 : i64, tpu.core_type = #tpu.core_type<tc>} {
    %c16 = arith.constant 16 : index
    %c0 = arith.constant 0 : index
    %0 = vector.load %arg2[%c16, %c0] : memref<184x128xf32, #tpu.memory_space<vmem>>, vector<32x128xf32>
    %c72 = arith.constant 72 : index
    %c0_0 = arith.constant 0 : index
    %1 = vector.load %arg2[%c72, %c0_0] : memref<184x128xf32, #tpu.memory_space<vmem>>, vector<64x128xf32>
    %c0_1 = arith.constant 0 : index
    %c0_2 = arith.constant 0 : index
    %2 = vector.load %arg0[%c0_1, %c0_2] : memref<32x16xf32, #tpu.memory_space<vmem>>, vector<32x16xf32>
    %c0_3 = arith.constant 0 : index
    %c0_4 = arith.constant 0 : index
    %3 = vector.load %arg2[%c0_3, %c0_4] : memref<184x128xf32, #tpu.memory_space<vmem>>, vector<16x128xf32>
    %cst = arith.constant dense<0.000000e+00> : vector<32x128xf32>
    %4 = tpu.matmul %2, %3, %cst {dimension_numbers = #tpu.dot_dimension_numbers<[1], [0], [0], [1], [0, 0, 1, 1], [], []>} : vector<32x16xf32>, vector<16x128xf32>, vector<32x128xf32> -> vector<32x128xf32>
    %c48 = arith.constant 48 : index
    %c0_5 = arith.constant 0 : index
    %5 = vector.load %arg2[%c48, %c0_5] : memref<184x128xf32, #tpu.memory_space<vmem>>, vector<1x128xf32>
    %6 = vector.broadcast %5 : vector<1x128xf32> to vector<32x128xf32>
    %7 = arith.addf %4, %6 : vector<32x128xf32>
    %cst_6 = arith.constant 0.000000e+00 : f32
    %8 = vector.broadcast %cst_6 : f32 to vector<2x32xf32>
    %cst_7 = arith.constant 0.000000e+00 : f32
    %9 = vector.broadcast %cst_7 : f32 to vector<2x32xf32>
    %10 = vector.extract_strided_slice %7 {offsets = [0, 0], sizes = [2, 128], strides = [1, 1]} : vector<32x128xf32> to vector<2x128xf32>
    %cst_8 = arith.constant dense<0.000000e+00> : vector<2x128xf32>
    %11 = tpu.matmul %8, %0, %cst_8 {dimension_numbers = #tpu.dot_dimension_numbers<[1], [0], [0], [1], [0, 0, 1, 1], [], []>} : vector<2x32xf32>, vector<32x128xf32>, vector<2x128xf32> -> vector<2x128xf32>
    %12 = arith.addf %10, %11 : vector<2x128xf32>
    %cst_9 = arith.constant 0.000000e+00 : f32
    %13 = vector.broadcast %cst_9 : f32 to vector<2x128xf32>
    %14 = arith.subf %13, %12 : vector<2x128xf32>
    %15 = math.exp %14 : vector<2x128xf32>
    %cst_10 = arith.constant 1.000000e+00 : f32
    %16 = vector.broadcast %cst_10 : f32 to vector<2x128xf32>
    %17 = arith.addf %16, %15 : vector<2x128xf32>
    %cst_11 = arith.constant 1.000000e+00 : f32
    %18 = vector.broadcast %cst_11 : f32 to vector<2x128xf32>
    %19 = arith.divf %18, %17 : vector<2x128xf32>
    %20 = vector.extract_strided_slice %19 {offsets = [0, 0], sizes = [2, 32], strides = [1, 1]} : vector<2x128xf32> to vector<2x32xf32>
    %21 = vector.extract_strided_slice %19 {offsets = [0, 32], sizes = [2, 32], strides = [1, 1]} : vector<2x128xf32> to vector<2x32xf32>
    %22 = vector.extract_strided_slice %19 {offsets = [0, 96], sizes = [2, 32], strides = [1, 1]} : vector<2x128xf32> to vector<2x32xf32>
    %23 = vector.extract_strided_slice %12 {offsets = [0, 64], sizes = [2, 32], strides = [1, 1]} : vector<2x128xf32> to vector<2x32xf32>
    %24 = math.tanh %23 : vector<2x32xf32>
    %25 = arith.mulf %21, %9 : vector<2x32xf32>
    %26 = arith.mulf %20, %24 : vector<2x32xf32>
    %27 = arith.addf %25, %26 : vector<2x32xf32>
    %28 = math.tanh %27 : vector<2x32xf32>
    %29 = arith.mulf %22, %28 : vector<2x32xf32>
    %30 = vector.extract_strided_slice %29 {offsets = [0, 0], sizes = [1, 32], strides = [1, 1]} : vector<2x32xf32> to vector<1x32xf32>
    %c0_12 = arith.constant 0 : index
    %c0_13 = arith.constant 0 : index
    %31 = vector.load %arg4[%c0_12, %c0_13] : memref<32x32xf32, #tpu.memory_space<vmem>>, vector<1x32xf32>
    tpu.vector_store %arg4[%c0_12, %c0_13], %30 {strides = array<i32>} : memref<32x32xf32, #tpu.memory_space<vmem>>, vector<1x32xf32>,
    %32 = vector.extract_strided_slice %29 {offsets = [1, 0], sizes = [1, 32], strides = [1, 1]} : vector<2x32xf32> to vector<1x32xf32>
    %c16_14 = arith.constant 16 : index
    %c0_15 = arith.constant 0 : index
    %33 = vector.load %arg4[%c16_14, %c0_15] : memref<32x32xf32, #tpu.memory_space<vmem>>, vector<1x32xf32>
    tpu.vector_store %arg4[%c16_14, %c0_15], %32 {strides = array<i32>} : memref<32x32xf32, #tpu.memory_space<vmem>>, vector<1x32xf32>,
    %34 = vector.extract_strided_slice %7 {offsets = [2, 0], sizes = [2, 128], strides = [1, 1]} : vector<32x128xf32> to vector<2x128xf32>
    %cst_16 = arith.constant dense<0.000000e+00> : vector<2x128xf32>
    %35 = tpu.matmul %29, %0, %cst_16 {dimension_numbers = #tpu.dot_dimension_numbers<[1], [0], [0], [1], [0, 0, 1, 1], [], []>} : vector<2x32xf32>, vector<32x128xf32>, vector<2x128xf32> -> vector<2x128xf32>
    %36 = arith.addf %34, %35 : vector<2x128xf32>
    %cst_17 = arith.constant 0.000000e+00 : f32
    %37 = vector.broadcast %cst_17 : f32 to vector<2x128xf32>
    %38 = arith.subf %37, %36 : vector<2x128xf32>
    %39 = math.exp %38 : vector<2x128xf32>
    %cst_18 = arith.constant 1.000000e+00 : f32
    %40 = vector.broadcast %cst_18 : f32 to vector<2x128xf32>
    %41 = arith.addf %40, %39 : vector<2x128xf32>
    %cst_19 = arith.constant 1.000000e+00 : f32
    %42 = vector.broadcast %cst_19 : f32 to vector<2x128xf32>
    %43 = arith.divf %42, %41 : vector<2x128xf32>
    %44 = vector.extract_strided_slice %43 {offsets = [0, 0], sizes = [2, 32], strides = [1, 1]} : vector<2x128xf32> to vector<2x32xf32>
    %45 = vector.extract_strided_slice %43 {offsets = [0, 32], sizes = [2, 32], strides = [1, 1]} : vector<2x128xf32> to vector<2x32xf32>
    %46 = vector.extract_strided_slice %43 {offsets = [0, 96], sizes = [2, 32], strides = [1, 1]} : vector<2x128xf32> to vector<2x32xf32>
    %47 = vector.extract_strided_slice %36 {offsets = [0, 64], sizes = [2, 32], strides = [1, 1]} : vector<2x128xf32> to vector<2x32xf32>
    %48 = math.tanh %47 : vector<2x32xf32>
    %49 = arith.mulf %45, %27 : vector<2x32xf32>
    %50 = arith.mulf %44, %48 : vector<2x32xf32>
    %51 = arith.addf %49, %50 : vector<2x32xf32>
    %52 = math.tanh %51 : vector<2x32xf32>
    %53 = arith.mulf %46, %52 : vector<2x32xf32>
    %54 = vector.extract_strided_slice %53 {offsets = [0, 0], sizes = [1, 32], strides = [1, 1]} : vector<2x32xf32> to vector<1x32xf32>
    %c1 = arith.constant 1 : index
    %c0_20 = arith.constant 0 : index
    %55 = vector.load %arg4[%c1, %c0_20] : memref<32x32xf32, #tpu.memory_space<vmem>>, vector<1x32xf32>
    tpu.vector_store %arg4[%c1, %c0_20], %54 {strides = array<i32>} : memref<32x32xf32, #tpu.memory_space<vmem>>, vector<1x32xf32>,
    %56 = vector.extract_strided_slice %53 {offsets = [1, 0], sizes = [1, 32], strides = [1, 1]} : vector<2x32xf32> to vector<1x32xf32>
    %c17 = arith.constant 17 : index
    %c0_21 = arith.constant 0 : index
    %57 = vector.load %arg4[%c17, %c0_21] : memref<32x32xf32, #tpu.memory_space<vmem>>, vector<1x32xf32>
    tpu.vector_store %arg4[%c17, %c0_21], %56 {strides = array<i32>} : memref<32x32xf32, #tpu.memory_space<vmem>>, vector<1x32xf32>,
    %58 = vector.extract_strided_slice %7 {offsets = [4, 0], sizes = [2, 128], strides = [1, 1]} : vector<32x128xf32> to vector<2x128xf32>
    %cst_22 = arith.constant dense<0.000000e+00> : vector<2x128xf32>
    %59 = tpu.matmul %53, %0, %cst_22 {dimension_numbers = #tpu.dot_dimension_numbers<[1], [0], [0], [1], [0, 0, 1, 1], [], []>} : vector<2x32xf32>, vector<32x128xf32>, vector<2x128xf32> -> vector<2x128xf32>
    %60 = arith.addf %58, %59 : vector<2x128xf32>
    %cst_23 = arith.constant 0.000000e+00 : f32
    %61 = vector.broadcast %cst_23 : f32 to vector<2x128xf32>
    %62 = arith.subf %61, %60 : vector<2x128xf32>
    %63 = math.exp %62 : vector<2x128xf32>
    %cst_24 = arith.constant 1.000000e+00 : f32
    %64 = vector.broadcast %cst_24 : f32 to vector<2x128xf32>
    %65 = arith.addf %64, %63 : vector<2x128xf32>
    %cst_25 = arith.constant 1.000000e+00 : f32
    %66 = vector.broadcast %cst_25 : f32 to vector<2x128xf32>
    %67 = arith.divf %66, %65 : vector<2x128xf32>
    %68 = vector.extract_strided_slice %67 {offsets = [0, 0], sizes = [2, 32], strides = [1, 1]} : vector<2x128xf32> to vector<2x32xf32>
    %69 = vector.extract_strided_slice %67 {offsets = [0, 32], sizes = [2, 32], strides = [1, 1]} : vector<2x128xf32> to vector<2x32xf32>
    %70 = vector.extract_strided_slice %67 {offsets = [0, 96], sizes = [2, 32], strides = [1, 1]} : vector<2x128xf32> to vector<2x32xf32>
    %71 = vector.extract_strided_slice %60 {offsets = [0, 64], sizes = [2, 32], strides = [1, 1]} : vector<2x128xf32> to vector<2x32xf32>
    %72 = math.tanh %71 : vector<2x32xf32>
    %73 = arith.mulf %69, %51 : vector<2x32xf32>
    %74 = arith.mulf %68, %72 : vector<2x32xf32>
    %75 = arith.addf %73, %74 : vector<2x32xf32>
    %76 = math.tanh %75 : vector<2x32xf32>
    %77 = arith.mulf %70, %76 : vector<2x32xf32>
    %78 = vector.extract_strided_slice %77 {offsets = [0, 0], sizes = [1, 32], strides = [1, 1]} : vector<2x32xf32> to vector<1x32xf32>
    %c2 = arith.constant 2 : index
    %c0_26 = arith.constant 0 : index
    %79 = vector.load %arg4[%c2, %c0_26] : memref<32x32xf32, #tpu.memory_space<vmem>>, vector<1x32xf32>
    tpu.vector_store %arg4[%c2, %c0_26], %78 {strides = array<i32>} : memref<32x32xf32, #tpu.memory_space<vmem>>, vector<1x32xf32>,
    %80 = vector.extract_strided_slice %77 {offsets = [1, 0], sizes = [1, 32], strides = [1, 1]} : vector<2x32xf32> to vector<1x32xf32>
    %c18 = arith.constant 18 : index
    %c0_27 = arith.constant 0 : index
    %81 = vector.load %arg4[%c18, %c0_27] : memref<32x32xf32, #tpu.memory_space<vmem>>, vector<1x32xf32>
    tpu.vector_store %arg4[%c18, %c0_27], %80 {strides = array<i32>} : memref<32x32xf32, #tpu.memory_space<vmem>>, vector<1x32xf32>,
    %82 = vector.extract_strided_slice %7 {offsets = [6, 0], sizes = [2, 128], strides = [1, 1]} : vector<32x128xf32> to vector<2x128xf32>
    %cst_28 = arith.constant dense<0.000000e+00> : vector<2x128xf32>
    %83 = tpu.matmul %77, %0, %cst_28 {dimension_numbers = #tpu.dot_dimension_numbers<[1], [0], [0], [1], [0, 0, 1, 1], [], []>} : vector<2x32xf32>, vector<32x128xf32>, vector<2x128xf32> -> vector<2x128xf32>
    %84 = arith.addf %82, %83 : vector<2x128xf32>
    %cst_29 = arith.constant 0.000000e+00 : f32
    %85 = vector.broadcast %cst_29 : f32 to vector<2x128xf32>
    %86 = arith.subf %85, %84 : vector<2x128xf32>
    %87 = math.exp %86 : vector<2x128xf32>
    %cst_30 = arith.constant 1.000000e+00 : f32
    %88 = vector.broadcast %cst_30 : f32 to vector<2x128xf32>
    %89 = arith.addf %88, %87 : vector<2x128xf32>
    %cst_31 = arith.constant 1.000000e+00 : f32
    %90 = vector.broadcast %cst_31 : f32 to vector<2x128xf32>
    %91 = arith.divf %90, %89 : vector<2x128xf32>
    %92 = vector.extract_strided_slice %91 {offsets = [0, 0], sizes = [2, 32], strides = [1, 1]} : vector<2x128xf32> to vector<2x32xf32>
    %93 = vector.extract_strided_slice %91 {offsets = [0, 32], sizes = [2, 32], strides = [1, 1]} : vector<2x128xf32> to vector<2x32xf32>
    %94 = vector.extract_strided_slice %91 {offsets = [0, 96], sizes = [2, 32], strides = [1, 1]} : vector<2x128xf32> to vector<2x32xf32>
    %95 = vector.extract_strided_slice %84 {offsets = [0, 64], sizes = [2, 32], strides = [1, 1]} : vector<2x128xf32> to vector<2x32xf32>
    %96 = math.tanh %95 : vector<2x32xf32>
    %97 = arith.mulf %93, %75 : vector<2x32xf32>
    %98 = arith.mulf %92, %96 : vector<2x32xf32>
    %99 = arith.addf %97, %98 : vector<2x32xf32>
    %100 = math.tanh %99 : vector<2x32xf32>
    %101 = arith.mulf %94, %100 : vector<2x32xf32>
    %102 = vector.extract_strided_slice %101 {offsets = [0, 0], sizes = [1, 32], strides = [1, 1]} : vector<2x32xf32> to vector<1x32xf32>
    %c3 = arith.constant 3 : index
    %c0_32 = arith.constant 0 : index
    %103 = vector.load %arg4[%c3, %c0_32] : memref<32x32xf32, #tpu.memory_space<vmem>>, vector<1x32xf32>
    tpu.vector_store %arg4[%c3, %c0_32], %102 {strides = array<i32>} : memref<32x32xf32, #tpu.memory_space<vmem>>, vector<1x32xf32>,
    %104 = vector.extract_strided_slice %101 {offsets = [1, 0], sizes = [1, 32], strides = [1, 1]} : vector<2x32xf32> to vector<1x32xf32>
    %c19 = arith.constant 19 : index
    %c0_33 = arith.constant 0 : index
    %105 = vector.load %arg4[%c19, %c0_33] : memref<32x32xf32, #tpu.memory_space<vmem>>, vector<1x32xf32>
    tpu.vector_store %arg4[%c19, %c0_33], %104 {strides = array<i32>} : memref<32x32xf32, #tpu.memory_space<vmem>>, vector<1x32xf32>,
    %106 = vector.extract_strided_slice %7 {offsets = [8, 0], sizes = [2, 128], strides = [1, 1]} : vector<32x128xf32> to vector<2x128xf32>
    %cst_34 = arith.constant dense<0.000000e+00> : vector<2x128xf32>
    %107 = tpu.matmul %101, %0, %cst_34 {dimension_numbers = #tpu.dot_dimension_numbers<[1], [0], [0], [1], [0, 0, 1, 1], [], []>} : vector<2x32xf32>, vector<32x128xf32>, vector<2x128xf32> -> vector<2x128xf32>
    %108 = arith.addf %106, %107 : vector<2x128xf32>
    %cst_35 = arith.constant 0.000000e+00 : f32
    %109 = vector.broadcast %cst_35 : f32 to vector<2x128xf32>
    %110 = arith.subf %109, %108 : vector<2x128xf32>
    %111 = math.exp %110 : vector<2x128xf32>
    %cst_36 = arith.constant 1.000000e+00 : f32
    %112 = vector.broadcast %cst_36 : f32 to vector<2x128xf32>
    %113 = arith.addf %112, %111 : vector<2x128xf32>
    %cst_37 = arith.constant 1.000000e+00 : f32
    %114 = vector.broadcast %cst_37 : f32 to vector<2x128xf32>
    %115 = arith.divf %114, %113 : vector<2x128xf32>
    %116 = vector.extract_strided_slice %115 {offsets = [0, 0], sizes = [2, 32], strides = [1, 1]} : vector<2x128xf32> to vector<2x32xf32>
    %117 = vector.extract_strided_slice %115 {offsets = [0, 32], sizes = [2, 32], strides = [1, 1]} : vector<2x128xf32> to vector<2x32xf32>
    %118 = vector.extract_strided_slice %115 {offsets = [0, 96], sizes = [2, 32], strides = [1, 1]} : vector<2x128xf32> to vector<2x32xf32>
    %119 = vector.extract_strided_slice %108 {offsets = [0, 64], sizes = [2, 32], strides = [1, 1]} : vector<2x128xf32> to vector<2x32xf32>
    %120 = math.tanh %119 : vector<2x32xf32>
    %121 = arith.mulf %117, %99 : vector<2x32xf32>
    %122 = arith.mulf %116, %120 : vector<2x32xf32>
    %123 = arith.addf %121, %122 : vector<2x32xf32>
    %124 = math.tanh %123 : vector<2x32xf32>
    %125 = arith.mulf %118, %124 : vector<2x32xf32>
    %126 = vector.extract_strided_slice %125 {offsets = [0, 0], sizes = [1, 32], strides = [1, 1]} : vector<2x32xf32> to vector<1x32xf32>
    %c4 = arith.constant 4 : index
    %c0_38 = arith.constant 0 : index
    %127 = vector.load %arg4[%c4, %c0_38] : memref<32x32xf32, #tpu.memory_space<vmem>>, vector<1x32xf32>
    tpu.vector_store %arg4[%c4, %c0_38], %126 {strides = array<i32>} : memref<32x32xf32, #tpu.memory_space<vmem>>, vector<1x32xf32>,
    %128 = vector.extract_strided_slice %125 {offsets = [1, 0], sizes = [1, 32], strides = [1, 1]} : vector<2x32xf32> to vector<1x32xf32>
    %c20 = arith.constant 20 : index
    %c0_39 = arith.constant 0 : index
    %129 = vector.load %arg4[%c20, %c0_39] : memref<32x32xf32, #tpu.memory_space<vmem>>, vector<1x32xf32>
    tpu.vector_store %arg4[%c20, %c0_39], %128 {strides = array<i32>} : memref<32x32xf32, #tpu.memory_space<vmem>>, vector<1x32xf32>,
    %130 = vector.extract_strided_slice %7 {offsets = [10, 0], sizes = [2, 128], strides = [1, 1]} : vector<32x128xf32> to vector<2x128xf32>
    %cst_40 = arith.constant dense<0.000000e+00> : vector<2x128xf32>
    %131 = tpu.matmul %125, %0, %cst_40 {dimension_numbers = #tpu.dot_dimension_numbers<[1], [0], [0], [1], [0, 0, 1, 1], [], []>} : vector<2x32xf32>, vector<32x128xf32>, vector<2x128xf32> -> vector<2x128xf32>
    %132 = arith.addf %130, %131 : vector<2x128xf32>
    %cst_41 = arith.constant 0.000000e+00 : f32
    %133 = vector.broadcast %cst_41 : f32 to vector<2x128xf32>
    %134 = arith.subf %133, %132 : vector<2x128xf32>
    %135 = math.exp %134 : vector<2x128xf32>
    %cst_42 = arith.constant 1.000000e+00 : f32
    %136 = vector.broadcast %cst_42 : f32 to vector<2x128xf32>
    %137 = arith.addf %136, %135 : vector<2x128xf32>
    %cst_43 = arith.constant 1.000000e+00 : f32
    %138 = vector.broadcast %cst_43 : f32 to vector<2x128xf32>
    %139 = arith.divf %138, %137 : vector<2x128xf32>
    %140 = vector.extract_strided_slice %139 {offsets = [0, 0], sizes = [2, 32], strides = [1, 1]} : vector<2x128xf32> to vector<2x32xf32>
    %141 = vector.extract_strided_slice %139 {offsets = [0, 32], sizes = [2, 32], strides = [1, 1]} : vector<2x128xf32> to vector<2x32xf32>
    %142 = vector.extract_strided_slice %139 {offsets = [0, 96], sizes = [2, 32], strides = [1, 1]} : vector<2x128xf32> to vector<2x32xf32>
    %143 = vector.extract_strided_slice %132 {offsets = [0, 64], sizes = [2, 32], strides = [1, 1]} : vector<2x128xf32> to vector<2x32xf32>
    %144 = math.tanh %143 : vector<2x32xf32>
    %145 = arith.mulf %141, %123 : vector<2x32xf32>
    %146 = arith.mulf %140, %144 : vector<2x32xf32>
    %147 = arith.addf %145, %146 : vector<2x32xf32>
    %148 = math.tanh %147 : vector<2x32xf32>
    %149 = arith.mulf %142, %148 : vector<2x32xf32>
    %150 = vector.extract_strided_slice %149 {offsets = [0, 0], sizes = [1, 32], strides = [1, 1]} : vector<2x32xf32> to vector<1x32xf32>
    %c5 = arith.constant 5 : index
    %c0_44 = arith.constant 0 : index
    %151 = vector.load %arg4[%c5, %c0_44] : memref<32x32xf32, #tpu.memory_space<vmem>>, vector<1x32xf32>
    tpu.vector_store %arg4[%c5, %c0_44], %150 {strides = array<i32>} : memref<32x32xf32, #tpu.memory_space<vmem>>, vector<1x32xf32>,
    %152 = vector.extract_strided_slice %149 {offsets = [1, 0], sizes = [1, 32], strides = [1, 1]} : vector<2x32xf32> to vector<1x32xf32>
    %c21 = arith.constant 21 : index
    %c0_45 = arith.constant 0 : index
    %153 = vector.load %arg4[%c21, %c0_45] : memref<32x32xf32, #tpu.memory_space<vmem>>, vector<1x32xf32>
    tpu.vector_store %arg4[%c21, %c0_45], %152 {strides = array<i32>} : memref<32x32xf32, #tpu.memory_space<vmem>>, vector<1x32xf32>,
    %154 = vector.extract_strided_slice %7 {offsets = [12, 0], sizes = [2, 128], strides = [1, 1]} : vector<32x128xf32> to vector<2x128xf32>
    %cst_46 = arith.constant dense<0.000000e+00> : vector<2x128xf32>
    %155 = tpu.matmul %149, %0, %cst_46 {dimension_numbers = #tpu.dot_dimension_numbers<[1], [0], [0], [1], [0, 0, 1, 1], [], []>} : vector<2x32xf32>, vector<32x128xf32>, vector<2x128xf32> -> vector<2x128xf32>
    %156 = arith.addf %154, %155 : vector<2x128xf32>
    %cst_47 = arith.constant 0.000000e+00 : f32
    %157 = vector.broadcast %cst_47 : f32 to vector<2x128xf32>
    %158 = arith.subf %157, %156 : vector<2x128xf32>
    %159 = math.exp %158 : vector<2x128xf32>
    %cst_48 = arith.constant 1.000000e+00 : f32
    %160 = vector.broadcast %cst_48 : f32 to vector<2x128xf32>
    %161 = arith.addf %160, %159 : vector<2x128xf32>
    %cst_49 = arith.constant 1.000000e+00 : f32
    %162 = vector.broadcast %cst_49 : f32 to vector<2x128xf32>
    %163 = arith.divf %162, %161 : vector<2x128xf32>
    %164 = vector.extract_strided_slice %163 {offsets = [0, 0], sizes = [2, 32], strides = [1, 1]} : vector<2x128xf32> to vector<2x32xf32>
    %165 = vector.extract_strided_slice %163 {offsets = [0, 32], sizes = [2, 32], strides = [1, 1]} : vector<2x128xf32> to vector<2x32xf32>
    %166 = vector.extract_strided_slice %163 {offsets = [0, 96], sizes = [2, 32], strides = [1, 1]} : vector<2x128xf32> to vector<2x32xf32>
    %167 = vector.extract_strided_slice %156 {offsets = [0, 64], sizes = [2, 32], strides = [1, 1]} : vector<2x128xf32> to vector<2x32xf32>
    %168 = math.tanh %167 : vector<2x32xf32>
    %169 = arith.mulf %165, %147 : vector<2x32xf32>
    %170 = arith.mulf %164, %168 : vector<2x32xf32>
    %171 = arith.addf %169, %170 : vector<2x32xf32>
    %172 = math.tanh %171 : vector<2x32xf32>
    %173 = arith.mulf %166, %172 : vector<2x32xf32>
    %174 = vector.extract_strided_slice %173 {offsets = [0, 0], sizes = [1, 32], strides = [1, 1]} : vector<2x32xf32> to vector<1x32xf32>
    %c6 = arith.constant 6 : index
    %c0_50 = arith.constant 0 : index
    %175 = vector.load %arg4[%c6, %c0_50] : memref<32x32xf32, #tpu.memory_space<vmem>>, vector<1x32xf32>
    tpu.vector_store %arg4[%c6, %c0_50], %174 {strides = array<i32>} : memref<32x32xf32, #tpu.memory_space<vmem>>, vector<1x32xf32>,
    %176 = vector.extract_strided_slice %173 {offsets = [1, 0], sizes = [1, 32], strides = [1, 1]} : vector<2x32xf32> to vector<1x32xf32>
    %c22 = arith.constant 22 : index
    %c0_51 = arith.constant 0 : index
    %177 = vector.load %arg4[%c22, %c0_51] : memref<32x32xf32, #tpu.memory_space<vmem>>, vector<1x32xf32>
    tpu.vector_store %arg4[%c22, %c0_51], %176 {strides = array<i32>} : memref<32x32xf32, #tpu.memory_space<vmem>>, vector<1x32xf32>,
    %178 = vector.extract_strided_slice %7 {offsets = [14, 0], sizes = [2, 128], strides = [1, 1]} : vector<32x128xf32> to vector<2x128xf32>
    %cst_52 = arith.constant dense<0.000000e+00> : vector<2x128xf32>
    %179 = tpu.matmul %173, %0, %cst_52 {dimension_numbers = #tpu.dot_dimension_numbers<[1], [0], [0], [1], [0, 0, 1, 1], [], []>} : vector<2x32xf32>, vector<32x128xf32>, vector<2x128xf32> -> vector<2x128xf32>
    %180 = arith.addf %178, %179 : vector<2x128xf32>
    %cst_53 = arith.constant 0.000000e+00 : f32
    %181 = vector.broadcast %cst_53 : f32 to vector<2x128xf32>
    %182 = arith.subf %181, %180 : vector<2x128xf32>
    %183 = math.exp %182 : vector<2x128xf32>
    %cst_54 = arith.constant 1.000000e+00 : f32
    %184 = vector.broadcast %cst_54 : f32 to vector<2x128xf32>
    %185 = arith.addf %184, %183 : vector<2x128xf32>
    %cst_55 = arith.constant 1.000000e+00 : f32
    %186 = vector.broadcast %cst_55 : f32 to vector<2x128xf32>
    %187 = arith.divf %186, %185 : vector<2x128xf32>
    %188 = vector.extract_strided_slice %187 {offsets = [0, 0], sizes = [2, 32], strides = [1, 1]} : vector<2x128xf32> to vector<2x32xf32>
    %189 = vector.extract_strided_slice %187 {offsets = [0, 32], sizes = [2, 32], strides = [1, 1]} : vector<2x128xf32> to vector<2x32xf32>
    %190 = vector.extract_strided_slice %187 {offsets = [0, 96], sizes = [2, 32], strides = [1, 1]} : vector<2x128xf32> to vector<2x32xf32>
    %191 = vector.extract_strided_slice %180 {offsets = [0, 64], sizes = [2, 32], strides = [1, 1]} : vector<2x128xf32> to vector<2x32xf32>
    %192 = math.tanh %191 : vector<2x32xf32>
    %193 = arith.mulf %189, %171 : vector<2x32xf32>
    %194 = arith.mulf %188, %192 : vector<2x32xf32>
    %195 = arith.addf %193, %194 : vector<2x32xf32>
    %196 = math.tanh %195 : vector<2x32xf32>
    %197 = arith.mulf %190, %196 : vector<2x32xf32>
    %198 = vector.extract_strided_slice %197 {offsets = [0, 0], sizes = [1, 32], strides = [1, 1]} : vector<2x32xf32> to vector<1x32xf32>
    %c7 = arith.constant 7 : index
    %c0_56 = arith.constant 0 : index
    %199 = vector.load %arg4[%c7, %c0_56] : memref<32x32xf32, #tpu.memory_space<vmem>>, vector<1x32xf32>
    tpu.vector_store %arg4[%c7, %c0_56], %198 {strides = array<i32>} : memref<32x32xf32, #tpu.memory_space<vmem>>, vector<1x32xf32>,
    %200 = vector.extract_strided_slice %197 {offsets = [1, 0], sizes = [1, 32], strides = [1, 1]} : vector<2x32xf32> to vector<1x32xf32>
    %c23 = arith.constant 23 : index
    %c0_57 = arith.constant 0 : index
    %201 = vector.load %arg4[%c23, %c0_57] : memref<32x32xf32, #tpu.memory_space<vmem>>, vector<1x32xf32>
    tpu.vector_store %arg4[%c23, %c0_57], %200 {strides = array<i32>} : memref<32x32xf32, #tpu.memory_space<vmem>>, vector<1x32xf32>,
    %202 = vector.extract_strided_slice %7 {offsets = [16, 0], sizes = [2, 128], strides = [1, 1]} : vector<32x128xf32> to vector<2x128xf32>
    %cst_58 = arith.constant dense<0.000000e+00> : vector<2x128xf32>
    %203 = tpu.matmul %197, %0, %cst_58 {dimension_numbers = #tpu.dot_dimension_numbers<[1], [0], [0], [1], [0, 0, 1, 1], [], []>} : vector<2x32xf32>, vector<32x128xf32>, vector<2x128xf32> -> vector<2x128xf32>
    %204 = arith.addf %202, %203 : vector<2x128xf32>
    %cst_59 = arith.constant 0.000000e+00 : f32
    %205 = vector.broadcast %cst_59 : f32 to vector<2x128xf32>
    %206 = arith.subf %205, %204 : vector<2x128xf32>
    %207 = math.exp %206 : vector<2x128xf32>
    %cst_60 = arith.constant 1.000000e+00 : f32
    %208 = vector.broadcast %cst_60 : f32 to vector<2x128xf32>
    %209 = arith.addf %208, %207 : vector<2x128xf32>
    %cst_61 = arith.constant 1.000000e+00 : f32
    %210 = vector.broadcast %cst_61 : f32 to vector<2x128xf32>
    %211 = arith.divf %210, %209 : vector<2x128xf32>
    %212 = vector.extract_strided_slice %211 {offsets = [0, 0], sizes = [2, 32], strides = [1, 1]} : vector<2x128xf32> to vector<2x32xf32>
    %213 = vector.extract_strided_slice %211 {offsets = [0, 32], sizes = [2, 32], strides = [1, 1]} : vector<2x128xf32> to vector<2x32xf32>
    %214 = vector.extract_strided_slice %211 {offsets = [0, 96], sizes = [2, 32], strides = [1, 1]} : vector<2x128xf32> to vector<2x32xf32>
    %215 = vector.extract_strided_slice %204 {offsets = [0, 64], sizes = [2, 32], strides = [1, 1]} : vector<2x128xf32> to vector<2x32xf32>
    %216 = math.tanh %215 : vector<2x32xf32>
    %217 = arith.mulf %213, %195 : vector<2x32xf32>
    %218 = arith.mulf %212, %216 : vector<2x32xf32>
    %219 = arith.addf %217, %218 : vector<2x32xf32>
    %220 = math.tanh %219 : vector<2x32xf32>
    %221 = arith.mulf %214, %220 : vector<2x32xf32>
    %222 = vector.extract_strided_slice %221 {offsets = [0, 0], sizes = [1, 32], strides = [1, 1]} : vector<2x32xf32> to vector<1x32xf32>
    %c8 = arith.constant 8 : index
    %c0_62 = arith.constant 0 : index
    %223 = vector.load %arg4[%c8, %c0_62] : memref<32x32xf32, #tpu.memory_space<vmem>>, vector<1x32xf32>
    tpu.vector_store %arg4[%c8, %c0_62], %222 {strides = array<i32>} : memref<32x32xf32, #tpu.memory_space<vmem>>, vector<1x32xf32>,
    %224 = vector.extract_strided_slice %221 {offsets = [1, 0], sizes = [1, 32], strides = [1, 1]} : vector<2x32xf32> to vector<1x32xf32>
    %c24 = arith.constant 24 : index
    %c0_63 = arith.constant 0 : index
    %225 = vector.load %arg4[%c24, %c0_63] : memref<32x32xf32, #tpu.memory_space<vmem>>, vector<1x32xf32>
    tpu.vector_store %arg4[%c24, %c0_63], %224 {strides = array<i32>} : memref<32x32xf32, #tpu.memory_space<vmem>>, vector<1x32xf32>,
    %226 = vector.extract_strided_slice %7 {offsets = [18, 0], sizes = [2, 128], strides = [1, 1]} : vector<32x128xf32> to vector<2x128xf32>
    %cst_64 = arith.constant dense<0.000000e+00> : vector<2x128xf32>
    %227 = tpu.matmul %221, %0, %cst_64 {dimension_numbers = #tpu.dot_dimension_numbers<[1], [0], [0], [1], [0, 0, 1, 1], [], []>} : vector<2x32xf32>, vector<32x128xf32>, vector<2x128xf32> -> vector<2x128xf32>
    %228 = arith.addf %226, %227 : vector<2x128xf32>
    %cst_65 = arith.constant 0.000000e+00 : f32
    %229 = vector.broadcast %cst_65 : f32 to vector<2x128xf32>
    %230 = arith.subf %229, %228 : vector<2x128xf32>
    %231 = math.exp %230 : vector<2x128xf32>
    %cst_66 = arith.constant 1.000000e+00 : f32
    %232 = vector.broadcast %cst_66 : f32 to vector<2x128xf32>
    %233 = arith.addf %232, %231 : vector<2x128xf32>
    %cst_67 = arith.constant 1.000000e+00 : f32
    %234 = vector.broadcast %cst_67 : f32 to vector<2x128xf32>
    %235 = arith.divf %234, %233 : vector<2x128xf32>
    %236 = vector.extract_strided_slice %235 {offsets = [0, 0], sizes = [2, 32], strides = [1, 1]} : vector<2x128xf32> to vector<2x32xf32>
    %237 = vector.extract_strided_slice %235 {offsets = [0, 32], sizes = [2, 32], strides = [1, 1]} : vector<2x128xf32> to vector<2x32xf32>
    %238 = vector.extract_strided_slice %235 {offsets = [0, 96], sizes = [2, 32], strides = [1, 1]} : vector<2x128xf32> to vector<2x32xf32>
    %239 = vector.extract_strided_slice %228 {offsets = [0, 64], sizes = [2, 32], strides = [1, 1]} : vector<2x128xf32> to vector<2x32xf32>
    %240 = math.tanh %239 : vector<2x32xf32>
    %241 = arith.mulf %237, %219 : vector<2x32xf32>
    %242 = arith.mulf %236, %240 : vector<2x32xf32>
    %243 = arith.addf %241, %242 : vector<2x32xf32>
    %244 = math.tanh %243 : vector<2x32xf32>
    %245 = arith.mulf %238, %244 : vector<2x32xf32>
    %246 = vector.extract_strided_slice %245 {offsets = [0, 0], sizes = [1, 32], strides = [1, 1]} : vector<2x32xf32> to vector<1x32xf32>
    %c9 = arith.constant 9 : index
    %c0_68 = arith.constant 0 : index
    %247 = vector.load %arg4[%c9, %c0_68] : memref<32x32xf32, #tpu.memory_space<vmem>>, vector<1x32xf32>
    tpu.vector_store %arg4[%c9, %c0_68], %246 {strides = array<i32>} : memref<32x32xf32, #tpu.memory_space<vmem>>, vector<1x32xf32>,
    %248 = vector.extract_strided_slice %245 {offsets = [1, 0], sizes = [1, 32], strides = [1, 1]} : vector<2x32xf32> to vector<1x32xf32>
    %c25 = arith.constant 25 : index
    %c0_69 = arith.constant 0 : index
    %249 = vector.load %arg4[%c25, %c0_69] : memref<32x32xf32, #tpu.memory_space<vmem>>, vector<1x32xf32>
    tpu.vector_store %arg4[%c25, %c0_69], %248 {strides = array<i32>} : memref<32x32xf32, #tpu.memory_space<vmem>>, vector<1x32xf32>,
    %250 = vector.extract_strided_slice %7 {offsets = [20, 0], sizes = [2, 128], strides = [1, 1]} : vector<32x128xf32> to vector<2x128xf32>
    %cst_70 = arith.constant dense<0.000000e+00> : vector<2x128xf32>
    %251 = tpu.matmul %245, %0, %cst_70 {dimension_numbers = #tpu.dot_dimension_numbers<[1], [0], [0], [1], [0, 0, 1, 1], [], []>} : vector<2x32xf32>, vector<32x128xf32>, vector<2x128xf32> -> vector<2x128xf32>
    %252 = arith.addf %250, %251 : vector<2x128xf32>
    %cst_71 = arith.constant 0.000000e+00 : f32
    %253 = vector.broadcast %cst_71 : f32 to vector<2x128xf32>
    %254 = arith.subf %253, %252 : vector<2x128xf32>
    %255 = math.exp %254 : vector<2x128xf32>
    %cst_72 = arith.constant 1.000000e+00 : f32
    %256 = vector.broadcast %cst_72 : f32 to vector<2x128xf32>
    %257 = arith.addf %256, %255 : vector<2x128xf32>
    %cst_73 = arith.constant 1.000000e+00 : f32
    %258 = vector.broadcast %cst_73 : f32 to vector<2x128xf32>
    %259 = arith.divf %258, %257 : vector<2x128xf32>
    %260 = vector.extract_strided_slice %259 {offsets = [0, 0], sizes = [2, 32], strides = [1, 1]} : vector<2x128xf32> to vector<2x32xf32>
    %261 = vector.extract_strided_slice %259 {offsets = [0, 32], sizes = [2, 32], strides = [1, 1]} : vector<2x128xf32> to vector<2x32xf32>
    %262 = vector.extract_strided_slice %259 {offsets = [0, 96], sizes = [2, 32], strides = [1, 1]} : vector<2x128xf32> to vector<2x32xf32>
    %263 = vector.extract_strided_slice %252 {offsets = [0, 64], sizes = [2, 32], strides = [1, 1]} : vector<2x128xf32> to vector<2x32xf32>
    %264 = math.tanh %263 : vector<2x32xf32>
    %265 = arith.mulf %261, %243 : vector<2x32xf32>
    %266 = arith.mulf %260, %264 : vector<2x32xf32>
    %267 = arith.addf %265, %266 : vector<2x32xf32>
    %268 = math.tanh %267 : vector<2x32xf32>
    %269 = arith.mulf %262, %268 : vector<2x32xf32>
    %270 = vector.extract_strided_slice %269 {offsets = [0, 0], sizes = [1, 32], strides = [1, 1]} : vector<2x32xf32> to vector<1x32xf32>
    %c10 = arith.constant 10 : index
    %c0_74 = arith.constant 0 : index
    %271 = vector.load %arg4[%c10, %c0_74] : memref<32x32xf32, #tpu.memory_space<vmem>>, vector<1x32xf32>
    tpu.vector_store %arg4[%c10, %c0_74], %270 {strides = array<i32>} : memref<32x32xf32, #tpu.memory_space<vmem>>, vector<1x32xf32>,
    %272 = vector.extract_strided_slice %269 {offsets = [1, 0], sizes = [1, 32], strides = [1, 1]} : vector<2x32xf32> to vector<1x32xf32>
    %c26 = arith.constant 26 : index
    %c0_75 = arith.constant 0 : index
    %273 = vector.load %arg4[%c26, %c0_75] : memref<32x32xf32, #tpu.memory_space<vmem>>, vector<1x32xf32>
    tpu.vector_store %arg4[%c26, %c0_75], %272 {strides = array<i32>} : memref<32x32xf32, #tpu.memory_space<vmem>>, vector<1x32xf32>,
    %274 = vector.extract_strided_slice %7 {offsets = [22, 0], sizes = [2, 128], strides = [1, 1]} : vector<32x128xf32> to vector<2x128xf32>
    %cst_76 = arith.constant dense<0.000000e+00> : vector<2x128xf32>
    %275 = tpu.matmul %269, %0, %cst_76 {dimension_numbers = #tpu.dot_dimension_numbers<[1], [0], [0], [1], [0, 0, 1, 1], [], []>} : vector<2x32xf32>, vector<32x128xf32>, vector<2x128xf32> -> vector<2x128xf32>
    %276 = arith.addf %274, %275 : vector<2x128xf32>
    %cst_77 = arith.constant 0.000000e+00 : f32
    %277 = vector.broadcast %cst_77 : f32 to vector<2x128xf32>
    %278 = arith.subf %277, %276 : vector<2x128xf32>
    %279 = math.exp %278 : vector<2x128xf32>
    %cst_78 = arith.constant 1.000000e+00 : f32
    %280 = vector.broadcast %cst_78 : f32 to vector<2x128xf32>
    %281 = arith.addf %280, %279 : vector<2x128xf32>
    %cst_79 = arith.constant 1.000000e+00 : f32
    %282 = vector.broadcast %cst_79 : f32 to vector<2x128xf32>
    %283 = arith.divf %282, %281 : vector<2x128xf32>
    %284 = vector.extract_strided_slice %283 {offsets = [0, 0], sizes = [2, 32], strides = [1, 1]} : vector<2x128xf32> to vector<2x32xf32>
    %285 = vector.extract_strided_slice %283 {offsets = [0, 32], sizes = [2, 32], strides = [1, 1]} : vector<2x128xf32> to vector<2x32xf32>
    %286 = vector.extract_strided_slice %283 {offsets = [0, 96], sizes = [2, 32], strides = [1, 1]} : vector<2x128xf32> to vector<2x32xf32>
    %287 = vector.extract_strided_slice %276 {offsets = [0, 64], sizes = [2, 32], strides = [1, 1]} : vector<2x128xf32> to vector<2x32xf32>
    %288 = math.tanh %287 : vector<2x32xf32>
    %289 = arith.mulf %285, %267 : vector<2x32xf32>
    %290 = arith.mulf %284, %288 : vector<2x32xf32>
    %291 = arith.addf %289, %290 : vector<2x32xf32>
    %292 = math.tanh %291 : vector<2x32xf32>
    %293 = arith.mulf %286, %292 : vector<2x32xf32>
    %294 = vector.extract_strided_slice %293 {offsets = [0, 0], sizes = [1, 32], strides = [1, 1]} : vector<2x32xf32> to vector<1x32xf32>
    %c11 = arith.constant 11 : index
    %c0_80 = arith.constant 0 : index
    %295 = vector.load %arg4[%c11, %c0_80] : memref<32x32xf32, #tpu.memory_space<vmem>>, vector<1x32xf32>
    tpu.vector_store %arg4[%c11, %c0_80], %294 {strides = array<i32>} : memref<32x32xf32, #tpu.memory_space<vmem>>, vector<1x32xf32>,
    %296 = vector.extract_strided_slice %293 {offsets = [1, 0], sizes = [1, 32], strides = [1, 1]} : vector<2x32xf32> to vector<1x32xf32>
    %c27 = arith.constant 27 : index
    %c0_81 = arith.constant 0 : index
    %297 = vector.load %arg4[%c27, %c0_81] : memref<32x32xf32, #tpu.memory_space<vmem>>, vector<1x32xf32>
    tpu.vector_store %arg4[%c27, %c0_81], %296 {strides = array<i32>} : memref<32x32xf32, #tpu.memory_space<vmem>>, vector<1x32xf32>,
    %298 = vector.extract_strided_slice %7 {offsets = [24, 0], sizes = [2, 128], strides = [1, 1]} : vector<32x128xf32> to vector<2x128xf32>
    %cst_82 = arith.constant dense<0.000000e+00> : vector<2x128xf32>
    %299 = tpu.matmul %293, %0, %cst_82 {dimension_numbers = #tpu.dot_dimension_numbers<[1], [0], [0], [1], [0, 0, 1, 1], [], []>} : vector<2x32xf32>, vector<32x128xf32>, vector<2x128xf32> -> vector<2x128xf32>
    %300 = arith.addf %298, %299 : vector<2x128xf32>
    %cst_83 = arith.constant 0.000000e+00 : f32
    %301 = vector.broadcast %cst_83 : f32 to vector<2x128xf32>
    %302 = arith.subf %301, %300 : vector<2x128xf32>
    %303 = math.exp %302 : vector<2x128xf32>
    %cst_84 = arith.constant 1.000000e+00 : f32
    %304 = vector.broadcast %cst_84 : f32 to vector<2x128xf32>
    %305 = arith.addf %304, %303 : vector<2x128xf32>
    %cst_85 = arith.constant 1.000000e+00 : f32
    %306 = vector.broadcast %cst_85 : f32 to vector<2x128xf32>
    %307 = arith.divf %306, %305 : vector<2x128xf32>
    %308 = vector.extract_strided_slice %307 {offsets = [0, 0], sizes = [2, 32], strides = [1, 1]} : vector<2x128xf32> to vector<2x32xf32>
    %309 = vector.extract_strided_slice %307 {offsets = [0, 32], sizes = [2, 32], strides = [1, 1]} : vector<2x128xf32> to vector<2x32xf32>
    %310 = vector.extract_strided_slice %307 {offsets = [0, 96], sizes = [2, 32], strides = [1, 1]} : vector<2x128xf32> to vector<2x32xf32>
    %311 = vector.extract_strided_slice %300 {offsets = [0, 64], sizes = [2, 32], strides = [1, 1]} : vector<2x128xf32> to vector<2x32xf32>
    %312 = math.tanh %311 : vector<2x32xf32>
    %313 = arith.mulf %309, %291 : vector<2x32xf32>
    %314 = arith.mulf %308, %312 : vector<2x32xf32>
    %315 = arith.addf %313, %314 : vector<2x32xf32>
    %316 = math.tanh %315 : vector<2x32xf32>
    %317 = arith.mulf %310, %316 : vector<2x32xf32>
    %318 = vector.extract_strided_slice %317 {offsets = [0, 0], sizes = [1, 32], strides = [1, 1]} : vector<2x32xf32> to vector<1x32xf32>
    %c12 = arith.constant 12 : index
    %c0_86 = arith.constant 0 : index
    %319 = vector.load %arg4[%c12, %c0_86] : memref<32x32xf32, #tpu.memory_space<vmem>>, vector<1x32xf32>
    tpu.vector_store %arg4[%c12, %c0_86], %318 {strides = array<i32>} : memref<32x32xf32, #tpu.memory_space<vmem>>, vector<1x32xf32>,
    %320 = vector.extract_strided_slice %317 {offsets = [1, 0], sizes = [1, 32], strides = [1, 1]} : vector<2x32xf32> to vector<1x32xf32>
    %c28 = arith.constant 28 : index
    %c0_87 = arith.constant 0 : index
    %321 = vector.load %arg4[%c28, %c0_87] : memref<32x32xf32, #tpu.memory_space<vmem>>, vector<1x32xf32>
    tpu.vector_store %arg4[%c28, %c0_87], %320 {strides = array<i32>} : memref<32x32xf32, #tpu.memory_space<vmem>>, vector<1x32xf32>,
    %322 = vector.extract_strided_slice %7 {offsets = [26, 0], sizes = [2, 128], strides = [1, 1]} : vector<32x128xf32> to vector<2x128xf32>
    %cst_88 = arith.constant dense<0.000000e+00> : vector<2x128xf32>
    %323 = tpu.matmul %317, %0, %cst_88 {dimension_numbers = #tpu.dot_dimension_numbers<[1], [0], [0], [1], [0, 0, 1, 1], [], []>} : vector<2x32xf32>, vector<32x128xf32>, vector<2x128xf32> -> vector<2x128xf32>
    %324 = arith.addf %322, %323 : vector<2x128xf32>
    %cst_89 = arith.constant 0.000000e+00 : f32
    %325 = vector.broadcast %cst_89 : f32 to vector<2x128xf32>
    %326 = arith.subf %325, %324 : vector<2x128xf32>
    %327 = math.exp %326 : vector<2x128xf32>
    %cst_90 = arith.constant 1.000000e+00 : f32
    %328 = vector.broadcast %cst_90 : f32 to vector<2x128xf32>
    %329 = arith.addf %328, %327 : vector<2x128xf32>
    %cst_91 = arith.constant 1.000000e+00 : f32
    %330 = vector.broadcast %cst_91 : f32 to vector<2x128xf32>
    %331 = arith.divf %330, %329 : vector<2x128xf32>
    %332 = vector.extract_strided_slice %331 {offsets = [0, 0], sizes = [2, 32], strides = [1, 1]} : vector<2x128xf32> to vector<2x32xf32>
    %333 = vector.extract_strided_slice %331 {offsets = [0, 32], sizes = [2, 32], strides = [1, 1]} : vector<2x128xf32> to vector<2x32xf32>
    %334 = vector.extract_strided_slice %331 {offsets = [0, 96], sizes = [2, 32], strides = [1, 1]} : vector<2x128xf32> to vector<2x32xf32>
    %335 = vector.extract_strided_slice %324 {offsets = [0, 64], sizes = [2, 32], strides = [1, 1]} : vector<2x128xf32> to vector<2x32xf32>
    %336 = math.tanh %335 : vector<2x32xf32>
    %337 = arith.mulf %333, %315 : vector<2x32xf32>
    %338 = arith.mulf %332, %336 : vector<2x32xf32>
    %339 = arith.addf %337, %338 : vector<2x32xf32>
    %340 = math.tanh %339 : vector<2x32xf32>
    %341 = arith.mulf %334, %340 : vector<2x32xf32>
    %342 = vector.extract_strided_slice %341 {offsets = [0, 0], sizes = [1, 32], strides = [1, 1]} : vector<2x32xf32> to vector<1x32xf32>
    %c13 = arith.constant 13 : index
    %c0_92 = arith.constant 0 : index
    %343 = vector.load %arg4[%c13, %c0_92] : memref<32x32xf32, #tpu.memory_space<vmem>>, vector<1x32xf32>
    tpu.vector_store %arg4[%c13, %c0_92], %342 {strides = array<i32>} : memref<32x32xf32, #tpu.memory_space<vmem>>, vector<1x32xf32>,
    %344 = vector.extract_strided_slice %341 {offsets = [1, 0], sizes = [1, 32], strides = [1, 1]} : vector<2x32xf32> to vector<1x32xf32>
    %c29 = arith.constant 29 : index
    %c0_93 = arith.constant 0 : index
    %345 = vector.load %arg4[%c29, %c0_93] : memref<32x32xf32, #tpu.memory_space<vmem>>, vector<1x32xf32>
    tpu.vector_store %arg4[%c29, %c0_93], %344 {strides = array<i32>} : memref<32x32xf32, #tpu.memory_space<vmem>>, vector<1x32xf32>,
    %346 = vector.extract_strided_slice %7 {offsets = [28, 0], sizes = [2, 128], strides = [1, 1]} : vector<32x128xf32> to vector<2x128xf32>
    %cst_94 = arith.constant dense<0.000000e+00> : vector<2x128xf32>
    %347 = tpu.matmul %341, %0, %cst_94 {dimension_numbers = #tpu.dot_dimension_numbers<[1], [0], [0], [1], [0, 0, 1, 1], [], []>} : vector<2x32xf32>, vector<32x128xf32>, vector<2x128xf32> -> vector<2x128xf32>
    %348 = arith.addf %346, %347 : vector<2x128xf32>
    %cst_95 = arith.constant 0.000000e+00 : f32
    %349 = vector.broadcast %cst_95 : f32 to vector<2x128xf32>
    %350 = arith.subf %349, %348 : vector<2x128xf32>
    %351 = math.exp %350 : vector<2x128xf32>
    %cst_96 = arith.constant 1.000000e+00 : f32
    %352 = vector.broadcast %cst_96 : f32 to vector<2x128xf32>
    %353 = arith.addf %352, %351 : vector<2x128xf32>
    %cst_97 = arith.constant 1.000000e+00 : f32
    %354 = vector.broadcast %cst_97 : f32 to vector<2x128xf32>
    %355 = arith.divf %354, %353 : vector<2x128xf32>
    %356 = vector.extract_strided_slice %355 {offsets = [0, 0], sizes = [2, 32], strides = [1, 1]} : vector<2x128xf32> to vector<2x32xf32>
    %357 = vector.extract_strided_slice %355 {offsets = [0, 32], sizes = [2, 32], strides = [1, 1]} : vector<2x128xf32> to vector<2x32xf32>
    %358 = vector.extract_strided_slice %355 {offsets = [0, 96], sizes = [2, 32], strides = [1, 1]} : vector<2x128xf32> to vector<2x32xf32>
    %359 = vector.extract_strided_slice %348 {offsets = [0, 64], sizes = [2, 32], strides = [1, 1]} : vector<2x128xf32> to vector<2x32xf32>
    %360 = math.tanh %359 : vector<2x32xf32>
    %361 = arith.mulf %357, %339 : vector<2x32xf32>
    %362 = arith.mulf %356, %360 : vector<2x32xf32>
    %363 = arith.addf %361, %362 : vector<2x32xf32>
    %364 = math.tanh %363 : vector<2x32xf32>
    %365 = arith.mulf %358, %364 : vector<2x32xf32>
    %366 = vector.extract_strided_slice %365 {offsets = [0, 0], sizes = [1, 32], strides = [1, 1]} : vector<2x32xf32> to vector<1x32xf32>
    %c14 = arith.constant 14 : index
    %c0_98 = arith.constant 0 : index
    %367 = vector.load %arg4[%c14, %c0_98] : memref<32x32xf32, #tpu.memory_space<vmem>>, vector<1x32xf32>
    tpu.vector_store %arg4[%c14, %c0_98], %366 {strides = array<i32>} : memref<32x32xf32, #tpu.memory_space<vmem>>, vector<1x32xf32>,
    %368 = vector.extract_strided_slice %365 {offsets = [1, 0], sizes = [1, 32], strides = [1, 1]} : vector<2x32xf32> to vector<1x32xf32>
    %c30 = arith.constant 30 : index
    %c0_99 = arith.constant 0 : index
    %369 = vector.load %arg4[%c30, %c0_99] : memref<32x32xf32, #tpu.memory_space<vmem>>, vector<1x32xf32>
    tpu.vector_store %arg4[%c30, %c0_99], %368 {strides = array<i32>} : memref<32x32xf32, #tpu.memory_space<vmem>>, vector<1x32xf32>,
    %370 = vector.extract_strided_slice %7 {offsets = [30, 0], sizes = [2, 128], strides = [1, 1]} : vector<32x128xf32> to vector<2x128xf32>
    %cst_100 = arith.constant dense<0.000000e+00> : vector<2x128xf32>
    %371 = tpu.matmul %365, %0, %cst_100 {dimension_numbers = #tpu.dot_dimension_numbers<[1], [0], [0], [1], [0, 0, 1, 1], [], []>} : vector<2x32xf32>, vector<32x128xf32>, vector<2x128xf32> -> vector<2x128xf32>
    %372 = arith.addf %370, %371 : vector<2x128xf32>
    %cst_101 = arith.constant 0.000000e+00 : f32
    %373 = vector.broadcast %cst_101 : f32 to vector<2x128xf32>
    %374 = arith.subf %373, %372 : vector<2x128xf32>
    %375 = math.exp %374 : vector<2x128xf32>
    %cst_102 = arith.constant 1.000000e+00 : f32
    %376 = vector.broadcast %cst_102 : f32 to vector<2x128xf32>
    %377 = arith.addf %376, %375 : vector<2x128xf32>
    %cst_103 = arith.constant 1.000000e+00 : f32
    %378 = vector.broadcast %cst_103 : f32 to vector<2x128xf32>
    %379 = arith.divf %378, %377 : vector<2x128xf32>
    %380 = vector.extract_strided_slice %379 {offsets = [0, 0], sizes = [2, 32], strides = [1, 1]} : vector<2x128xf32> to vector<2x32xf32>
    %381 = vector.extract_strided_slice %379 {offsets = [0, 32], sizes = [2, 32], strides = [1, 1]} : vector<2x128xf32> to vector<2x32xf32>
    %382 = vector.extract_strided_slice %379 {offsets = [0, 96], sizes = [2, 32], strides = [1, 1]} : vector<2x128xf32> to vector<2x32xf32>
    %383 = vector.extract_strided_slice %372 {offsets = [0, 64], sizes = [2, 32], strides = [1, 1]} : vector<2x128xf32> to vector<2x32xf32>
    %384 = math.tanh %383 : vector<2x32xf32>
    %385 = arith.mulf %381, %363 : vector<2x32xf32>
    %386 = arith.mulf %380, %384 : vector<2x32xf32>
    %387 = arith.addf %385, %386 : vector<2x32xf32>
    %388 = math.tanh %387 : vector<2x32xf32>
    %389 = arith.mulf %382, %388 : vector<2x32xf32>
    %390 = vector.extract_strided_slice %389 {offsets = [0, 0], sizes = [1, 32], strides = [1, 1]} : vector<2x32xf32> to vector<1x32xf32>
    %c15 = arith.constant 15 : index
    %c0_104 = arith.constant 0 : index
    %391 = vector.load %arg4[%c15, %c0_104] : memref<32x32xf32, #tpu.memory_space<vmem>>, vector<1x32xf32>
    tpu.vector_store %arg4[%c15, %c0_104], %390 {strides = array<i32>} : memref<32x32xf32, #tpu.memory_space<vmem>>, vector<1x32xf32>,
    %392 = vector.extract_strided_slice %389 {offsets = [1, 0], sizes = [1, 32], strides = [1, 1]} : vector<2x32xf32> to vector<1x32xf32>
    %c31 = arith.constant 31 : index
    %c0_105 = arith.constant 0 : index
    %393 = vector.load %arg4[%c31, %c0_105] : memref<32x32xf32, #tpu.memory_space<vmem>>, vector<1x32xf32>
    tpu.vector_store %arg4[%c31, %c0_105], %392 {strides = array<i32>} : memref<32x32xf32, #tpu.memory_space<vmem>>, vector<1x32xf32>,
    %c0_106 = arith.constant 0 : index
    %c0_107 = arith.constant 0 : index
    %394 = vector.load %arg1[%c0_106, %c0_107] : memref<14x1xi32, #tpu.memory_space<vmem>>, vector<14x1xi32>
    %395 = tpu.iota {dimensions = array<i32: 1>} : vector<14x16xi32>
    %396 = vector.broadcast %394 : vector<14x1xi32> to vector<14x16xi32>
    %397 = arith.cmpi eq, %396, %395 : vector<14x16xi32>
    %398 = arith.extui %397 : vector<14x16xi1> to vector<14x16xi32>
    %399 = arith.sitofp %398 : vector<14x16xi32> to vector<14x16xf32>
    %c56 = arith.constant 56 : index
    %c0_108 = arith.constant 0 : index
    %400 = vector.load %arg2[%c56, %c0_108] : memref<184x128xf32, #tpu.memory_space<vmem>>, vector<16x128xf32>
    %cst_109 = arith.constant dense<0.000000e+00> : vector<14x128xf32>
    %401 = tpu.matmul %399, %400, %cst_109 {dimension_numbers = #tpu.dot_dimension_numbers<[1], [0], [0], [1], [0, 0, 1, 1], [], []>} : vector<14x16xf32>, vector<16x128xf32>, vector<14x128xf32> -> vector<14x128xf32>
    %c136 = arith.constant 136 : index
    %c0_110 = arith.constant 0 : index
    %402 = vector.load %arg2[%c136, %c0_110] : memref<184x128xf32, #tpu.memory_space<vmem>>, vector<1x128xf32>
    %403 = vector.broadcast %402 : vector<1x128xf32> to vector<14x128xf32>
    %404 = arith.addf %401, %403 : vector<14x128xf32>
    %cst_111 = arith.constant 0.000000e+00 : f32
    %405 = vector.broadcast %cst_111 : f32 to vector<2x32xf32>
    %cst_112 = arith.constant 0.000000e+00 : f32
    %406 = vector.broadcast %cst_112 : f32 to vector<2x32xf32>
    %cst_113 = arith.constant 0.000000e+00 : f32
    %407 = vector.broadcast %cst_113 : f32 to vector<2x32xf32>
    %408 = tpu.concatenate %407, %405 in 1 : vector<2x32xf32>, vector<2x32xf32> -> vector<2x64xf32>
    %409 = vector.extract_strided_slice %404 {offsets = [0, 0], sizes = [2, 128], strides = [1, 1]} : vector<14x128xf32> to vector<2x128xf32>
    %cst_114 = arith.constant dense<0.000000e+00> : vector<2x128xf32>
    %410 = tpu.matmul %408, %1, %cst_114 {dimension_numbers = #tpu.dot_dimension_numbers<[1], [0], [0], [1], [0, 0, 1, 1], [], []>} : vector<2x64xf32>, vector<64x128xf32>, vector<2x128xf32> -> vector<2x128xf32>
    %411 = arith.addf %409, %410 : vector<2x128xf32>
    %cst_115 = arith.constant 0.000000e+00 : f32
    %412 = vector.broadcast %cst_115 : f32 to vector<2x128xf32>
    %413 = arith.subf %412, %411 : vector<2x128xf32>
    %414 = math.exp %413 : vector<2x128xf32>
    %cst_116 = arith.constant 1.000000e+00 : f32
    %415 = vector.broadcast %cst_116 : f32 to vector<2x128xf32>
    %416 = arith.addf %415, %414 : vector<2x128xf32>
    %cst_117 = arith.constant 1.000000e+00 : f32
    %417 = vector.broadcast %cst_117 : f32 to vector<2x128xf32>
    %418 = arith.divf %417, %416 : vector<2x128xf32>
    %419 = vector.extract_strided_slice %418 {offsets = [0, 0], sizes = [2, 32], strides = [1, 1]} : vector<2x128xf32> to vector<2x32xf32>
    %420 = vector.extract_strided_slice %418 {offsets = [0, 32], sizes = [2, 32], strides = [1, 1]} : vector<2x128xf32> to vector<2x32xf32>
    %421 = vector.extract_strided_slice %418 {offsets = [0, 96], sizes = [2, 32], strides = [1, 1]} : vector<2x128xf32> to vector<2x32xf32>
    %422 = vector.extract_strided_slice %411 {offsets = [0, 64], sizes = [2, 32], strides = [1, 1]} : vector<2x128xf32> to vector<2x32xf32>
    %423 = math.tanh %422 : vector<2x32xf32>
    %424 = arith.mulf %420, %406 : vector<2x32xf32>
    %425 = arith.mulf %419, %423 : vector<2x32xf32>
    %426 = arith.addf %424, %425 : vector<2x32xf32>
    %427 = math.tanh %426 : vector<2x32xf32>
    %428 = arith.mulf %421, %427 : vector<2x32xf32>
    %c0_118 = arith.constant 0 : index
    %c0_119 = arith.constant 0 : index
    %429 = vector.load %arg4[%c0_118, %c0_119] : memref<32x32xf32, #tpu.memory_space<vmem>>, vector<16x32xf32>
    %430 = vector.extract_strided_slice %428 {offsets = [0, 0], sizes = [1, 32], strides = [1, 1]} : vector<2x32xf32> to vector<1x32xf32>
    %cst_120 = arith.constant dense<0.000000e+00> : vector<1x16xf32>
    %431 = tpu.matmul %430, %429, %cst_120 {dimension_numbers = #tpu.dot_dimension_numbers<[1], [1], [0], [0], [0, 0, 1, 0], [], []>} : vector<1x32xf32>, vector<16x32xf32>, vector<1x16xf32> -> vector<1x16xf32>
    %cst_121 = arith.constant dense<0xFF800000> : vector<1xf32>
    %432 = vector.multi_reduction <maximumf>, %431, %cst_121 [1] : vector<1x16xf32> to vector<1xf32>
    %433 = vector.shape_cast %432 : vector<1xf32> to vector<1x1xf32>
    %434 = vector.broadcast %433 : vector<1x1xf32> to vector<1x16xf32>
    %435 = arith.subf %431, %434 : vector<1x16xf32>
    %436 = math.exp %435 : vector<1x16xf32>
    %cst_122 = arith.constant dense<0.000000e+00> : vector<1xf32>
    %437 = vector.multi_reduction <add>, %436, %cst_122 [1] : vector<1x16xf32> to vector<1xf32>
    %438 = vector.shape_cast %437 : vector<1xf32> to vector<1x1xf32>
    %439 = tpu.reciprocal %438 {approx = true} : vector<1x1xf32> -> vector<1x1xf32>
    %440 = vector.broadcast %439 : vector<1x1xf32> to vector<1x16xf32>
    %441 = arith.mulf %436, %440 : vector<1x16xf32>
    %cst_123 = arith.constant dense<0.000000e+00> : vector<1x32xf32>
    %442 = tpu.matmul %441, %429, %cst_123 {dimension_numbers = #tpu.dot_dimension_numbers<[1], [0], [0], [1], [0, 0, 1, 1], [], []>} : vector<1x16xf32>, vector<16x32xf32>, vector<1x32xf32> -> vector<1x32xf32>
    %c16_124 = arith.constant 16 : index
    %c0_125 = arith.constant 0 : index
    %443 = vector.load %arg4[%c16_124, %c0_125] : memref<32x32xf32, #tpu.memory_space<vmem>>, vector<16x32xf32>
    %444 = vector.extract_strided_slice %428 {offsets = [1, 0], sizes = [1, 32], strides = [1, 1]} : vector<2x32xf32> to vector<1x32xf32>
    %cst_126 = arith.constant dense<0.000000e+00> : vector<1x16xf32>
    %445 = tpu.matmul %444, %443, %cst_126 {dimension_numbers = #tpu.dot_dimension_numbers<[1], [1], [0], [0], [0, 0, 1, 0], [], []>} : vector<1x32xf32>, vector<16x32xf32>, vector<1x16xf32> -> vector<1x16xf32>
    %cst_127 = arith.constant dense<0xFF800000> : vector<1xf32>
    %446 = vector.multi_reduction <maximumf>, %445, %cst_127 [1] : vector<1x16xf32> to vector<1xf32>
    %447 = vector.shape_cast %446 : vector<1xf32> to vector<1x1xf32>
    %448 = vector.broadcast %447 : vector<1x1xf32> to vector<1x16xf32>
    %449 = arith.subf %445, %448 : vector<1x16xf32>
    %450 = math.exp %449 : vector<1x16xf32>
    %cst_128 = arith.constant dense<0.000000e+00> : vector<1xf32>
    %451 = vector.multi_reduction <add>, %450, %cst_128 [1] : vector<1x16xf32> to vector<1xf32>
    %452 = vector.shape_cast %451 : vector<1xf32> to vector<1x1xf32>
    %453 = tpu.reciprocal %452 {approx = true} : vector<1x1xf32> -> vector<1x1xf32>
    %454 = vector.broadcast %453 : vector<1x1xf32> to vector<1x16xf32>
    %455 = arith.mulf %450, %454 : vector<1x16xf32>
    %cst_129 = arith.constant dense<0.000000e+00> : vector<1x32xf32>
    %456 = tpu.matmul %455, %443, %cst_129 {dimension_numbers = #tpu.dot_dimension_numbers<[1], [0], [0], [1], [0, 0, 1, 1], [], []>} : vector<1x16xf32>, vector<16x32xf32>, vector<1x32xf32> -> vector<1x32xf32>
    %457 = tpu.concatenate %442, %456 in 0 : vector<1x32xf32>, vector<1x32xf32> -> vector<2x32xf32>
    %458 = arith.addf %428, %457 : vector<2x32xf32>
    %c0_130 = arith.constant 0 : index
    %c0_131 = arith.constant 0 : index
    %459 = vector.load %arg5[%c0_130, %c0_131] : memref<14x32xf32, #tpu.memory_space<vmem>>, vector<2x32xf32>
    tpu.vector_store %arg5[%c0_130, %c0_131], %458 {strides = array<i32>} : memref<14x32xf32, #tpu.memory_space<vmem>>, vector<2x32xf32>,
    %460 = tpu.concatenate %457, %428 in 1 : vector<2x32xf32>, vector<2x32xf32> -> vector<2x64xf32>
    %461 = vector.extract_strided_slice %404 {offsets = [2, 0], sizes = [2, 128], strides = [1, 1]} : vector<14x128xf32> to vector<2x128xf32>
    %cst_132 = arith.constant dense<0.000000e+00> : vector<2x128xf32>
    %462 = tpu.matmul %460, %1, %cst_132 {dimension_numbers = #tpu.dot_dimension_numbers<[1], [0], [0], [1], [0, 0, 1, 1], [], []>} : vector<2x64xf32>, vector<64x128xf32>, vector<2x128xf32> -> vector<2x128xf32>
    %463 = arith.addf %461, %462 : vector<2x128xf32>
    %cst_133 = arith.constant 0.000000e+00 : f32
    %464 = vector.broadcast %cst_133 : f32 to vector<2x128xf32>
    %465 = arith.subf %464, %463 : vector<2x128xf32>
    %466 = math.exp %465 : vector<2x128xf32>
    %cst_134 = arith.constant 1.000000e+00 : f32
    %467 = vector.broadcast %cst_134 : f32 to vector<2x128xf32>
    %468 = arith.addf %467, %466 : vector<2x128xf32>
    %cst_135 = arith.constant 1.000000e+00 : f32
    %469 = vector.broadcast %cst_135 : f32 to vector<2x128xf32>
    %470 = arith.divf %469, %468 : vector<2x128xf32>
    %471 = vector.extract_strided_slice %470 {offsets = [0, 0], sizes = [2, 32], strides = [1, 1]} : vector<2x128xf32> to vector<2x32xf32>
    %472 = vector.extract_strided_slice %470 {offsets = [0, 32], sizes = [2, 32], strides = [1, 1]} : vector<2x128xf32> to vector<2x32xf32>
    %473 = vector.extract_strided_slice %470 {offsets = [0, 96], sizes = [2, 32], strides = [1, 1]} : vector<2x128xf32> to vector<2x32xf32>
    %474 = vector.extract_strided_slice %463 {offsets = [0, 64], sizes = [2, 32], strides = [1, 1]} : vector<2x128xf32> to vector<2x32xf32>
    %475 = math.tanh %474 : vector<2x32xf32>
    %476 = arith.mulf %472, %426 : vector<2x32xf32>
    %477 = arith.mulf %471, %475 : vector<2x32xf32>
    %478 = arith.addf %476, %477 : vector<2x32xf32>
    %479 = math.tanh %478 : vector<2x32xf32>
    %480 = arith.mulf %473, %479 : vector<2x32xf32>
    %c0_136 = arith.constant 0 : index
    %c0_137 = arith.constant 0 : index
    %481 = vector.load %arg4[%c0_136, %c0_137] : memref<32x32xf32, #tpu.memory_space<vmem>>, vector<16x32xf32>
    %482 = vector.extract_strided_slice %480 {offsets = [0, 0], sizes = [1, 32], strides = [1, 1]} : vector<2x32xf32> to vector<1x32xf32>
    %cst_138 = arith.constant dense<0.000000e+00> : vector<1x16xf32>
    %483 = tpu.matmul %482, %481, %cst_138 {dimension_numbers = #tpu.dot_dimension_numbers<[1], [1], [0], [0], [0, 0, 1, 0], [], []>} : vector<1x32xf32>, vector<16x32xf32>, vector<1x16xf32> -> vector<1x16xf32>
    %cst_139 = arith.constant dense<0xFF800000> : vector<1xf32>
    %484 = vector.multi_reduction <maximumf>, %483, %cst_139 [1] : vector<1x16xf32> to vector<1xf32>
    %485 = vector.shape_cast %484 : vector<1xf32> to vector<1x1xf32>
    %486 = vector.broadcast %485 : vector<1x1xf32> to vector<1x16xf32>
    %487 = arith.subf %483, %486 : vector<1x16xf32>
    %488 = math.exp %487 : vector<1x16xf32>
    %cst_140 = arith.constant dense<0.000000e+00> : vector<1xf32>
    %489 = vector.multi_reduction <add>, %488, %cst_140 [1] : vector<1x16xf32> to vector<1xf32>
    %490 = vector.shape_cast %489 : vector<1xf32> to vector<1x1xf32>
    %491 = tpu.reciprocal %490 {approx = true} : vector<1x1xf32> -> vector<1x1xf32>
    %492 = vector.broadcast %491 : vector<1x1xf32> to vector<1x16xf32>
    %493 = arith.mulf %488, %492 : vector<1x16xf32>
    %cst_141 = arith.constant dense<0.000000e+00> : vector<1x32xf32>
    %494 = tpu.matmul %493, %481, %cst_141 {dimension_numbers = #tpu.dot_dimension_numbers<[1], [0], [0], [1], [0, 0, 1, 1], [], []>} : vector<1x16xf32>, vector<16x32xf32>, vector<1x32xf32> -> vector<1x32xf32>
    %c16_142 = arith.constant 16 : index
    %c0_143 = arith.constant 0 : index
    %495 = vector.load %arg4[%c16_142, %c0_143] : memref<32x32xf32, #tpu.memory_space<vmem>>, vector<16x32xf32>
    %496 = vector.extract_strided_slice %480 {offsets = [1, 0], sizes = [1, 32], strides = [1, 1]} : vector<2x32xf32> to vector<1x32xf32>
    %cst_144 = arith.constant dense<0.000000e+00> : vector<1x16xf32>
    %497 = tpu.matmul %496, %495, %cst_144 {dimension_numbers = #tpu.dot_dimension_numbers<[1], [1], [0], [0], [0, 0, 1, 0], [], []>} : vector<1x32xf32>, vector<16x32xf32>, vector<1x16xf32> -> vector<1x16xf32>
    %cst_145 = arith.constant dense<0xFF800000> : vector<1xf32>
    %498 = vector.multi_reduction <maximumf>, %497, %cst_145 [1] : vector<1x16xf32> to vector<1xf32>
    %499 = vector.shape_cast %498 : vector<1xf32> to vector<1x1xf32>
    %500 = vector.broadcast %499 : vector<1x1xf32> to vector<1x16xf32>
    %501 = arith.subf %497, %500 : vector<1x16xf32>
    %502 = math.exp %501 : vector<1x16xf32>
    %cst_146 = arith.constant dense<0.000000e+00> : vector<1xf32>
    %503 = vector.multi_reduction <add>, %502, %cst_146 [1] : vector<1x16xf32> to vector<1xf32>
    %504 = vector.shape_cast %503 : vector<1xf32> to vector<1x1xf32>
    %505 = tpu.reciprocal %504 {approx = true} : vector<1x1xf32> -> vector<1x1xf32>
    %506 = vector.broadcast %505 : vector<1x1xf32> to vector<1x16xf32>
    %507 = arith.mulf %502, %506 : vector<1x16xf32>
    %cst_147 = arith.constant dense<0.000000e+00> : vector<1x32xf32>
    %508 = tpu.matmul %507, %495, %cst_147 {dimension_numbers = #tpu.dot_dimension_numbers<[1], [0], [0], [1], [0, 0, 1, 1], [], []>} : vector<1x16xf32>, vector<16x32xf32>, vector<1x32xf32> -> vector<1x32xf32>
    %509 = tpu.concatenate %494, %508 in 0 : vector<1x32xf32>, vector<1x32xf32> -> vector<2x32xf32>
    %510 = arith.addf %480, %509 : vector<2x32xf32>
    %c2_148 = arith.constant 2 : index
    %c0_149 = arith.constant 0 : index
    %511 = vector.load %arg5[%c2_148, %c0_149] : memref<14x32xf32, #tpu.memory_space<vmem>>, vector<2x32xf32>
    tpu.vector_store %arg5[%c2_148, %c0_149], %510 {strides = array<i32>} : memref<14x32xf32, #tpu.memory_space<vmem>>, vector<2x32xf32>,
    %512 = tpu.concatenate %509, %480 in 1 : vector<2x32xf32>, vector<2x32xf32> -> vector<2x64xf32>
    %513 = vector.extract_strided_slice %404 {offsets = [4, 0], sizes = [2, 128], strides = [1, 1]} : vector<14x128xf32> to vector<2x128xf32>
    %cst_150 = arith.constant dense<0.000000e+00> : vector<2x128xf32>
    %514 = tpu.matmul %512, %1, %cst_150 {dimension_numbers = #tpu.dot_dimension_numbers<[1], [0], [0], [1], [0, 0, 1, 1], [], []>} : vector<2x64xf32>, vector<64x128xf32>, vector<2x128xf32> -> vector<2x128xf32>
    %515 = arith.addf %513, %514 : vector<2x128xf32>
    %cst_151 = arith.constant 0.000000e+00 : f32
    %516 = vector.broadcast %cst_151 : f32 to vector<2x128xf32>
    %517 = arith.subf %516, %515 : vector<2x128xf32>
    %518 = math.exp %517 : vector<2x128xf32>
    %cst_152 = arith.constant 1.000000e+00 : f32
    %519 = vector.broadcast %cst_152 : f32 to vector<2x128xf32>
    %520 = arith.addf %519, %518 : vector<2x128xf32>
    %cst_153 = arith.constant 1.000000e+00 : f32
    %521 = vector.broadcast %cst_153 : f32 to vector<2x128xf32>
    %522 = arith.divf %521, %520 : vector<2x128xf32>
    %523 = vector.extract_strided_slice %522 {offsets = [0, 0], sizes = [2, 32], strides = [1, 1]} : vector<2x128xf32> to vector<2x32xf32>
    %524 = vector.extract_strided_slice %522 {offsets = [0, 32], sizes = [2, 32], strides = [1, 1]} : vector<2x128xf32> to vector<2x32xf32>
    %525 = vector.extract_strided_slice %522 {offsets = [0, 96], sizes = [2, 32], strides = [1, 1]} : vector<2x128xf32> to vector<2x32xf32>
    %526 = vector.extract_strided_slice %515 {offsets = [0, 64], sizes = [2, 32], strides = [1, 1]} : vector<2x128xf32> to vector<2x32xf32>
    %527 = math.tanh %526 : vector<2x32xf32>
    %528 = arith.mulf %524, %478 : vector<2x32xf32>
    %529 = arith.mulf %523, %527 : vector<2x32xf32>
    %530 = arith.addf %528, %529 : vector<2x32xf32>
    %531 = math.tanh %530 : vector<2x32xf32>
    %532 = arith.mulf %525, %531 : vector<2x32xf32>
    %c0_154 = arith.constant 0 : index
    %c0_155 = arith.constant 0 : index
    %533 = vector.load %arg4[%c0_154, %c0_155] : memref<32x32xf32, #tpu.memory_space<vmem>>, vector<16x32xf32>
    %534 = vector.extract_strided_slice %532 {offsets = [0, 0], sizes = [1, 32], strides = [1, 1]} : vector<2x32xf32> to vector<1x32xf32>
    %cst_156 = arith.constant dense<0.000000e+00> : vector<1x16xf32>
    %535 = tpu.matmul %534, %533, %cst_156 {dimension_numbers = #tpu.dot_dimension_numbers<[1], [1], [0], [0], [0, 0, 1, 0], [], []>} : vector<1x32xf32>, vector<16x32xf32>, vector<1x16xf32> -> vector<1x16xf32>
    %cst_157 = arith.constant dense<0xFF800000> : vector<1xf32>
    %536 = vector.multi_reduction <maximumf>, %535, %cst_157 [1] : vector<1x16xf32> to vector<1xf32>
    %537 = vector.shape_cast %536 : vector<1xf32> to vector<1x1xf32>
    %538 = vector.broadcast %537 : vector<1x1xf32> to vector<1x16xf32>
    %539 = arith.subf %535, %538 : vector<1x16xf32>
    %540 = math.exp %539 : vector<1x16xf32>
    %cst_158 = arith.constant dense<0.000000e+00> : vector<1xf32>
    %541 = vector.multi_reduction <add>, %540, %cst_158 [1] : vector<1x16xf32> to vector<1xf32>
    %542 = vector.shape_cast %541 : vector<1xf32> to vector<1x1xf32>
    %543 = tpu.reciprocal %542 {approx = true} : vector<1x1xf32> -> vector<1x1xf32>
    %544 = vector.broadcast %543 : vector<1x1xf32> to vector<1x16xf32>
    %545 = arith.mulf %540, %544 : vector<1x16xf32>
    %cst_159 = arith.constant dense<0.000000e+00> : vector<1x32xf32>
    %546 = tpu.matmul %545, %533, %cst_159 {dimension_numbers = #tpu.dot_dimension_numbers<[1], [0], [0], [1], [0, 0, 1, 1], [], []>} : vector<1x16xf32>, vector<16x32xf32>, vector<1x32xf32> -> vector<1x32xf32>
    %c16_160 = arith.constant 16 : index
    %c0_161 = arith.constant 0 : index
    %547 = vector.load %arg4[%c16_160, %c0_161] : memref<32x32xf32, #tpu.memory_space<vmem>>, vector<16x32xf32>
    %548 = vector.extract_strided_slice %532 {offsets = [1, 0], sizes = [1, 32], strides = [1, 1]} : vector<2x32xf32> to vector<1x32xf32>
    %cst_162 = arith.constant dense<0.000000e+00> : vector<1x16xf32>
    %549 = tpu.matmul %548, %547, %cst_162 {dimension_numbers = #tpu.dot_dimension_numbers<[1], [1], [0], [0], [0, 0, 1, 0], [], []>} : vector<1x32xf32>, vector<16x32xf32>, vector<1x16xf32> -> vector<1x16xf32>
    %cst_163 = arith.constant dense<0xFF800000> : vector<1xf32>
    %550 = vector.multi_reduction <maximumf>, %549, %cst_163 [1] : vector<1x16xf32> to vector<1xf32>
    %551 = vector.shape_cast %550 : vector<1xf32> to vector<1x1xf32>
    %552 = vector.broadcast %551 : vector<1x1xf32> to vector<1x16xf32>
    %553 = arith.subf %549, %552 : vector<1x16xf32>
    %554 = math.exp %553 : vector<1x16xf32>
    %cst_164 = arith.constant dense<0.000000e+00> : vector<1xf32>
    %555 = vector.multi_reduction <add>, %554, %cst_164 [1] : vector<1x16xf32> to vector<1xf32>
    %556 = vector.shape_cast %555 : vector<1xf32> to vector<1x1xf32>
    %557 = tpu.reciprocal %556 {approx = true} : vector<1x1xf32> -> vector<1x1xf32>
    %558 = vector.broadcast %557 : vector<1x1xf32> to vector<1x16xf32>
    %559 = arith.mulf %554, %558 : vector<1x16xf32>
    %cst_165 = arith.constant dense<0.000000e+00> : vector<1x32xf32>
    %560 = tpu.matmul %559, %547, %cst_165 {dimension_numbers = #tpu.dot_dimension_numbers<[1], [0], [0], [1], [0, 0, 1, 1], [], []>} : vector<1x16xf32>, vector<16x32xf32>, vector<1x32xf32> -> vector<1x32xf32>
    %561 = tpu.concatenate %546, %560 in 0 : vector<1x32xf32>, vector<1x32xf32> -> vector<2x32xf32>
    %562 = arith.addf %532, %561 : vector<2x32xf32>
    %c4_166 = arith.constant 4 : index
    %c0_167 = arith.constant 0 : index
    %563 = vector.load %arg5[%c4_166, %c0_167] : memref<14x32xf32, #tpu.memory_space<vmem>>, vector<2x32xf32>
    tpu.vector_store %arg5[%c4_166, %c0_167], %562 {strides = array<i32>} : memref<14x32xf32, #tpu.memory_space<vmem>>, vector<2x32xf32>,
    %564 = tpu.concatenate %561, %532 in 1 : vector<2x32xf32>, vector<2x32xf32> -> vector<2x64xf32>
    %565 = vector.extract_strided_slice %404 {offsets = [6, 0], sizes = [2, 128], strides = [1, 1]} : vector<14x128xf32> to vector<2x128xf32>
    %cst_168 = arith.constant dense<0.000000e+00> : vector<2x128xf32>
    %566 = tpu.matmul %564, %1, %cst_168 {dimension_numbers = #tpu.dot_dimension_numbers<[1], [0], [0], [1], [0, 0, 1, 1], [], []>} : vector<2x64xf32>, vector<64x128xf32>, vector<2x128xf32> -> vector<2x128xf32>
    %567 = arith.addf %565, %566 : vector<2x128xf32>
    %cst_169 = arith.constant 0.000000e+00 : f32
    %568 = vector.broadcast %cst_169 : f32 to vector<2x128xf32>
    %569 = arith.subf %568, %567 : vector<2x128xf32>
    %570 = math.exp %569 : vector<2x128xf32>
    %cst_170 = arith.constant 1.000000e+00 : f32
    %571 = vector.broadcast %cst_170 : f32 to vector<2x128xf32>
    %572 = arith.addf %571, %570 : vector<2x128xf32>
    %cst_171 = arith.constant 1.000000e+00 : f32
    %573 = vector.broadcast %cst_171 : f32 to vector<2x128xf32>
    %574 = arith.divf %573, %572 : vector<2x128xf32>
    %575 = vector.extract_strided_slice %574 {offsets = [0, 0], sizes = [2, 32], strides = [1, 1]} : vector<2x128xf32> to vector<2x32xf32>
    %576 = vector.extract_strided_slice %574 {offsets = [0, 32], sizes = [2, 32], strides = [1, 1]} : vector<2x128xf32> to vector<2x32xf32>
    %577 = vector.extract_strided_slice %574 {offsets = [0, 96], sizes = [2, 32], strides = [1, 1]} : vector<2x128xf32> to vector<2x32xf32>
    %578 = vector.extract_strided_slice %567 {offsets = [0, 64], sizes = [2, 32], strides = [1, 1]} : vector<2x128xf32> to vector<2x32xf32>
    %579 = math.tanh %578 : vector<2x32xf32>
    %580 = arith.mulf %576, %530 : vector<2x32xf32>
    %581 = arith.mulf %575, %579 : vector<2x32xf32>
    %582 = arith.addf %580, %581 : vector<2x32xf32>
    %583 = math.tanh %582 : vector<2x32xf32>
    %584 = arith.mulf %577, %583 : vector<2x32xf32>
    %c0_172 = arith.constant 0 : index
    %c0_173 = arith.constant 0 : index
    %585 = vector.load %arg4[%c0_172, %c0_173] : memref<32x32xf32, #tpu.memory_space<vmem>>, vector<16x32xf32>
    %586 = vector.extract_strided_slice %584 {offsets = [0, 0], sizes = [1, 32], strides = [1, 1]} : vector<2x32xf32> to vector<1x32xf32>
    %cst_174 = arith.constant dense<0.000000e+00> : vector<1x16xf32>
    %587 = tpu.matmul %586, %585, %cst_174 {dimension_numbers = #tpu.dot_dimension_numbers<[1], [1], [0], [0], [0, 0, 1, 0], [], []>} : vector<1x32xf32>, vector<16x32xf32>, vector<1x16xf32> -> vector<1x16xf32>
    %cst_175 = arith.constant dense<0xFF800000> : vector<1xf32>
    %588 = vector.multi_reduction <maximumf>, %587, %cst_175 [1] : vector<1x16xf32> to vector<1xf32>
    %589 = vector.shape_cast %588 : vector<1xf32> to vector<1x1xf32>
    %590 = vector.broadcast %589 : vector<1x1xf32> to vector<1x16xf32>
    %591 = arith.subf %587, %590 : vector<1x16xf32>
    %592 = math.exp %591 : vector<1x16xf32>
    %cst_176 = arith.constant dense<0.000000e+00> : vector<1xf32>
    %593 = vector.multi_reduction <add>, %592, %cst_176 [1] : vector<1x16xf32> to vector<1xf32>
    %594 = vector.shape_cast %593 : vector<1xf32> to vector<1x1xf32>
    %595 = tpu.reciprocal %594 {approx = true} : vector<1x1xf32> -> vector<1x1xf32>
    %596 = vector.broadcast %595 : vector<1x1xf32> to vector<1x16xf32>
    %597 = arith.mulf %592, %596 : vector<1x16xf32>
    %cst_177 = arith.constant dense<0.000000e+00> : vector<1x32xf32>
    %598 = tpu.matmul %597, %585, %cst_177 {dimension_numbers = #tpu.dot_dimension_numbers<[1], [0], [0], [1], [0, 0, 1, 1], [], []>} : vector<1x16xf32>, vector<16x32xf32>, vector<1x32xf32> -> vector<1x32xf32>
    %c16_178 = arith.constant 16 : index
    %c0_179 = arith.constant 0 : index
    %599 = vector.load %arg4[%c16_178, %c0_179] : memref<32x32xf32, #tpu.memory_space<vmem>>, vector<16x32xf32>
    %600 = vector.extract_strided_slice %584 {offsets = [1, 0], sizes = [1, 32], strides = [1, 1]} : vector<2x32xf32> to vector<1x32xf32>
    %cst_180 = arith.constant dense<0.000000e+00> : vector<1x16xf32>
    %601 = tpu.matmul %600, %599, %cst_180 {dimension_numbers = #tpu.dot_dimension_numbers<[1], [1], [0], [0], [0, 0, 1, 0], [], []>} : vector<1x32xf32>, vector<16x32xf32>, vector<1x16xf32> -> vector<1x16xf32>
    %cst_181 = arith.constant dense<0xFF800000> : vector<1xf32>
    %602 = vector.multi_reduction <maximumf>, %601, %cst_181 [1] : vector<1x16xf32> to vector<1xf32>
    %603 = vector.shape_cast %602 : vector<1xf32> to vector<1x1xf32>
    %604 = vector.broadcast %603 : vector<1x1xf32> to vector<1x16xf32>
    %605 = arith.subf %601, %604 : vector<1x16xf32>
    %606 = math.exp %605 : vector<1x16xf32>
    %cst_182 = arith.constant dense<0.000000e+00> : vector<1xf32>
    %607 = vector.multi_reduction <add>, %606, %cst_182 [1] : vector<1x16xf32> to vector<1xf32>
    %608 = vector.shape_cast %607 : vector<1xf32> to vector<1x1xf32>
    %609 = tpu.reciprocal %608 {approx = true} : vector<1x1xf32> -> vector<1x1xf32>
    %610 = vector.broadcast %609 : vector<1x1xf32> to vector<1x16xf32>
    %611 = arith.mulf %606, %610 : vector<1x16xf32>
    %cst_183 = arith.constant dense<0.000000e+00> : vector<1x32xf32>
    %612 = tpu.matmul %611, %599, %cst_183 {dimension_numbers = #tpu.dot_dimension_numbers<[1], [0], [0], [1], [0, 0, 1, 1], [], []>} : vector<1x16xf32>, vector<16x32xf32>, vector<1x32xf32> -> vector<1x32xf32>
    %613 = tpu.concatenate %598, %612 in 0 : vector<1x32xf32>, vector<1x32xf32> -> vector<2x32xf32>
    %614 = arith.addf %584, %613 : vector<2x32xf32>
    %c6_184 = arith.constant 6 : index
    %c0_185 = arith.constant 0 : index
    %615 = vector.load %arg5[%c6_184, %c0_185] : memref<14x32xf32, #tpu.memory_space<vmem>>, vector<2x32xf32>
    tpu.vector_store %arg5[%c6_184, %c0_185], %614 {strides = array<i32>} : memref<14x32xf32, #tpu.memory_space<vmem>>, vector<2x32xf32>,
    %616 = tpu.concatenate %613, %584 in 1 : vector<2x32xf32>, vector<2x32xf32> -> vector<2x64xf32>
    %617 = vector.extract_strided_slice %404 {offsets = [8, 0], sizes = [2, 128], strides = [1, 1]} : vector<14x128xf32> to vector<2x128xf32>
    %cst_186 = arith.constant dense<0.000000e+00> : vector<2x128xf32>
    %618 = tpu.matmul %616, %1, %cst_186 {dimension_numbers = #tpu.dot_dimension_numbers<[1], [0], [0], [1], [0, 0, 1, 1], [], []>} : vector<2x64xf32>, vector<64x128xf32>, vector<2x128xf32> -> vector<2x128xf32>
    %619 = arith.addf %617, %618 : vector<2x128xf32>
    %cst_187 = arith.constant 0.000000e+00 : f32
    %620 = vector.broadcast %cst_187 : f32 to vector<2x128xf32>
    %621 = arith.subf %620, %619 : vector<2x128xf32>
    %622 = math.exp %621 : vector<2x128xf32>
    %cst_188 = arith.constant 1.000000e+00 : f32
    %623 = vector.broadcast %cst_188 : f32 to vector<2x128xf32>
    %624 = arith.addf %623, %622 : vector<2x128xf32>
    %cst_189 = arith.constant 1.000000e+00 : f32
    %625 = vector.broadcast %cst_189 : f32 to vector<2x128xf32>
    %626 = arith.divf %625, %624 : vector<2x128xf32>
    %627 = vector.extract_strided_slice %626 {offsets = [0, 0], sizes = [2, 32], strides = [1, 1]} : vector<2x128xf32> to vector<2x32xf32>
    %628 = vector.extract_strided_slice %626 {offsets = [0, 32], sizes = [2, 32], strides = [1, 1]} : vector<2x128xf32> to vector<2x32xf32>
    %629 = vector.extract_strided_slice %626 {offsets = [0, 96], sizes = [2, 32], strides = [1, 1]} : vector<2x128xf32> to vector<2x32xf32>
    %630 = vector.extract_strided_slice %619 {offsets = [0, 64], sizes = [2, 32], strides = [1, 1]} : vector<2x128xf32> to vector<2x32xf32>
    %631 = math.tanh %630 : vector<2x32xf32>
    %632 = arith.mulf %628, %582 : vector<2x32xf32>
    %633 = arith.mulf %627, %631 : vector<2x32xf32>
    %634 = arith.addf %632, %633 : vector<2x32xf32>
    %635 = math.tanh %634 : vector<2x32xf32>
    %636 = arith.mulf %629, %635 : vector<2x32xf32>
    %c0_190 = arith.constant 0 : index
    %c0_191 = arith.constant 0 : index
    %637 = vector.load %arg4[%c0_190, %c0_191] : memref<32x32xf32, #tpu.memory_space<vmem>>, vector<16x32xf32>
    %638 = vector.extract_strided_slice %636 {offsets = [0, 0], sizes = [1, 32], strides = [1, 1]} : vector<2x32xf32> to vector<1x32xf32>
    %cst_192 = arith.constant dense<0.000000e+00> : vector<1x16xf32>
    %639 = tpu.matmul %638, %637, %cst_192 {dimension_numbers = #tpu.dot_dimension_numbers<[1], [1], [0], [0], [0, 0, 1, 0], [], []>} : vector<1x32xf32>, vector<16x32xf32>, vector<1x16xf32> -> vector<1x16xf32>
    %cst_193 = arith.constant dense<0xFF800000> : vector<1xf32>
    %640 = vector.multi_reduction <maximumf>, %639, %cst_193 [1] : vector<1x16xf32> to vector<1xf32>
    %641 = vector.shape_cast %640 : vector<1xf32> to vector<1x1xf32>
    %642 = vector.broadcast %641 : vector<1x1xf32> to vector<1x16xf32>
    %643 = arith.subf %639, %642 : vector<1x16xf32>
    %644 = math.exp %643 : vector<1x16xf32>
    %cst_194 = arith.constant dense<0.000000e+00> : vector<1xf32>
    %645 = vector.multi_reduction <add>, %644, %cst_194 [1] : vector<1x16xf32> to vector<1xf32>
    %646 = vector.shape_cast %645 : vector<1xf32> to vector<1x1xf32>
    %647 = tpu.reciprocal %646 {approx = true} : vector<1x1xf32> -> vector<1x1xf32>
    %648 = vector.broadcast %647 : vector<1x1xf32> to vector<1x16xf32>
    %649 = arith.mulf %644, %648 : vector<1x16xf32>
    %cst_195 = arith.constant dense<0.000000e+00> : vector<1x32xf32>
    %650 = tpu.matmul %649, %637, %cst_195 {dimension_numbers = #tpu.dot_dimension_numbers<[1], [0], [0], [1], [0, 0, 1, 1], [], []>} : vector<1x16xf32>, vector<16x32xf32>, vector<1x32xf32> -> vector<1x32xf32>
    %c16_196 = arith.constant 16 : index
    %c0_197 = arith.constant 0 : index
    %651 = vector.load %arg4[%c16_196, %c0_197] : memref<32x32xf32, #tpu.memory_space<vmem>>, vector<16x32xf32>
    %652 = vector.extract_strided_slice %636 {offsets = [1, 0], sizes = [1, 32], strides = [1, 1]} : vector<2x32xf32> to vector<1x32xf32>
    %cst_198 = arith.constant dense<0.000000e+00> : vector<1x16xf32>
    %653 = tpu.matmul %652, %651, %cst_198 {dimension_numbers = #tpu.dot_dimension_numbers<[1], [1], [0], [0], [0, 0, 1, 0], [], []>} : vector<1x32xf32>, vector<16x32xf32>, vector<1x16xf32> -> vector<1x16xf32>
    %cst_199 = arith.constant dense<0xFF800000> : vector<1xf32>
    %654 = vector.multi_reduction <maximumf>, %653, %cst_199 [1] : vector<1x16xf32> to vector<1xf32>
    %655 = vector.shape_cast %654 : vector<1xf32> to vector<1x1xf32>
    %656 = vector.broadcast %655 : vector<1x1xf32> to vector<1x16xf32>
    %657 = arith.subf %653, %656 : vector<1x16xf32>
    %658 = math.exp %657 : vector<1x16xf32>
    %cst_200 = arith.constant dense<0.000000e+00> : vector<1xf32>
    %659 = vector.multi_reduction <add>, %658, %cst_200 [1] : vector<1x16xf32> to vector<1xf32>
    %660 = vector.shape_cast %659 : vector<1xf32> to vector<1x1xf32>
    %661 = tpu.reciprocal %660 {approx = true} : vector<1x1xf32> -> vector<1x1xf32>
    %662 = vector.broadcast %661 : vector<1x1xf32> to vector<1x16xf32>
    %663 = arith.mulf %658, %662 : vector<1x16xf32>
    %cst_201 = arith.constant dense<0.000000e+00> : vector<1x32xf32>
    %664 = tpu.matmul %663, %651, %cst_201 {dimension_numbers = #tpu.dot_dimension_numbers<[1], [0], [0], [1], [0, 0, 1, 1], [], []>} : vector<1x16xf32>, vector<16x32xf32>, vector<1x32xf32> -> vector<1x32xf32>
    %665 = tpu.concatenate %650, %664 in 0 : vector<1x32xf32>, vector<1x32xf32> -> vector<2x32xf32>
    %666 = arith.addf %636, %665 : vector<2x32xf32>
    %c8_202 = arith.constant 8 : index
    %c0_203 = arith.constant 0 : index
    %667 = vector.load %arg5[%c8_202, %c0_203] : memref<14x32xf32, #tpu.memory_space<vmem>>, vector<2x32xf32>
    tpu.vector_store %arg5[%c8_202, %c0_203], %666 {strides = array<i32>} : memref<14x32xf32, #tpu.memory_space<vmem>>, vector<2x32xf32>,
    %668 = tpu.concatenate %665, %636 in 1 : vector<2x32xf32>, vector<2x32xf32> -> vector<2x64xf32>
    %669 = vector.extract_strided_slice %404 {offsets = [10, 0], sizes = [2, 128], strides = [1, 1]} : vector<14x128xf32> to vector<2x128xf32>
    %cst_204 = arith.constant dense<0.000000e+00> : vector<2x128xf32>
    %670 = tpu.matmul %668, %1, %cst_204 {dimension_numbers = #tpu.dot_dimension_numbers<[1], [0], [0], [1], [0, 0, 1, 1], [], []>} : vector<2x64xf32>, vector<64x128xf32>, vector<2x128xf32> -> vector<2x128xf32>
    %671 = arith.addf %669, %670 : vector<2x128xf32>
    %cst_205 = arith.constant 0.000000e+00 : f32
    %672 = vector.broadcast %cst_205 : f32 to vector<2x128xf32>
    %673 = arith.subf %672, %671 : vector<2x128xf32>
    %674 = math.exp %673 : vector<2x128xf32>
    %cst_206 = arith.constant 1.000000e+00 : f32
    %675 = vector.broadcast %cst_206 : f32 to vector<2x128xf32>
    %676 = arith.addf %675, %674 : vector<2x128xf32>
    %cst_207 = arith.constant 1.000000e+00 : f32
    %677 = vector.broadcast %cst_207 : f32 to vector<2x128xf32>
    %678 = arith.divf %677, %676 : vector<2x128xf32>
    %679 = vector.extract_strided_slice %678 {offsets = [0, 0], sizes = [2, 32], strides = [1, 1]} : vector<2x128xf32> to vector<2x32xf32>
    %680 = vector.extract_strided_slice %678 {offsets = [0, 32], sizes = [2, 32], strides = [1, 1]} : vector<2x128xf32> to vector<2x32xf32>
    %681 = vector.extract_strided_slice %678 {offsets = [0, 96], sizes = [2, 32], strides = [1, 1]} : vector<2x128xf32> to vector<2x32xf32>
    %682 = vector.extract_strided_slice %671 {offsets = [0, 64], sizes = [2, 32], strides = [1, 1]} : vector<2x128xf32> to vector<2x32xf32>
    %683 = math.tanh %682 : vector<2x32xf32>
    %684 = arith.mulf %680, %634 : vector<2x32xf32>
    %685 = arith.mulf %679, %683 : vector<2x32xf32>
    %686 = arith.addf %684, %685 : vector<2x32xf32>
    %687 = math.tanh %686 : vector<2x32xf32>
    %688 = arith.mulf %681, %687 : vector<2x32xf32>
    %c0_208 = arith.constant 0 : index
    %c0_209 = arith.constant 0 : index
    %689 = vector.load %arg4[%c0_208, %c0_209] : memref<32x32xf32, #tpu.memory_space<vmem>>, vector<16x32xf32>
    %690 = vector.extract_strided_slice %688 {offsets = [0, 0], sizes = [1, 32], strides = [1, 1]} : vector<2x32xf32> to vector<1x32xf32>
    %cst_210 = arith.constant dense<0.000000e+00> : vector<1x16xf32>
    %691 = tpu.matmul %690, %689, %cst_210 {dimension_numbers = #tpu.dot_dimension_numbers<[1], [1], [0], [0], [0, 0, 1, 0], [], []>} : vector<1x32xf32>, vector<16x32xf32>, vector<1x16xf32> -> vector<1x16xf32>
    %cst_211 = arith.constant dense<0xFF800000> : vector<1xf32>
    %692 = vector.multi_reduction <maximumf>, %691, %cst_211 [1] : vector<1x16xf32> to vector<1xf32>
    %693 = vector.shape_cast %692 : vector<1xf32> to vector<1x1xf32>
    %694 = vector.broadcast %693 : vector<1x1xf32> to vector<1x16xf32>
    %695 = arith.subf %691, %694 : vector<1x16xf32>
    %696 = math.exp %695 : vector<1x16xf32>
    %cst_212 = arith.constant dense<0.000000e+00> : vector<1xf32>
    %697 = vector.multi_reduction <add>, %696, %cst_212 [1] : vector<1x16xf32> to vector<1xf32>
    %698 = vector.shape_cast %697 : vector<1xf32> to vector<1x1xf32>
    %699 = tpu.reciprocal %698 {approx = true} : vector<1x1xf32> -> vector<1x1xf32>
    %700 = vector.broadcast %699 : vector<1x1xf32> to vector<1x16xf32>
    %701 = arith.mulf %696, %700 : vector<1x16xf32>
    %cst_213 = arith.constant dense<0.000000e+00> : vector<1x32xf32>
    %702 = tpu.matmul %701, %689, %cst_213 {dimension_numbers = #tpu.dot_dimension_numbers<[1], [0], [0], [1], [0, 0, 1, 1], [], []>} : vector<1x16xf32>, vector<16x32xf32>, vector<1x32xf32> -> vector<1x32xf32>
    %c16_214 = arith.constant 16 : index
    %c0_215 = arith.constant 0 : index
    %703 = vector.load %arg4[%c16_214, %c0_215] : memref<32x32xf32, #tpu.memory_space<vmem>>, vector<16x32xf32>
    %704 = vector.extract_strided_slice %688 {offsets = [1, 0], sizes = [1, 32], strides = [1, 1]} : vector<2x32xf32> to vector<1x32xf32>
    %cst_216 = arith.constant dense<0.000000e+00> : vector<1x16xf32>
    %705 = tpu.matmul %704, %703, %cst_216 {dimension_numbers = #tpu.dot_dimension_numbers<[1], [1], [0], [0], [0, 0, 1, 0], [], []>} : vector<1x32xf32>, vector<16x32xf32>, vector<1x16xf32> -> vector<1x16xf32>
    %cst_217 = arith.constant dense<0xFF800000> : vector<1xf32>
    %706 = vector.multi_reduction <maximumf>, %705, %cst_217 [1] : vector<1x16xf32> to vector<1xf32>
    %707 = vector.shape_cast %706 : vector<1xf32> to vector<1x1xf32>
    %708 = vector.broadcast %707 : vector<1x1xf32> to vector<1x16xf32>
    %709 = arith.subf %705, %708 : vector<1x16xf32>
    %710 = math.exp %709 : vector<1x16xf32>
    %cst_218 = arith.constant dense<0.000000e+00> : vector<1xf32>
    %711 = vector.multi_reduction <add>, %710, %cst_218 [1] : vector<1x16xf32> to vector<1xf32>
    %712 = vector.shape_cast %711 : vector<1xf32> to vector<1x1xf32>
    %713 = tpu.reciprocal %712 {approx = true} : vector<1x1xf32> -> vector<1x1xf32>
    %714 = vector.broadcast %713 : vector<1x1xf32> to vector<1x16xf32>
    %715 = arith.mulf %710, %714 : vector<1x16xf32>
    %cst_219 = arith.constant dense<0.000000e+00> : vector<1x32xf32>
    %716 = tpu.matmul %715, %703, %cst_219 {dimension_numbers = #tpu.dot_dimension_numbers<[1], [0], [0], [1], [0, 0, 1, 1], [], []>} : vector<1x16xf32>, vector<16x32xf32>, vector<1x32xf32> -> vector<1x32xf32>
    %717 = tpu.concatenate %702, %716 in 0 : vector<1x32xf32>, vector<1x32xf32> -> vector<2x32xf32>
    %718 = arith.addf %688, %717 : vector<2x32xf32>
    %c10_220 = arith.constant 10 : index
    %c0_221 = arith.constant 0 : index
    %719 = vector.load %arg5[%c10_220, %c0_221] : memref<14x32xf32, #tpu.memory_space<vmem>>, vector<2x32xf32>
    tpu.vector_store %arg5[%c10_220, %c0_221], %718 {strides = array<i32>} : memref<14x32xf32, #tpu.memory_space<vmem>>, vector<2x32xf32>,
    %720 = tpu.concatenate %717, %688 in 1 : vector<2x32xf32>, vector<2x32xf32> -> vector<2x64xf32>
    %721 = vector.extract_strided_slice %404 {offsets = [12, 0], sizes = [2, 128], strides = [1, 1]} : vector<14x128xf32> to vector<2x128xf32>
    %cst_222 = arith.constant dense<0.000000e+00> : vector<2x128xf32>
    %722 = tpu.matmul %720, %1, %cst_222 {dimension_numbers = #tpu.dot_dimension_numbers<[1], [0], [0], [1], [0, 0, 1, 1], [], []>} : vector<2x64xf32>, vector<64x128xf32>, vector<2x128xf32> -> vector<2x128xf32>
    %723 = arith.addf %721, %722 : vector<2x128xf32>
    %cst_223 = arith.constant 0.000000e+00 : f32
    %724 = vector.broadcast %cst_223 : f32 to vector<2x128xf32>
    %725 = arith.subf %724, %723 : vector<2x128xf32>
    %726 = math.exp %725 : vector<2x128xf32>
    %cst_224 = arith.constant 1.000000e+00 : f32
    %727 = vector.broadcast %cst_224 : f32 to vector<2x128xf32>
    %728 = arith.addf %727, %726 : vector<2x128xf32>
    %cst_225 = arith.constant 1.000000e+00 : f32
    %729 = vector.broadcast %cst_225 : f32 to vector<2x128xf32>
    %730 = arith.divf %729, %728 : vector<2x128xf32>
    %731 = vector.extract_strided_slice %730 {offsets = [0, 0], sizes = [2, 32], strides = [1, 1]} : vector<2x128xf32> to vector<2x32xf32>
    %732 = vector.extract_strided_slice %730 {offsets = [0, 32], sizes = [2, 32], strides = [1, 1]} : vector<2x128xf32> to vector<2x32xf32>
    %733 = vector.extract_strided_slice %730 {offsets = [0, 96], sizes = [2, 32], strides = [1, 1]} : vector<2x128xf32> to vector<2x32xf32>
    %734 = vector.extract_strided_slice %723 {offsets = [0, 64], sizes = [2, 32], strides = [1, 1]} : vector<2x128xf32> to vector<2x32xf32>
    %735 = math.tanh %734 : vector<2x32xf32>
    %736 = arith.mulf %732, %686 : vector<2x32xf32>
    %737 = arith.mulf %731, %735 : vector<2x32xf32>
    %738 = arith.addf %736, %737 : vector<2x32xf32>
    %739 = math.tanh %738 : vector<2x32xf32>
    %740 = arith.mulf %733, %739 : vector<2x32xf32>
    %c0_226 = arith.constant 0 : index
    %c0_227 = arith.constant 0 : index
    %741 = vector.load %arg4[%c0_226, %c0_227] : memref<32x32xf32, #tpu.memory_space<vmem>>, vector<16x32xf32>
    %742 = vector.extract_strided_slice %740 {offsets = [0, 0], sizes = [1, 32], strides = [1, 1]} : vector<2x32xf32> to vector<1x32xf32>
    %cst_228 = arith.constant dense<0.000000e+00> : vector<1x16xf32>
    %743 = tpu.matmul %742, %741, %cst_228 {dimension_numbers = #tpu.dot_dimension_numbers<[1], [1], [0], [0], [0, 0, 1, 0], [], []>} : vector<1x32xf32>, vector<16x32xf32>, vector<1x16xf32> -> vector<1x16xf32>
    %cst_229 = arith.constant dense<0xFF800000> : vector<1xf32>
    %744 = vector.multi_reduction <maximumf>, %743, %cst_229 [1] : vector<1x16xf32> to vector<1xf32>
    %745 = vector.shape_cast %744 : vector<1xf32> to vector<1x1xf32>
    %746 = vector.broadcast %745 : vector<1x1xf32> to vector<1x16xf32>
    %747 = arith.subf %743, %746 : vector<1x16xf32>
    %748 = math.exp %747 : vector<1x16xf32>
    %cst_230 = arith.constant dense<0.000000e+00> : vector<1xf32>
    %749 = vector.multi_reduction <add>, %748, %cst_230 [1] : vector<1x16xf32> to vector<1xf32>
    %750 = vector.shape_cast %749 : vector<1xf32> to vector<1x1xf32>
    %751 = tpu.reciprocal %750 {approx = true} : vector<1x1xf32> -> vector<1x1xf32>
    %752 = vector.broadcast %751 : vector<1x1xf32> to vector<1x16xf32>
    %753 = arith.mulf %748, %752 : vector<1x16xf32>
    %cst_231 = arith.constant dense<0.000000e+00> : vector<1x32xf32>
    %754 = tpu.matmul %753, %741, %cst_231 {dimension_numbers = #tpu.dot_dimension_numbers<[1], [0], [0], [1], [0, 0, 1, 1], [], []>} : vector<1x16xf32>, vector<16x32xf32>, vector<1x32xf32> -> vector<1x32xf32>
    %c16_232 = arith.constant 16 : index
    %c0_233 = arith.constant 0 : index
    %755 = vector.load %arg4[%c16_232, %c0_233] : memref<32x32xf32, #tpu.memory_space<vmem>>, vector<16x32xf32>
    %756 = vector.extract_strided_slice %740 {offsets = [1, 0], sizes = [1, 32], strides = [1, 1]} : vector<2x32xf32> to vector<1x32xf32>
    %cst_234 = arith.constant dense<0.000000e+00> : vector<1x16xf32>
    %757 = tpu.matmul %756, %755, %cst_234 {dimension_numbers = #tpu.dot_dimension_numbers<[1], [1], [0], [0], [0, 0, 1, 0], [], []>} : vector<1x32xf32>, vector<16x32xf32>, vector<1x16xf32> -> vector<1x16xf32>
    %cst_235 = arith.constant dense<0xFF800000> : vector<1xf32>
    %758 = vector.multi_reduction <maximumf>, %757, %cst_235 [1] : vector<1x16xf32> to vector<1xf32>
    %759 = vector.shape_cast %758 : vector<1xf32> to vector<1x1xf32>
    %760 = vector.broadcast %759 : vector<1x1xf32> to vector<1x16xf32>
    %761 = arith.subf %757, %760 : vector<1x16xf32>
    %762 = math.exp %761 : vector<1x16xf32>
    %cst_236 = arith.constant dense<0.000000e+00> : vector<1xf32>
    %763 = vector.multi_reduction <add>, %762, %cst_236 [1] : vector<1x16xf32> to vector<1xf32>
    %764 = vector.shape_cast %763 : vector<1xf32> to vector<1x1xf32>
    %765 = tpu.reciprocal %764 {approx = true} : vector<1x1xf32> -> vector<1x1xf32>
    %766 = vector.broadcast %765 : vector<1x1xf32> to vector<1x16xf32>
    %767 = arith.mulf %762, %766 : vector<1x16xf32>
    %cst_237 = arith.constant dense<0.000000e+00> : vector<1x32xf32>
    %768 = tpu.matmul %767, %755, %cst_237 {dimension_numbers = #tpu.dot_dimension_numbers<[1], [0], [0], [1], [0, 0, 1, 1], [], []>} : vector<1x16xf32>, vector<16x32xf32>, vector<1x32xf32> -> vector<1x32xf32>
    %769 = tpu.concatenate %754, %768 in 0 : vector<1x32xf32>, vector<1x32xf32> -> vector<2x32xf32>
    %770 = arith.addf %740, %769 : vector<2x32xf32>
    %c12_238 = arith.constant 12 : index
    %c0_239 = arith.constant 0 : index
    %771 = vector.load %arg5[%c12_238, %c0_239] : memref<14x32xf32, #tpu.memory_space<vmem>>, vector<2x32xf32>
    tpu.vector_store %arg5[%c12_238, %c0_239], %770 {strides = array<i32>} : memref<14x32xf32, #tpu.memory_space<vmem>>, vector<2x32xf32>,
    %c0_240 = arith.constant 0 : index
    %c0_241 = arith.constant 0 : index
    %772 = vector.load %arg5[%c0_240, %c0_241] : memref<14x32xf32, #tpu.memory_space<vmem>>, vector<14x32xf32>
    %c144 = arith.constant 144 : index
    %c0_242 = arith.constant 0 : index
    %773 = vector.load %arg2[%c144, %c0_242] : memref<184x128xf32, #tpu.memory_space<vmem>>, vector<32x128xf32>
    %cst_243 = arith.constant dense<0.000000e+00> : vector<14x128xf32>
    %774 = tpu.matmul %772, %773, %cst_243 {dimension_numbers = #tpu.dot_dimension_numbers<[1], [0], [0], [1], [0, 0, 1, 1], [], []>} : vector<14x32xf32>, vector<32x128xf32>, vector<14x128xf32> -> vector<14x128xf32>
    %c176 = arith.constant 176 : index
    %c0_244 = arith.constant 0 : index
    %775 = vector.load %arg2[%c176, %c0_244] : memref<184x128xf32, #tpu.memory_space<vmem>>, vector<1x128xf32>
    %776 = vector.broadcast %775 : vector<1x128xf32> to vector<14x128xf32>
    %777 = arith.addf %774, %776 : vector<14x128xf32>
    %c0_245 = arith.constant 0 : index
    %c0_246 = arith.constant 0 : index
    %778 = vector.load %arg3[%c0_245, %c0_246] : memref<14x128xf32, #tpu.memory_space<vmem>>, vector<14x128xf32>
    tpu.vector_store %arg3[%c0_245, %c0_246], %777 {strides = array<i32>} : memref<14x128xf32, #tpu.memory_space<vmem>>, vector<14x128xf32>,
    return
  }
}

</mosaic_0001>

<bundles_post_ra>
// kernel: seq2seq_forward.1
= control target key start
LH: loop header
LB: loop body
LE: loop exit
PB: predicated region body
PF: predicated region fallthrough
CT: control target
= control target key end

     0   :  { %8 = vsyncpa [#allocation5], 0  ;;  %s3279_s15 = smov [#allocation4]   ;;  %s3280_s17 = smov 128   ;;  %s4016_s0 = inlined_call_operand.vmem [shape: f32[32,16], index: 0, kind: input, shape index: {}]   ;;  %s4017_s1 = inlined_call_operand.vmem [shape: s32[14,1], index: 1, kind: input, shape index: {}]   ;;  %s4018_s2 = inlined_call_operand.hbm [shape: f32[184,128], index: 2, kind: input, shape index: {}]   ;;  %s4019_s3 = inlined_call_operand.vmem [shape: f32[14,128], index: 3, kind: output, shape index: {}]  }
   0x1   :  { %s17_s14 = sshll.u32 %s4018_s2, 4  ;;  %s19_s16 = sshll.u32 %s3279_s15, 4  ;;  %s18_s14 = int_to_ptr.hbm [resolvable:$true] %s17_s14  ;;  %s20_s16 = int_to_ptr.vmem [resolvable:$true] %s19_s16 }
   0x2   :  { %s3281_s18 = smov 8  }
   0x3   :  { %25 = dma.hbm_to_vmem [thread:$0]  %s18_s14, 2944, %s20_s16, [#allocation5], %s3280_s17, %s3280_s17, %s3281_s18  }
   0x4   :  { %3277 = dma.done.wait [#allocation5], 2944  }
   0x5   :  { %3278 = vsyncadd [#allocation5], 4294964352  ;;  %v3310_v0 = vld [vmem:[#allocation4 + $0x28] sm:$0xff]  ;;  %v3312_v2 = vld [vmem:[#allocation4 + $0x20] sm:$0xff]  ;;  %vm50_vm0 = vcmask 130048   ;;  %v3282_v7 = vmov 0.0  }
   0x6   :  { %v47_v1 = vld [vmem:[#allocation4 + $0x8] sm:$0xff]  ;;  %108 = vmatpush.msra.mxu1 %v3310_v0  ;;  %v46_v3 = vld [vmem:[#allocation4] sm:$0xff]  ;;  %v42_v4 = vld [vmem:[%s4016_s0] sm:$0xff]  ;;  %176 = vmatpush.msra.mxu2 %v3310_v0  ;;  %s3283_s20 = smov 64   ;;  %s3284_s21 = smov 32   ;;  %vm158_vm5 = vcmask 253952  }
   0x7   :  { %77 = vmatpush.msra.mxu0 %v47_v1  ;;  %v3318_v5 = vld [vmem:[#allocation4 + $0x18] sm:$0xff]  ;;  %476 = vmatpush.msra.mxu3 %v3310_v0  ;;  %v3324_v6 = vld [vmem:[#allocation4 + $0x10] sm:$0xff]  ;;  %vm92_vm6 = vcmask 261120   ;;  %vm160_vm7 = vcmask 254977   ;;  %v44_v63 = vld [vmem:[%s4016_s0 + $0x10] sm:$0xff] }
   0x8   :  { %109 = vmatpush.msra.mxu1 %v3312_v2  ;;  %177 = vmatpush.msra.mxu2 %v3312_v2  ;;  %v3359_v8 = vld [vmem:[#allocation4 + $0x30] ss:$0 sm:$0xff]  ;;  %v43_v62 = vld [vmem:[%s4016_s0 + $0x8] sm:$0xff]  ;;  %v45_v1 = vld [vmem:[%s4016_s0 + $0x18] sm:$0xff] }
   0x9   :  { %78 = vmatpush.msra.mxu0 %v46_v3  ;;  %477 = vmatpush.msra.mxu3 %v3312_v2 }
   0xa   :  { %2901 = vmatmul.msk.f32.vlgmr.msra.gmra.mxu0 %vm50_vm0, %v42_v4  ;;  %110 = vmatpush.msra.mxu1 %v3318_v5 }
   0xb   :  { %253 = vmatpush.msrb.mxu0 %v3310_v0  ;;  %178 = vmatpush.msra.mxu2 %v3318_v5 }
   0xc   :  { %111 = vmatpush.msra.mxu1 %v3324_v6  ;;  %478 = vmatpush.msra.mxu3 %v3318_v5 }
   0xd   :  { %254 = vmatpush.msrb.mxu0 %v3312_v2  ;;  %112 = vmatmul.f32.vlgmr.msra.gmra.mxu1 %v3282_v7 }
   0xe   :  { %179 = vmatpush.msra.mxu2 %v3324_v6  ;;  %330 = vmatpush.msrb.mxu1 %v3310_v0 }
   0xf   :  { %255 = vmatpush.msrb.mxu0 %v3318_v5  ;;  %479 = vmatpush.msra.mxu3 %v3324_v6 }
  0x10   :  { %407 = vmatpush.msrb.mxu2 %v3310_v0  ;;  %331 = vmatpush.msrb.mxu1 %v3312_v2 }
  0x11   :  { %256 = vmatpush.msrb.mxu0 %v3324_v6  ;;  %701 = vmatpush.msrb.mxu3 %v3310_v0 }
  0x12   :  { %408 = vmatpush.msrb.mxu2 %v3312_v2  ;;  %332 = vmatpush.msrb.mxu1 %v3318_v5 }
  0x13   :  { %995 = vmatpush.msra.mxu0 %v3310_v0  ;;  %702 = vmatpush.msrb.mxu3 %v3312_v2 }
  0x14   :  { %409 = vmatpush.msrb.mxu2 %v3318_v5  ;;  %333 = vmatpush.msrb.mxu1 %v3324_v6 }
  0x15   :  { %703 = vmatpush.msrb.mxu3 %v3318_v5  ;;  %996 = vmatpush.msra.mxu0 %v3312_v2 }
  0x16   :  { %410 = vmatpush.msrb.mxu2 %v3324_v6  ;;  %551 = vmatpush.msra.mxu1 %v3310_v0 }
  0x17   :  { %704 = vmatpush.msrb.mxu3 %v3324_v6  ;;  %997 = vmatpush.msra.mxu0 %v3318_v5 }
  0x18   :  { %552 = vmatpush.msra.mxu1 %v3312_v2  ;;  %2902 = vmatmul.msk.f32.gmra.mxu0 %vm50_vm0, %v43_v62 }
  0x19   :  { %998 = vmatpush.msra.mxu0 %v3324_v6 }
  0x1a   :  { %553 = vmatpush.msra.mxu1 %v3318_v5 }
  0x1c   :  { %554 = vmatpush.msra.mxu1 %v3324_v6 }
  0x20   :  { %2903 = vmatmul.msk.f32.gmra.mxu0 %vm50_vm0, %v44_v63 }
  0x28   :  { %2904 = vmatmul.msk.f32.gmra.mxu0 %vm50_vm0, %v45_v1 }
  0x87   :  { %v80_v9 = vpop.f32.mrf.mxu0 }
  0x88   :  { %v3362_v10 = vadd.f32 %v3359_v8, %v80_v9 }
  0x8a   :  { %v113_v11 = vpop.f32.mrf.mxu1 }
  0x8b   :  { %v116_v12 = vadd.f32 %v113_v11, %v3362_v10 }
  0x8d   :  { %3001 = vtanh.f32 %v116_v12  ;;  %v117_v14 = vsub.f32 0.0, %v116_v12 }
  0x8f   :  { %v118_v15 = vmul.f32 1.442695, %v117_v14 }
  0x91   :  { %3003 = vpow2.f32 %v118_v15 }
  0x93   :  { %v3002_v13 = vpop.eup %3001 }
  0x94   :  { %139 = vrot.lane.b32.xlu0 %v3002_v13, %s3283_s20 }
  0x95   :  { %v3397_v12 = vpop.f32.mrf.mxu0 }
  0x97   :  { %v3004_v16 = vpop.eup %3003 }
  0x98   :  { %v120_v17 = vadd.f32 1.0, %v3004_v16 }
  0x9a   :  { %3005 = vrcp.f32 %v120_v17  ;;  %v132_v23 = vand.u32 2147483648, %v120_v17  ;;  %vm126_vm2 = vweird.f32 %v120_v17  ;;  %v130_v24 = vand.u32 2147483647, %v120_v17 }
  0x9c   :  { %v133_v26 = vor.u32 1.1754944e-38, %v132_v23  ;;  %vm131_vm4 = vcmp.eq.f32.partialorder %v130_v24, 8.507059e+37 }
  0x9d   :  { %v3399_v13 = vpop.f32.mrf.mxu0 }
  0xa0   :  { %v3006_v18 = vpop.eup %3005 }
  0xa1   :  { %v122_v19 = vmul.f32 %v3006_v18, %v120_v17  ;;  %vm127_vm1 = vweird.f32 %v3006_v18 }
  0xa2   :  { %vm128_vm3 = vmor %vm126_vm2, %vm127_vm1 }
  0xa3   :  { %v123_v20 = vsub.f32 1.0, %v122_v19 }
  0xa5   :  { %v124_v21 = vmul.f32 %v3006_v18, %v123_v20  ;;  %v3401_v14 = vpop.f32.mrf.mxu0 }
  0xa7   :  { %v125_v22 = vadd.f32 %v3006_v18, %v124_v21 }
  0xa9   :  { %v129_v25 = vsel %vm128_vm3, %v3006_v18, %v125_v22 }
  0xaa   :  { %v134_v28 = vsel %vm131_vm4, %v133_v26, %v129_v25 }
  0xab   :  { %v137_v30 = vmul.f32 0.0, %v134_v28 }
 0x106   :  { %v140_v27 = vpop.permute.xlu0 %139 }
 0x107   :  { %v142_v29 = vmul.f32 %v140_v27, %v134_v28 }
 0x109   :  { %144 = vrot.lane.b32.xlu0 %v142_v29, %s3284_s21 }
 0x17b   :  { %v145_v31 = vpop.permute.xlu0 %144 }
 0x17c   :  { %v147_v32 = vadd.f32 %v145_v31, %v137_v30 }
 0x17e   :  { %3007 = vtanh.f32 %v147_v32  ;;  %v209_v57 = vrot.slane %v147_v32, 6 }
 0x184   :  { %v3008_v33 = vpop.eup %3007 }
 0x185   :  { %150 = vrot.lane.b32.xlu1 %v3008_v33, %s3283_s20 }
 0x1f7   :  { %v151_v34 = vpop.permute.xlu1 %150 }
 0x1f8   :  { %v153_v35 = vmul.f32 %v151_v34, %v134_v28 }
 0x1fa   :  { %155 = vrot.lane.b32.xlu1 %v153_v35, %s3284_s21 }
 0x26c   :  { %v156_v36 = vpop.permute.xlu1 %155 }
 0x26d   :  { %159 = vst.msk [vmem:[#allocation2] sm:$0x1] %vm158_vm5, %v156_v36  ;;  %2905 = vmatmul.msk.f32.vlgmr.msra.gmra.mxu2 %vm92_vm6, %v156_v36 }
 0x26e   :  { %161 = vst.msk [vmem:[#allocation2 + $0xf] sm:$0x2] %vm160_vm7, %v156_v36  ;;  %626 = vmatpush.msra.mxu2 %v3310_v0 }
 0x270   :  { %627 = vmatpush.msra.mxu2 %v3312_v2 }
 0x272   :  { %628 = vmatpush.msra.mxu2 %v3318_v5 }
 0x274   :  { %629 = vmatpush.msra.mxu2 %v3324_v6 }
 0x2f0   :  { %v181_v37 = vpop.f32.mrf.mxu2 }
 0x2f1   :  { %v185_v38 = vrot.slane %v181_v37, 6 }
 0x2f3   :  { %v187_v39 = vadd.f32 %v185_v38, %v3362_v10 }
 0x2f5   :  { %3009 = vtanh.f32 %v187_v39  ;;  %v188_v41 = vsub.f32 0.0, %v187_v39 }
 0x2f7   :  { %v189_v42 = vmul.f32 1.442695, %v188_v41 }
 0x2f9   :  { %3011 = vpow2.f32 %v189_v42 }
 0x2fb   :  { %v3010_v40 = vpop.eup %3009 }
 0x2fc   :  { %213 = vrot.lane.b32.xlu2 %v3010_v40, %s3283_s20 }
 0x2ff   :  { %v3012_v43 = vpop.eup %3011 }
 0x300   :  { %v191_v44 = vadd.f32 1.0, %v3012_v43 }
 0x302   :  { %3013 = vrcp.f32 %v191_v44  ;;  %v203_v50 = vand.u32 2147483648, %v191_v44  ;;  %vm197_vm9 = vweird.f32 %v191_v44  ;;  %v201_v51 = vand.u32 2147483647, %v191_v44 }
 0x304   :  { %v204_v53 = vor.u32 1.1754944e-38, %v203_v50  ;;  %vm202_vm11 = vcmp.eq.f32.partialorder %v201_v51, 8.507059e+37 }
 0x308   :  { %v3014_v45 = vpop.eup %3013 }
 0x309   :  { %v193_v46 = vmul.f32 %v3014_v45, %v191_v44  ;;  %vm198_vm8 = vweird.f32 %v3014_v45 }
 0x30a   :  { %vm199_vm10 = vmor %vm197_vm9, %vm198_vm8 }
 0x30b   :  { %v194_v47 = vsub.f32 1.0, %v193_v46 }
 0x30d   :  { %v195_v48 = vmul.f32 %v3014_v45, %v194_v47 }
 0x30f   :  { %v196_v49 = vadd.f32 %v3014_v45, %v195_v48 }
 0x311   :  { %v200_v52 = vsel %vm199_vm10, %v3014_v45, %v196_v49 }
 0x312   :  { %v205_v55 = vsel %vm202_vm11, %v204_v53, %v200_v52 }
 0x313   :  { %v211_v58 = vmul.f32 %v209_v57, %v205_v55 }
 0x356   :  { %v214_v54 = vpop.permute.xlu2 %213 }
 0x357   :  { %v216_v56 = vmul.f32 %v214_v54, %v205_v55 }
 0x359   :  { %218 = vrot.lane.b32.xlu2 %v216_v56, %s3284_s21 }
 0x3b3   :  { %v219_v59 = vpop.permute.xlu2 %218 }
 0x3b4   :  { %v221_v60 = vadd.f32 %v219_v59, %v211_v58 }
 0x3b6   :  { %3015 = vtanh.f32 %v221_v60  ;;  %v286_v35 = vrot.slane %v221_v60, 6 }
 0x3bc   :  { %v3016_v61 = vpop.eup %3015 }
 0x3bd   :  { %224 = vrot.lane.b32.xlu0 %v3016_v61, %s3283_s20 }
 0x42f   :  { %v225_v3 = vpop.permute.xlu0 %224 }
 0x430   :  { %v3392_v4 = vmul.f32 %v225_v3, %v205_v55 }
 0x432   :  { %v236_v9 = vrot.slane %v3392_v4, 2 }
 0x434   :  { %237 = vrot.lane.b32.xlu1 %v236_v9, %s3284_s21 }
 0x4a6   :  { %v238_v11 = vpop.permute.xlu1 %237 }
 0x4a7   :  { %2906 = vmatmul.msk.f32.vlgmr.msrb.gmra.mxu0 %vm92_vm6, %v238_v11 }
 0x524   :  { %v258_v15 = vpop.f32.mrf.mxu0 }
 0x525   :  { %v262_v16 = vrot.slane %v258_v15, 4 }
 0x527   :  { %v264_v17 = vadd.f32 %v262_v16, %v3362_v10 }
 0x529   :  { %3017 = vtanh.f32 %v264_v17  ;;  %v265_v19 = vsub.f32 0.0, %v264_v17 }
 0x52b   :  { %v266_v20 = vmul.f32 1.442695, %v265_v19  ;;  %v3431_v19 = vadd.f32 %v3359_v8, %v3397_v12 }
 0x52d   :  { %3019 = vpow2.f32 %v266_v20 }
 0x52f   :  { %v3018_v18 = vpop.eup %3017 }
 0x530   :  { %290 = vrot.lane.b32.xlu2 %v3018_v18, %s3283_s20 }
 0x533   :  { %v3020_v21 = vpop.eup %3019 }
 0x534   :  { %v268_v22 = vadd.f32 1.0, %v3020_v21 }
 0x536   :  { %3021 = vrcp.f32 %v268_v22  ;;  %v280_v28 = vand.u32 2147483648, %v268_v22  ;;  %vm274_vm13 = vweird.f32 %v268_v22  ;;  %v278_v29 = vand.u32 2147483647, %v268_v22 }
 0x538   :  { %v281_v31 = vor.u32 1.1754944e-38, %v280_v28  ;;  %vm279_vm15 = vcmp.eq.f32.partialorder %v278_v29, 8.507059e+37 }
 0x53c   :  { %v3022_v23 = vpop.eup %3021 }
 0x53d   :  { %v270_v24 = vmul.f32 %v3022_v23, %v268_v22  ;;  %vm275_vm12 = vweird.f32 %v3022_v23 }
 0x53e   :  { %vm276_vm14 = vmor %vm274_vm13, %vm275_vm12 }
 0x53f   :  { %v271_v25 = vsub.f32 1.0, %v270_v24 }
 0x541   :  { %v272_v26 = vmul.f32 %v3022_v23, %v271_v25 }
 0x543   :  { %v273_v27 = vadd.f32 %v3022_v23, %v272_v26 }
 0x545   :  { %v277_v30 = vsel %vm276_vm14, %v3022_v23, %v273_v27 }
 0x546   :  { %v282_v33 = vsel %vm279_vm15, %v281_v31, %v277_v30 }
 0x547   :  { %v288_v36 = vmul.f32 %v286_v35, %v282_v33 }
 0x58a   :  { %v291_v32 = vpop.permute.xlu2 %290 }
 0x58b   :  { %v293_v34 = vmul.f32 %v291_v32, %v282_v33 }
 0x58d   :  { %295 = vrot.lane.b32.xlu0 %v293_v34, %s3284_s21 }
 0x5ff   :  { %v296_v37 = vpop.permute.xlu0 %295 }
 0x600   :  { %v298_v38 = vadd.f32 %v296_v37, %v288_v36 }
 0x602   :  { %3023 = vtanh.f32 %v298_v38  ;;  %v363_v63 = vrot.slane %v298_v38, 6 }
 0x608   :  { %v3024_v39 = vpop.eup %3023 }
 0x609   :  { %301 = vrot.lane.b32.xlu1 %v3024_v39, %s3283_s20 }
 0x67b   :  { %v302_v40 = vpop.permute.xlu1 %301 }
 0x67c   :  { %v3407_v41 = vmul.f32 %v302_v40, %v282_v33 }
 0x67e   :  { %v313_v42 = vrot.slane %v3407_v41, 4 }
 0x680   :  { %314 = vrot.lane.b32.xlu2 %v313_v42, %s3284_s21 }
 0x6da   :  { %v315_v43 = vpop.permute.xlu2 %314 }
 0x6db   :  { %2907 = vmatmul.msk.f32.vlgmr.msrb.gmra.mxu1 %vm92_vm6, %v315_v43 }
 0x6dc   :  { %770 = vmatpush.msrb.mxu1 %v3310_v0 }
 0x6de   :  { %771 = vmatpush.msrb.mxu1 %v3312_v2 }
 0x6e0   :  { %772 = vmatpush.msrb.mxu1 %v3318_v5 }
 0x6e2   :  { %773 = vmatpush.msrb.mxu1 %v3324_v6 }
 0x758   :  { %v335_v44 = vpop.f32.mrf.mxu1 }
 0x759   :  { %v339_v45 = vrot.slane %v335_v44, 2 }
 0x75b   :  { %v341_v46 = vadd.f32 %v339_v45, %v3362_v10 }
 0x75d   :  { %3025 = vtanh.f32 %v341_v46  ;;  %v342_v48 = vsub.f32 0.0, %v341_v46 }
 0x75f   :  { %v343_v49 = vmul.f32 1.442695, %v342_v48 }
 0x761   :  { %3027 = vpow2.f32 %v343_v49 }
 0x763   :  { %v3026_v47 = vpop.eup %3025 }
 0x764   :  { %367 = vrot.lane.b32.xlu0 %v3026_v47, %s3283_s20 }
 0x767   :  { %v3028_v50 = vpop.eup %3027 }
 0x768   :  { %v345_v51 = vadd.f32 1.0, %v3028_v50 }
 0x76a   :  { %3029 = vrcp.f32 %v345_v51  ;;  %v357_v57 = vand.u32 2147483648, %v345_v51  ;;  %vm351_vm2 = vweird.f32 %v345_v51  ;;  %v355_v58 = vand.u32 2147483647, %v345_v51 }
 0x76c   :  { %v358_v59 = vor.u32 1.1754944e-38, %v357_v57  ;;  %vm356_vm4 = vcmp.eq.f32.partialorder %v355_v58, 8.507059e+37 }
 0x770   :  { %v3030_v52 = vpop.eup %3029 }
 0x771   :  { %v347_v53 = vmul.f32 %v3030_v52, %v345_v51  ;;  %vm352_vm1 = vweird.f32 %v3030_v52 }
 0x772   :  { %vm353_vm3 = vmor %vm351_vm2, %vm352_vm1 }
 0x773   :  { %v348_v54 = vsub.f32 1.0, %v347_v53 }
 0x775   :  { %v349_v55 = vmul.f32 %v3030_v52, %v348_v54 }
 0x777   :  { %v350_v56 = vadd.f32 %v3030_v52, %v349_v55 }
 0x779   :  { %v354_v10 = vsel %vm353_vm3, %v3030_v52, %v350_v56 }
 0x77a   :  { %v359_v61 = vsel %vm356_vm4, %v358_v59, %v354_v10 }
 0x77b   :  { %v365_v1 = vmul.f32 %v363_v63, %v359_v61 }
 0x7d6   :  { %v368_v60 = vpop.permute.xlu0 %367 }
 0x7d7   :  { %v370_v62 = vmul.f32 %v368_v60, %v359_v61 }
 0x7d9   :  { %372 = vrot.lane.b32.xlu1 %v370_v62, %s3284_s21 }
 0x84b   :  { %v373_v3 = vpop.permute.xlu1 %372 }
 0x84c   :  { %v375_v9 = vadd.f32 %v373_v3, %v365_v1 }
 0x84e   :  { %3031 = vtanh.f32 %v375_v9  ;;  %v437_v38 = vrot.slane %v375_v9, 6 }
 0x854   :  { %v3032_v11 = vpop.eup %3031 }
 0x855   :  { %378 = vrot.lane.b32.xlu2 %v3032_v11, %s3283_s20 }
 0x8af   :  { %v379_v15 = vpop.permute.xlu2 %378 }
 0x8b0   :  { %v3420_v16 = vmul.f32 %v379_v15, %v359_v61 }
 0x8b2   :  { %v390_v17 = vrot.slane %v3420_v16, 6 }
 0x8b4   :  { %391 = vrot.lane.b32.xlu0 %v390_v17, %s3284_s21 }
 0x926   :  { %v392_v18 = vpop.permute.xlu0 %391 }
 0x927   :  { %2908 = vmatmul.msk.f32.vlgmr.msrb.gmra.mxu2 %vm92_vm6, %v392_v18 }
 0x928   :  { %845 = vmatpush.msrb.mxu2 %v3310_v0 }
 0x92a   :  { %846 = vmatpush.msrb.mxu2 %v3312_v2 }
 0x92c   :  { %847 = vmatpush.msrb.mxu2 %v3318_v5 }
 0x92e   :  { %848 = vmatpush.msrb.mxu2 %v3324_v6 }
 0x9aa   :  { %v412_v20 = vpop.f32.mrf.mxu2 }
 0x9ab   :  { %v415_v21 = vadd.f32 %v412_v20, %v3431_v19 }
 0x9ad   :  { %3033 = vtanh.f32 %v415_v21  ;;  %v416_v23 = vsub.f32 0.0, %v415_v21 }
 0x9af   :  { %v417_v24 = vmul.f32 1.442695, %v416_v23 }
 0x9b1   :  { %3035 = vpow2.f32 %v417_v24 }
 0x9b3   :  { %v3034_v22 = vpop.eup %3033 }
 0x9b4   :  { %441 = vrot.lane.b32.xlu1 %v3034_v22, %s3283_s20 }
 0x9b7   :  { %v3036_v25 = vpop.eup %3035 }
 0x9b8   :  { %v419_v26 = vadd.f32 1.0, %v3036_v25 }
 0x9ba   :  { %3037 = vrcp.f32 %v419_v26  ;;  %v431_v12 = vand.u32 2147483648, %v419_v26  ;;  %vm425_vm9 = vweird.f32 %v419_v26  ;;  %v429_v32 = vand.u32 2147483647, %v419_v26 }
 0x9bc   :  { %v432_v34 = vor.u32 1.1754944e-38, %v431_v12  ;;  %vm430_vm11 = vcmp.eq.f32.partialorder %v429_v32, 8.507059e+37 }
 0x9c0   :  { %v3038_v27 = vpop.eup %3037 }
 0x9c1   :  { %v421_v28 = vmul.f32 %v3038_v27, %v419_v26  ;;  %vm426_vm8 = vweird.f32 %v3038_v27 }
 0x9c2   :  { %vm427_vm10 = vmor %vm425_vm9, %vm426_vm8 }
 0x9c3   :  { %v422_v29 = vsub.f32 1.0, %v421_v28 }
 0x9c5   :  { %v423_v30 = vmul.f32 %v3038_v27, %v422_v29 }
 0x9c7   :  { %v424_v31 = vadd.f32 %v3038_v27, %v423_v30 }
 0x9c9   :  { %v428_v33 = vsel %vm427_vm10, %v3038_v27, %v424_v31 }
 0x9ca   :  { %v433_v36 = vsel %vm430_vm11, %v432_v34, %v428_v33 }
 0x9cb   :  { %v439_v39 = vmul.f32 %v437_v38, %v433_v36 }
 0xa26   :  { %v442_v35 = vpop.permute.xlu1 %441 }
 0xa27   :  { %v444_v37 = vmul.f32 %v442_v35, %v433_v36 }
 0xa29   :  { %446 = vrot.lane.b32.xlu2 %v444_v37, %s3284_s21 }
 0xa83   :  { %v447_v40 = vpop.permute.xlu2 %446 }
 0xa84   :  { %v449_v42 = vadd.f32 %v447_v40, %v439_v39 }
 0xa86   :  { %3039 = vtanh.f32 %v449_v42  ;;  %v509_v9 = vrot.slane %v449_v42, 6 }
 0xa8c   :  { %v3040_v43 = vpop.eup %3039 }
 0xa8d   :  { %452 = vrot.lane.b32.xlu0 %v3040_v43, %s3283_s20 }
 0xaff   :  { %v453_v44 = vpop.permute.xlu0 %452 }
 0xb00   :  { %v455_v45 = vmul.f32 %v453_v44, %v433_v36 }
 0xb02   :  { %457 = vrot.lane.b32.xlu1 %v455_v45, %s3284_s21 }
 0xb74   :  { %v458_v46 = vpop.permute.xlu1 %457 }
 0xb75   :  { %460 = vst.msk [vmem:[#allocation2 + $0x4] sm:$0x1] %vm158_vm5, %v458_v46  ;;  %2909 = vmatmul.msk.f32.vlgmr.msra.gmra.mxu3 %vm92_vm6, %v458_v46 }
 0xb76   :  { %461 = vst.msk [vmem:[#allocation2 + $0x13] sm:$0x2] %vm160_vm7, %v458_v46  ;;  %920 = vmatpush.msra.mxu3 %v3310_v0 }
 0xb78   :  { %921 = vmatpush.msra.mxu3 %v3312_v2 }
 0xb7a   :  { %922 = vmatpush.msra.mxu3 %v3318_v5 }
 0xb7c   :  { %923 = vmatpush.msra.mxu3 %v3324_v6 }
 0xbf8   :  { %v481_v47 = vpop.f32.mrf.mxu3 }
 0xbf9   :  { %v485_v48 = vrot.slane %v481_v47, 6 }
 0xbfb   :  { %v487_v49 = vadd.f32 %v485_v48, %v3431_v19 }
 0xbfd   :  { %3041 = vtanh.f32 %v487_v49  ;;  %v488_v51 = vsub.f32 0.0, %v487_v49 }
 0xbff   :  { %v489_v52 = vmul.f32 1.442695, %v488_v51 }
 0xc01   :  { %3043 = vpow2.f32 %v489_v52 }
 0xc03   :  { %v3042_v50 = vpop.eup %3041 }
 0xc04   :  { %513 = vrot.lane.b32.xlu2 %v3042_v50, %s3283_s20 }
 0xc07   :  { %v3044_v53 = vpop.eup %3043 }
 0xc08   :  { %v491_v54 = vadd.f32 1.0, %v3044_v53 }
 0xc0a   :  { %3045 = vrcp.f32 %v491_v54  ;;  %v503_v59 = vand.u32 2147483648, %v491_v54  ;;  %vm497_vm13 = vweird.f32 %v491_v54  ;;  %v501_v60 = vand.u32 2147483647, %v491_v54 }
 0xc0c   :  { %v504_v62 = vor.u32 1.1754944e-38, %v503_v59  ;;  %vm502_vm15 = vcmp.eq.f32.partialorder %v501_v60, 8.507059e+37 }
 0xc10   :  { %v3046_v55 = vpop.eup %3045 }
 0xc11   :  { %v493_v56 = vmul.f32 %v3046_v55, %v491_v54  ;;  %vm498_vm12 = vweird.f32 %v3046_v55 }
 0xc12   :  { %vm499_vm14 = vmor %vm497_vm13, %vm498_vm12 }
 0xc13   :  { %v494_v57 = vsub.f32 1.0, %v493_v56 }
 0xc15   :  { %v495_v58 = vmul.f32 %v3046_v55, %v494_v57 }
 0xc17   :  { %v496_v10 = vadd.f32 %v3046_v55, %v495_v58 }
 0xc19   :  { %v500_v61 = vsel %vm499_vm14, %v3046_v55, %v496_v10 }
 0xc1a   :  { %v505_v1 = vsel %vm502_vm15, %v504_v62, %v500_v61 }
 0xc1b   :  { %v511_v11 = vmul.f32 %v509_v9, %v505_v1 }
 0xc5e   :  { %v514_v63 = vpop.permute.xlu2 %513 }
 0xc5f   :  { %v516_v3 = vmul.f32 %v514_v63, %v505_v1 }
 0xc61   :  { %518 = vrot.lane.b32.xlu0 %v516_v3, %s3284_s21 }
 0xcd3   :  { %v519_v15 = vpop.permute.xlu0 %518 }
 0xcd4   :  { %v521_v17 = vadd.f32 %v519_v15, %v511_v11 }
 0xcd6   :  { %3047 = vtanh.f32 %v521_v17  ;;  %v584_v44 = vrot.slane %v521_v17, 6 }
 0xcdc   :  { %v3048_v18 = vpop.eup %3047 }
 0xcdd   :  { %524 = vrot.lane.b32.xlu1 %v3048_v18, %s3283_s20 }
 0xd4f   :  { %v525_v20 = vpop.permute.xlu1 %524 }
 0xd50   :  { %v3449_v21 = vmul.f32 %v525_v20, %v505_v1 }
 0xd52   :  { %v534_v22 = vrot.slane %v3449_v21, 2 }
 0xd54   :  { %535 = vrot.lane.b32.xlu2 %v534_v22, %s3284_s21 }
 0xdae   :  { %v536_v23 = vpop.permute.xlu2 %535 }
 0xdaf   :  { %2910 = vmatmul.msk.f32.vlgmr.msra.gmra.mxu1 %vm92_vm6, %v536_v23 }
 0xdb0   :  { %1064 = vmatpush.msra.mxu1 %v3310_v0 }
 0xdb2   :  { %1065 = vmatpush.msra.mxu1 %v3312_v2 }
 0xdb4   :  { %1066 = vmatpush.msra.mxu1 %v3318_v5 }
 0xdb6   :  { %1067 = vmatpush.msra.mxu1 %v3324_v6 }
 0xe2c   :  { %v556_v24 = vpop.f32.mrf.mxu1 }
 0xe2d   :  { %v560_v25 = vrot.slane %v556_v24, 4 }
 0xe2f   :  { %v562_v26 = vadd.f32 %v560_v25, %v3431_v19 }
 0xe31   :  { %3049 = vtanh.f32 %v562_v26  ;;  %v563_v28 = vsub.f32 0.0, %v562_v26 }
 0xe33   :  { %v564_v29 = vmul.f32 1.442695, %v563_v28 }
 0xe35   :  { %3051 = vpow2.f32 %v564_v29 }
 0xe37   :  { %v3050_v27 = vpop.eup %3049 }
 0xe38   :  { %588 = vrot.lane.b32.xlu0 %v3050_v27, %s3283_s20 }
 0xe3b   :  { %v3052_v30 = vpop.eup %3051 }
 0xe3c   :  { %v566_v31 = vadd.f32 1.0, %v3052_v30  ;;  %v3486_v30 = vadd.f32 %v3359_v8, %v3399_v13 }
 0xe3e   :  { %3053 = vrcp.f32 %v566_v31  ;;  %v578_v36 = vand.u32 2147483648, %v566_v31  ;;  %vm572_vm2 = vweird.f32 %v566_v31  ;;  %v576_v37 = vand.u32 2147483647, %v566_v31 }
 0xe40   :  { %v579_v39 = vor.u32 1.1754944e-38, %v578_v36  ;;  %vm577_vm4 = vcmp.eq.f32.partialorder %v576_v37, 8.507059e+37 }
 0xe44   :  { %v3054_v12 = vpop.eup %3053 }
 0xe45   :  { %v568_v32 = vmul.f32 %v3054_v12, %v566_v31  ;;  %vm573_vm1 = vweird.f32 %v3054_v12 }
 0xe46   :  { %vm574_vm3 = vmor %vm572_vm2, %vm573_vm1 }
 0xe47   :  { %v569_v33 = vsub.f32 1.0, %v568_v32 }
 0xe49   :  { %v570_v34 = vmul.f32 %v3054_v12, %v569_v33 }
 0xe4b   :  { %v571_v35 = vadd.f32 %v3054_v12, %v570_v34 }
 0xe4d   :  { %v575_v38 = vsel %vm574_vm3, %v3054_v12, %v571_v35 }
 0xe4e   :  { %v580_v42 = vsel %vm577_vm4, %v579_v39, %v575_v38 }
 0xe4f   :  { %v586_v45 = vmul.f32 %v584_v44, %v580_v42 }
 0xeaa   :  { %v589_v40 = vpop.permute.xlu0 %588 }
 0xeab   :  { %v591_v43 = vmul.f32 %v589_v40, %v580_v42 }
 0xead   :  { %593 = vrot.lane.b32.xlu1 %v591_v43, %s3284_s21 }
 0xf1f   :  { %v594_v46 = vpop.permute.xlu1 %593 }
 0xf20   :  { %v596_v47 = vadd.f32 %v594_v46, %v586_v45 }
 0xf22   :  { %3055 = vtanh.f32 %v596_v47  ;;  %v659_v20 = vrot.slane %v596_v47, 6 }
 0xf28   :  { %v3056_v48 = vpop.eup %3055 }
 0xf29   :  { %599 = vrot.lane.b32.xlu2 %v3056_v48, %s3283_s20 }
 0xf83   :  { %v600_v49 = vpop.permute.xlu2 %599 }
 0xf84   :  { %v3462_v50 = vmul.f32 %v600_v49, %v580_v42 }
 0xf86   :  { %v609_v51 = vrot.slane %v3462_v50, 4 }
 0xf88   :  { %610 = vrot.lane.b32.xlu0 %v609_v51, %s3284_s21 }
 0xffa   :  { %v611_v52 = vpop.permute.xlu0 %610 }
 0xffb   :  { %2911 = vmatmul.msk.f32.vlgmr.msra.gmra.mxu2 %vm92_vm6, %v611_v52 }
 0xffc   :  { %1139 = vmatpush.msra.mxu2 %v3310_v0 }
 0xffe   :  { %1140 = vmatpush.msra.mxu2 %v3312_v2 }
0x1000   :  { %1141 = vmatpush.msra.mxu2 %v3318_v5 }
0x1002   :  { %1142 = vmatpush.msra.mxu2 %v3324_v6 }
0x107e   :  { %v631_v53 = vpop.f32.mrf.mxu2 }
0x107f   :  { %v635_v54 = vrot.slane %v631_v53, 2 }
0x1081   :  { %v637_v55 = vadd.f32 %v635_v54, %v3431_v19 }
0x1083   :  { %3057 = vtanh.f32 %v637_v55  ;;  %v638_v57 = vsub.f32 0.0, %v637_v55 }
0x1085   :  { %v639_v58 = vmul.f32 1.442695, %v638_v57 }
0x1087   :  { %3059 = vpow2.f32 %v639_v58 }
0x1089   :  { %v3058_v56 = vpop.eup %3057 }
0x108a   :  { %663 = vrot.lane.b32.xlu1 %v3058_v56, %s3283_s20 }
0x108d   :  { %v3060_v10 = vpop.eup %3059 }
0x108e   :  { %v641_v59 = vadd.f32 1.0, %v3060_v10 }
0x1090   :  { %3061 = vrcp.f32 %v641_v59  ;;  %v653_v3 = vand.u32 2147483648, %v641_v59  ;;  %vm647_vm9 = vweird.f32 %v641_v59  ;;  %v651_v9 = vand.u32 2147483647, %v641_v59 }
0x1092   :  { %v654_v11 = vor.u32 1.1754944e-38, %v653_v3  ;;  %vm652_vm11 = vcmp.eq.f32.partialorder %v651_v9, 8.507059e+37 }
0x1096   :  { %v3062_v60 = vpop.eup %3061 }
0x1097   :  { %v643_v61 = vmul.f32 %v3062_v60, %v641_v59  ;;  %vm648_vm8 = vweird.f32 %v3062_v60 }
0x1098   :  { %vm649_vm10 = vmor %vm647_vm9, %vm648_vm8 }
0x1099   :  { %v644_v62 = vsub.f32 1.0, %v643_v61 }
0x109b   :  { %v645_v63 = vmul.f32 %v3062_v60, %v644_v62 }
0x109d   :  { %v646_v1 = vadd.f32 %v3062_v60, %v645_v63 }
0x109f   :  { %v650_v19 = vsel %vm649_vm10, %v3062_v60, %v646_v1 }
0x10a0   :  { %v655_v17 = vsel %vm652_vm11, %v654_v11, %v650_v19 }
0x10a1   :  { %v661_v22 = vmul.f32 %v659_v20, %v655_v17 }
0x10fc   :  { %v664_v15 = vpop.permute.xlu1 %663 }
0x10fd   :  { %v666_v18 = vmul.f32 %v664_v15, %v655_v17 }
0x10ff   :  { %668 = vrot.lane.b32.xlu2 %v666_v18, %s3284_s21 }
0x1159   :  { %v669_v23 = vpop.permute.xlu2 %668 }
0x115a   :  { %v671_v24 = vadd.f32 %v669_v23, %v661_v22 }
0x115c   :  { %3063 = vtanh.f32 %v671_v24  ;;  %v731_v44 = vrot.slane %v671_v24, 6 }
0x1162   :  { %v3064_v25 = vpop.eup %3063 }
0x1163   :  { %674 = vrot.lane.b32.xlu0 %v3064_v25, %s3283_s20 }
0x11d5   :  { %v675_v26 = vpop.permute.xlu0 %674 }
0x11d6   :  { %v3475_v27 = vmul.f32 %v675_v26, %v655_v17 }
0x11d8   :  { %v684_v28 = vrot.slane %v3475_v27, 6 }
0x11da   :  { %685 = vrot.lane.b32.xlu1 %v684_v28, %s3284_s21 }
0x124c   :  { %v686_v29 = vpop.permute.xlu1 %685 }
0x124d   :  { %2912 = vmatmul.msk.f32.vlgmr.msrb.gmra.mxu3 %vm92_vm6, %v686_v29 }
0x124e   :  { %1214 = vmatpush.msrb.mxu3 %v3310_v0 }
0x1250   :  { %1215 = vmatpush.msrb.mxu3 %v3312_v2 }
0x1252   :  { %1216 = vmatpush.msrb.mxu3 %v3318_v5 }
0x1254   :  { %1217 = vmatpush.msrb.mxu3 %v3324_v6 }
0x12d0   :  { %v706_v31 = vpop.f32.mrf.mxu3 }
0x12d1   :  { %v709_v12 = vadd.f32 %v706_v31, %v3486_v30 }
0x12d3   :  { %3065 = vtanh.f32 %v709_v12  ;;  %v710_v33 = vsub.f32 0.0, %v709_v12 }
0x12d5   :  { %v711_v34 = vmul.f32 1.442695, %v710_v33 }
0x12d7   :  { %3067 = vpow2.f32 %v711_v34 }
0x12d9   :  { %v3066_v32 = vpop.eup %3065 }
0x12da   :  { %735 = vrot.lane.b32.xlu2 %v3066_v32, %s3283_s20 }
0x12dd   :  { %v3068_v0 = vpop.eup %3067 }
0x12de   :  { %v713_v2 = vadd.f32 1.0, %v3068_v0 }
0x12e0   :  { %3069 = vrcp.f32 %v713_v2  ;;  %v725_v8 = vand.u32 2147483648, %v713_v2  ;;  %vm719_vm13 = vweird.f32 %v713_v2  ;;  %v723_v13 = vand.u32 2147483647, %v713_v2 }
0x12e2   :  { %v726_v39 = vor.u32 1.1754944e-38, %v725_v8  ;;  %vm724_vm15 = vcmp.eq.f32.partialorder %v723_v13, 8.507059e+37 }
0x12e6   :  { %v3070_v5 = vpop.eup %3069 }
0x12e7   :  { %v715_v35 = vmul.f32 %v3070_v5, %v713_v2  ;;  %vm720_vm12 = vweird.f32 %v3070_v5 }
0x12e8   :  { %vm721_vm14 = vmor %vm719_vm13, %vm720_vm12 }
0x12e9   :  { %v716_v6 = vsub.f32 1.0, %v715_v35 }
0x12eb   :  { %v717_v36 = vmul.f32 %v3070_v5, %v716_v6 }
0x12ed   :  { %v718_v37 = vadd.f32 %v3070_v5, %v717_v36 }
0x12ef   :  { %v722_v38 = vsel %vm721_vm14, %v3070_v5, %v718_v37 }
0x12f0   :  { %v727_v42 = vsel %vm724_vm15, %v726_v39, %v722_v38 }
0x12f1   :  { %v733_v45 = vmul.f32 %v731_v44, %v727_v42 }
0x1334   :  { %v736_v40 = vpop.permute.xlu2 %735 }
0x1335   :  { %v738_v43 = vmul.f32 %v736_v40, %v727_v42 }
0x1337   :  { %740 = vrot.lane.b32.xlu0 %v738_v43, %s3284_s21 }
0x13a9   :  { %v741_v46 = vpop.permute.xlu0 %740 }
0x13aa   :  { %v743_v47 = vadd.f32 %v741_v46, %v733_v45 }
0x13ac   :  { %3071 = vtanh.f32 %v743_v47  ;;  %v803_v20 = vrot.slane %v743_v47, 6 }
0x13b2   :  { %v3072_v48 = vpop.eup %3071 }
0x13b3   :  { %746 = vrot.lane.b32.xlu1 %v3072_v48, %s3283_s20 }
0x1425   :  { %v747_v49 = vpop.permute.xlu1 %746 }
0x1426   :  { %v749_v51 = vmul.f32 %v747_v49, %v727_v42 }
0x1428   :  { %751 = vrot.lane.b32.xlu2 %v749_v51, %s3284_s21 }
0x1482   :  { %v752_v52 = vpop.permute.xlu2 %751 }
0x1483   :  { %754 = vst.msk [vmem:[#allocation2 + $0x8] sm:$0x1] %vm158_vm5, %v752_v52  ;;  %2913 = vmatmul.msk.f32.vlgmr.msrb.gmra.mxu1 %vm92_vm6, %v752_v52 }
0x1484   :  { %755 = vst.msk [vmem:[#allocation2 + $0x17] sm:$0x2] %vm160_vm7, %v752_v52 }
0x1500   :  { %v775_v53 = vpop.f32.mrf.mxu1 }
0x1501   :  { %v779_v54 = vrot.slane %v775_v53, 6 }
0x1503   :  { %v781_v55 = vadd.f32 %v779_v54, %v3486_v30 }
0x1505   :  { %3073 = vtanh.f32 %v781_v55  ;;  %v782_v57 = vsub.f32 0.0, %v781_v55 }
0x1507   :  { %v783_v58 = vmul.f32 1.442695, %v782_v57 }
0x1509   :  { %3075 = vpow2.f32 %v783_v58 }
0x150b   :  { %v3074_v56 = vpop.eup %3073 }
0x150c   :  { %807 = vrot.lane.b32.xlu0 %v3074_v56, %s3283_s20 }
0x150f   :  { %v3076_v10 = vpop.eup %3075 }
0x1510   :  { %v785_v59 = vadd.f32 1.0, %v3076_v10 }
0x1512   :  { %3077 = vrcp.f32 %v785_v59  ;;  %v797_v3 = vand.u32 2147483648, %v785_v59  ;;  %vm791_vm2 = vweird.f32 %v785_v59  ;;  %v795_v9 = vand.u32 2147483647, %v785_v59 }
0x1514   :  { %v798_v11 = vor.u32 1.1754944e-38, %v797_v3  ;;  %vm796_vm4 = vcmp.eq.f32.partialorder %v795_v9, 8.507059e+37 }
0x1518   :  { %v3078_v60 = vpop.eup %3077 }
0x1519   :  { %v787_v61 = vmul.f32 %v3078_v60, %v785_v59  ;;  %vm792_vm1 = vweird.f32 %v3078_v60 }
0x151a   :  { %vm793_vm3 = vmor %vm791_vm2, %vm792_vm1 }
0x151b   :  { %v788_v62 = vsub.f32 1.0, %v787_v61 }
0x151d   :  { %v789_v63 = vmul.f32 %v3078_v60, %v788_v62 }
0x151f   :  { %v790_v1 = vadd.f32 %v3078_v60, %v789_v63 }
0x1521   :  { %v794_v19 = vsel %vm793_vm3, %v3078_v60, %v790_v1 }
0x1522   :  { %v799_v17 = vsel %vm796_vm4, %v798_v11, %v794_v19 }
0x1523   :  { %v805_v22 = vmul.f32 %v803_v20, %v799_v17 }
0x157e   :  { %v808_v15 = vpop.permute.xlu0 %807 }
0x157f   :  { %v810_v18 = vmul.f32 %v808_v15, %v799_v17 }
0x1581   :  { %812 = vrot.lane.b32.xlu1 %v810_v18, %s3284_s21 }
0x15f3   :  { %v813_v23 = vpop.permute.xlu1 %812 }
0x15f4   :  { %v815_v24 = vadd.f32 %v813_v23, %v805_v22 }
0x15f6   :  { %3079 = vtanh.f32 %v815_v24  ;;  %v878_v46 = vrot.slane %v815_v24, 6 }
0x15fc   :  { %v3080_v25 = vpop.eup %3079 }
0x15fd   :  { %818 = vrot.lane.b32.xlu2 %v3080_v25, %s3283_s20 }
0x1657   :  { %v819_v26 = vpop.permute.xlu2 %818 }
0x1658   :  { %v3500_v28 = vmul.f32 %v819_v26, %v799_v17 }
0x165a   :  { %v828_v29 = vrot.slane %v3500_v28, 2 }
0x165c   :  { %829 = vrot.lane.b32.xlu0 %v828_v29, %s3284_s21 }
0x16ce   :  { %v830_v31 = vpop.permute.xlu0 %829 }
0x16cf   :  { %2914 = vmatmul.msk.f32.vlgmr.msrb.gmra.mxu2 %vm92_vm6, %v830_v31 }
0x1752   :  { %v850_v12 = vpop.f32.mrf.mxu2 }
0x1753   :  { %v854_v32 = vrot.slane %v850_v12, 4 }
0x1755   :  { %v856_v33 = vadd.f32 %v854_v32, %v3486_v30 }
0x1757   :  { %3081 = vtanh.f32 %v856_v33  ;;  %v857_v0 = vsub.f32 0.0, %v856_v33 }
0x1759   :  { %v858_v2 = vmul.f32 1.442695, %v857_v0 }
0x175b   :  { %3083 = vpow2.f32 %v858_v2 }
0x175d   :  { %v3082_v34 = vpop.eup %3081 }
0x175e   :  { %882 = vrot.lane.b32.xlu1 %v3082_v34, %s3283_s20  ;;  %v3241_v34 = vld [vmem:[#allocation4 + $0x30] ss:$0 sm:$0xff] }
0x175f   :  { %v3524_v0 = vadd.f32 %v3241_v34, %v3401_v14 }
0x1761   :  { %v3084_v5 = vpop.eup %3083 }
0x1762   :  { %v860_v35 = vadd.f32 1.0, %v3084_v5 }
0x1764   :  { %3085 = vrcp.f32 %v860_v35  ;;  %v872_v38 = vand.u32 2147483648, %v860_v35  ;;  %vm866_vm9 = vweird.f32 %v860_v35  ;;  %v870_v39 = vand.u32 2147483647, %v860_v35 }
0x1766   :  { %v873_v42 = vor.u32 1.1754944e-38, %v872_v38  ;;  %vm871_vm11 = vcmp.eq.f32.partialorder %v870_v39, 8.507059e+37 }
0x176a   :  { %v3086_v6 = vpop.eup %3085 }
0x176b   :  { %v862_v36 = vmul.f32 %v3086_v6, %v860_v35  ;;  %vm867_vm8 = vweird.f32 %v3086_v6 }
0x176c   :  { %vm868_vm10 = vmor %vm866_vm9, %vm867_vm8 }
0x176d   :  { %v863_v37 = vsub.f32 1.0, %v862_v36 }
0x176f   :  { %v864_v8 = vmul.f32 %v3086_v6, %v863_v37 }
0x1771   :  { %v865_v13 = vadd.f32 %v3086_v6, %v864_v8 }
0x1773   :  { %v869_v40 = vsel %vm868_vm10, %v3086_v6, %v865_v13 }
0x1774   :  { %v874_v44 = vsel %vm871_vm11, %v873_v42, %v869_v40 }
0x1775   :  { %v880_v47 = vmul.f32 %v878_v46, %v874_v44 }
0x17d0   :  { %v883_v43 = vpop.permute.xlu1 %882 }
0x17d1   :  { %v885_v45 = vmul.f32 %v883_v43, %v874_v44 }
0x17d3   :  { %887 = vrot.lane.b32.xlu2 %v885_v45, %s3284_s21 }
0x182d   :  { %v888_v48 = vpop.permute.xlu2 %887 }
0x182e   :  { %v890_v49 = vadd.f32 %v888_v48, %v880_v47 }
0x1830   :  { %3087 = vtanh.f32 %v890_v49  ;;  %v953_v23 = vrot.slane %v890_v49, 6 }
0x1836   :  { %v3088_v51 = vpop.eup %3087 }
0x1837   :  { %893 = vrot.lane.b32.xlu0 %v3088_v51, %s3283_s20 }
0x18a9   :  { %v894_v52 = vpop.permute.xlu0 %893 }
0x18aa   :  { %v3509_v53 = vmul.f32 %v894_v52, %v874_v44 }
0x18ac   :  { %v903_v54 = vrot.slane %v3509_v53, 4 }
0x18ae   :  { %904 = vrot.lane.b32.xlu1 %v903_v54, %s3284_s21 }
0x1920   :  { %v905_v55 = vpop.permute.xlu1 %904 }
0x1921   :  { %2915 = vmatmul.msk.f32.vlgmr.msra.gmra.mxu3 %vm92_vm6, %v905_v55 }
0x19a4   :  { %v925_v56 = vpop.f32.mrf.mxu3 }
0x19a5   :  { %v929_v57 = vrot.slane %v925_v56, 2 }
0x19a7   :  { %v931_v58 = vadd.f32 %v929_v57, %v3486_v30 }
0x19a9   :  { %3089 = vtanh.f32 %v931_v58  ;;  %v932_v59 = vsub.f32 0.0, %v931_v58 }
0x19ab   :  { %v933_v60 = vmul.f32 1.442695, %v932_v59 }
0x19ad   :  { %3091 = vpow2.f32 %v933_v60 }
0x19af   :  { %v3090_v10 = vpop.eup %3089 }
0x19b0   :  { %957 = vrot.lane.b32.xlu2 %v3090_v10, %s3283_s20 }
0x19b3   :  { %v3092_v61 = vpop.eup %3091 }
0x19b4   :  { %v935_v62 = vadd.f32 1.0, %v3092_v61 }
0x19b6   :  { %3093 = vrcp.f32 %v935_v62  ;;  %v947_v11 = vand.u32 2147483648, %v935_v62  ;;  %vm941_vm13 = vweird.f32 %v935_v62  ;;  %v945_v15 = vand.u32 2147483647, %v935_v62 }
0x19b8   :  { %v948_v17 = vor.u32 1.1754944e-38, %v947_v11  ;;  %vm946_vm15 = vcmp.eq.f32.partialorder %v945_v15, 8.507059e+37 }
0x19bc   :  { %v3094_v63 = vpop.eup %3093 }
0x19bd   :  { %v937_v1 = vmul.f32 %v3094_v63, %v935_v62  ;;  %vm942_vm12 = vweird.f32 %v3094_v63 }
0x19be   :  { %vm943_vm14 = vmor %vm941_vm13, %vm942_vm12 }
0x19bf   :  { %v938_v3 = vsub.f32 1.0, %v937_v1 }
0x19c1   :  { %v939_v9 = vmul.f32 %v3094_v63, %v938_v3 }
0x19c3   :  { %v940_v19 = vadd.f32 %v3094_v63, %v939_v9 }
0x19c5   :  { %v944_v30 = vsel %vm943_vm14, %v3094_v63, %v940_v19 }
0x19c6   :  { %v949_v20 = vsel %vm946_vm15, %v948_v17, %v944_v30 }
0x19c7   :  { %v955_v24 = vmul.f32 %v953_v23, %v949_v20 }
0x1a0a   :  { %v958_v18 = vpop.permute.xlu2 %957 }
0x1a0b   :  { %v960_v22 = vmul.f32 %v958_v18, %v949_v20 }
0x1a0d   :  { %962 = vrot.lane.b32.xlu0 %v960_v22, %s3284_s21 }
0x1a7f   :  { %v963_v25 = vpop.permute.xlu0 %962 }
0x1a80   :  { %v965_v26 = vadd.f32 %v963_v25, %v955_v24 }
0x1a82   :  { %3095 = vtanh.f32 %v965_v26  ;;  %v1025_v49 = vrot.slane %v965_v26, 6 }
0x1a88   :  { %v3096_v29 = vpop.eup %3095 }
0x1a89   :  { %968 = vrot.lane.b32.xlu1 %v3096_v29, %s3283_s20 }
0x1afb   :  { %v969_v31 = vpop.permute.xlu1 %968 }
0x1afc   :  { %v3518_v12 = vmul.f32 %v969_v31, %v949_v20 }
0x1afe   :  { %v978_v32 = vrot.slane %v3518_v12, 6 }
0x1b00   :  { %979 = vrot.lane.b32.xlu2 %v978_v32, %s3284_s21 }
0x1b5a   :  { %v980_v33 = vpop.permute.xlu2 %979 }
0x1b5b   :  { %2916 = vmatmul.msk.f32.vlgmr.msra.gmra.mxu0 %vm92_vm6, %v980_v33 }
0x1bd8   :  { %v1000_v2 = vpop.f32.mrf.mxu0 }
0x1bd9   :  { %v1003_v5 = vadd.f32 %v1000_v2, %v3524_v0 }
0x1bdb   :  { %3097 = vtanh.f32 %v1003_v5  ;;  %v1004_v6 = vsub.f32 0.0, %v1003_v5 }
0x1bdd   :  { %v1005_v36 = vmul.f32 1.442695, %v1004_v6 }
0x1bdf   :  { %3099 = vpow2.f32 %v1005_v36 }
0x1be1   :  { %v3098_v35 = vpop.eup %3097 }
0x1be2   :  { %1029 = vrot.lane.b32.xlu0 %v3098_v35, %s3283_s20 }
0x1be5   :  { %v3100_v37 = vpop.eup %3099 }
0x1be6   :  { %v1007_v8 = vadd.f32 1.0, %v3100_v37 }
0x1be8   :  { %3101 = vrcp.f32 %v1007_v8  ;;  %v1019_v14 = vand.u32 2147483648, %v1007_v8  ;;  %vm1013_vm2 = vweird.f32 %v1007_v8  ;;  %v1017_v43 = vand.u32 2147483647, %v1007_v8 }
0x1bea   :  { %v1020_v45 = vor.u32 1.1754944e-38, %v1019_v14  ;;  %vm1018_vm4 = vcmp.eq.f32.partialorder %v1017_v43, 8.507059e+37  ;;  %v3548_v43 = vld [vmem:[#allocation4 + $0x80] sm:$0xff] }
0x1beb   :  { %1332 = vmatpush.msrb.mxu1 %v3548_v43 }
0x1bee   :  { %v3102_v13 = vpop.eup %3101 }
0x1bef   :  { %v1009_v38 = vmul.f32 %v3102_v13, %v1007_v8  ;;  %vm1014_vm1 = vweird.f32 %v3102_v13 }
0x1bf0   :  { %vm1015_vm3 = vmor %vm1013_vm2, %vm1014_vm1 }
0x1bf1   :  { %v1010_v39 = vsub.f32 1.0, %v1009_v38 }
0x1bf3   :  { %v1011_v40 = vmul.f32 %v3102_v13, %v1010_v39 }
0x1bf5   :  { %v1012_v42 = vadd.f32 %v3102_v13, %v1011_v40 }
0x1bf7   :  { %v1016_v44 = vsel %vm1015_vm3, %v3102_v13, %v1012_v42  ;;  %v3285_v42 = vmov 0  }
0x1bf8   :  { %v1021_v47 = vsel %vm1018_vm4, %v1020_v45, %v1016_v44  ;;  %2996 = vset.pattern.permute.xlu0 %v3285_v42  ;;  %2997 = vset.pattern.permute.xlu1 %v3285_v42  ;;  %v3550_v44 = vld [vmem:[#allocation4 + $0x78] sm:$0xff]  ;;  %vm232_vm4 = vcmask 256002  }
0x1bf9   :  { %v1027_v51 = vmul.f32 %v1025_v49, %v1021_v47  ;;  %1333 = vmatpush.msrb.mxu1 %v3550_v44 }
0x1c54   :  { %v1030_v46 = vpop.permute.xlu0 %1029 }
0x1c55   :  { %v1032_v48 = vmul.f32 %v1030_v46, %v1021_v47 }
0x1c57   :  { %1034 = vrot.lane.b32.xlu1 %v1032_v48, %s3284_s21 }
0x1cc9   :  { %v1035_v52 = vpop.permute.xlu1 %1034 }
0x1cca   :  { %v1037_v54 = vadd.f32 %v1035_v52, %v1027_v51 }
0x1ccc   :  { %3103 = vtanh.f32 %v1037_v54  ;;  %v1097_v26 = vrot.slane %v1037_v54, 6 }
0x1cd2   :  { %v3104_v55 = vpop.eup %3103 }
0x1cd3   :  { %1040 = vrot.lane.b32.xlu2 %v3104_v55, %s3283_s20 }
0x1d2d   :  { %v1041_v56 = vpop.permute.xlu2 %1040 }
0x1d2e   :  { %v1043_v57 = vmul.f32 %v1041_v56, %v1021_v47 }
0x1d30   :  { %1045 = vrot.lane.b32.xlu0 %v1043_v57, %s3284_s21 }
0x1da2   :  { %v1046_v58 = vpop.permute.xlu0 %1045 }
0x1da3   :  { %1048 = vst.msk [vmem:[#allocation2 + $0xc] sm:$0x1] %vm158_vm5, %v1046_v58  ;;  %2917 = vmatmul.msk.f32.vlgmr.msra.gmra.mxu1 %vm92_vm6, %v1046_v58 }
0x1da4   :  { %1049 = vst.msk [vmem:[#allocation2 + $0x1b] sm:$0x2] %vm160_vm7, %v1046_v58  ;;  %v1272_v58 = vld [vmem:[%s4017_s1] sm:$0xff] }
0x1e20   :  { %v1069_v10 = vpop.f32.mrf.mxu1 }
0x1e21   :  { %v1073_v59 = vrot.slane %v1069_v10, 6  ;;  %v3558_v10 = vld [vmem:[#allocation4 + $0x70] sm:$0xff] }
0x1e22   :  { %1334 = vmatpush.msrb.mxu1 %v3558_v10 }
0x1e23   :  { %v1075_v60 = vadd.f32 %v1073_v59, %v3524_v0  ;;  %v3561_v59 = vld [vmem:[#allocation4 + $0x68] sm:$0xff] }
0x1e24   :  { %1335 = vmatpush.msrb.mxu1 %v3561_v59 }
0x1e25   :  { %3105 = vtanh.f32 %v1075_v60  ;;  %v1076_v62 = vsub.f32 0.0, %v1075_v60  ;;  %v1289_v60 = vld [vmem:[#allocation4 + $0x40] sm:$0xff] }
0x1e26   :  { %1312 = vmatpush.msrb.mxu0 %v1289_v60 }
0x1e27   :  { %v1077_v63 = vmul.f32 1.442695, %v1076_v62  ;;  %v3566_v62 = vld [vmem:[#allocation4 + $0x58] sm:$0xff] }
0x1e29   :  { %3107 = vpow2.f32 %v1077_v63  ;;  %v1288_v63 = vld [vmem:[#allocation4 + $0x38] sm:$0xff] }
0x1e2a   :  { %1313 = vmatpush.msrb.mxu0 %v1288_v63 }
0x1e2b   :  { %v3106_v61 = vpop.eup %3105 }
0x1e2c   :  { %1101 = vrot.lane.b32.xlu1 %v3106_v61, %s3283_s20  ;;  %v3563_v61 = vld [vmem:[#allocation4 + $0x60] sm:$0xff]  ;;  %1548 = vmatpush.msra.mxu0 %v3548_v43 }
0x1e2d   :  { %1336 = vmatpush.msrb.mxu1 %v3563_v61 }
0x1e2e   :  { %1549 = vmatpush.msra.mxu0 %v3550_v44 }
0x1e2f   :  { %v3108_v1 = vpop.eup %3107  ;;  %1337 = vmatpush.msrb.mxu1 %v3566_v62 }
0x1e30   :  { %v1079_v3 = vadd.f32 1.0, %v3108_v1  ;;  %v3570_v1 = vld [vmem:[#allocation4 + $0x50] sm:$0xff]  ;;  %1550 = vmatpush.msra.mxu0 %v3558_v10 }
0x1e31   :  { %1338 = vmatpush.msrb.mxu1 %v3570_v1 }
0x1e32   :  { %3109 = vrcp.f32 %v1079_v3  ;;  %v1091_v17 = vand.u32 2147483648, %v1079_v3  ;;  %vm1085_vm7 = vweird.f32 %v1079_v3  ;;  %v1089_v18 = vand.u32 2147483647, %v1079_v3  ;;  %1551 = vmatpush.msra.mxu0 %v3561_v59 }
0x1e34   :  { %v1092_v22 = vor.u32 1.1754944e-38, %v1091_v17  ;;  %vm1090_vm9 = vcmp.eq.f32.partialorder %v1089_v18, 8.507059e+37  ;;  %1552 = vmatpush.msra.mxu0 %v3563_v61 }
0x1e36   :  { %1553 = vmatpush.msra.mxu0 %v3566_v62 }
0x1e38   :  { %v3110_v9 = vpop.eup %3109  ;;  %1554 = vmatpush.msra.mxu0 %v3570_v1 }
0x1e39   :  { %v1081_v19 = vmul.f32 %v3110_v9, %v1079_v3  ;;  %vm1086_vm5 = vweird.f32 %v3110_v9  ;;  %v3573_v3 = vld [vmem:[#allocation4 + $0x48] sm:$0xff] }
0x1e3a   :  { %vm1087_vm8 = vmor %vm1085_vm7, %vm1086_vm5  ;;  %1339 = vmatpush.msrb.mxu1 %v3573_v3  ;;  %1555 = vmatpush.msra.mxu0 %v3573_v3  ;;  %vm234_vm5 = vcmask 257027  }
0x1e3b   :  { %v1082_v11 = vsub.f32 1.0, %v1081_v19  ;;  %1340 = vmatmul.f32.vlgmr.msrb.gmra.mxu1 %v3282_v7 }
0x1e3d   :  { %v1083_v15 = vmul.f32 %v3110_v9, %v1082_v11 }
0x1e3f   :  { %v1084_v30 = vadd.f32 %v3110_v9, %v1083_v15 }
0x1e41   :  { %v1088_v20 = vsel %vm1087_vm8, %v3110_v9, %v1084_v30  ;;  %v1274_v30 = vlaneseq }
0x1e42   :  { %v1093_v24 = vsel %vm1090_vm9, %v1092_v22, %v1088_v20 }
0x1e43   :  { %v1099_v29 = vmul.f32 %v1097_v26, %v1093_v24  ;;  %v3589_v17 = vand.u32 127, %v1274_v30  ;;  %v2999_v26 = vld [vmem:[#allocation4 + $0x88] ss:$0 sm:$0xff] }
0x1e9e   :  { %v1102_v23 = vpop.permute.xlu1 %1101 }
0x1e9f   :  { %v1104_v25 = vmul.f32 %v1102_v23, %v1093_v24 }
0x1ea1   :  { %1106 = vrot.lane.b32.xlu2 %v1104_v25, %s3284_s21 }
0x1efb   :  { %v1107_v31 = vpop.permute.xlu2 %1106 }
0x1efc   :  { %v3537_v32 = vadd.f32 %v1107_v31, %v1099_v29  ;;  %v1341_v31 = vpop.f32.mrf.mxu1 }
0x1efe   :  { %3111 = vtanh.f32 %v3537_v32  ;;  %v1172_v9 = vrot.slane %v3537_v32, 6 }
0x1f04   :  { %v3112_v33 = vpop.eup %3111 }
0x1f05   :  { %1112 = vrot.lane.b32.xlu0 %v3112_v33, %s3283_s20 }
0x1f77   :  { %v1113_v34 = vpop.permute.xlu0 %1112 }
0x1f78   :  { %v3541_v2 = vmul.f32 %v1113_v34, %v1093_v24 }
0x1f7a   :  { %v1122_v5 = vrot.slane %v3541_v2, 2 }
0x1f7c   :  { %1123 = vrot.lane.b32.xlu1 %v1122_v5, %s3284_s21 }
0x1fee   :  { %v1124_v35 = vpop.permute.xlu1 %1123 }
0x1fef   :  { %2918 = vmatmul.msk.f32.vlgmr.msra.gmra.mxu2 %vm92_vm6, %v1124_v35 }
0x2072   :  { %v1144_v6 = vpop.f32.mrf.mxu2 }
0x2073   :  { %v1148_v36 = vrot.slane %v1144_v6, 4 }
0x2075   :  { %v1150_v37 = vadd.f32 %v1148_v36, %v3524_v0 }
0x2077   :  { %3113 = vtanh.f32 %v1150_v37  ;;  %v1151_v13 = vsub.f32 0.0, %v1150_v37 }
0x2079   :  { %v1152_v38 = vmul.f32 1.442695, %v1151_v13 }
0x207b   :  { %3115 = vpow2.f32 %v1152_v38 }
0x207d   :  { %v3114_v8 = vpop.eup %3113 }
0x207e   :  { %1176 = vrot.lane.b32.xlu2 %v3114_v8, %s3283_s20 }
0x2081   :  { %v3116_v39 = vpop.eup %3115 }
0x2082   :  { %v1154_v40 = vadd.f32 1.0, %v3116_v39 }
0x2084   :  { %3117 = vrcp.f32 %v1154_v40  ;;  %v1166_v49 = vand.u32 2147483648, %v1154_v40  ;;  %vm1160_vm11 = vweird.f32 %v1154_v40  ;;  %v1164_v51 = vand.u32 2147483647, %v1154_v40 }
0x2086   :  { %v1167_v54 = vor.u32 1.1754944e-38, %v1166_v49  ;;  %vm1165_vm13 = vcmp.eq.f32.partialorder %v1164_v51, 8.507059e+37 }
0x208a   :  { %v3118_v14 = vpop.eup %3117 }
0x208b   :  { %v1156_v45 = vmul.f32 %v3118_v14, %v1154_v40  ;;  %vm1161_vm10 = vweird.f32 %v3118_v14 }
0x208c   :  { %vm1162_vm12 = vmor %vm1160_vm11, %vm1161_vm10  ;;  %vm386_vm11 = vcmask 260102  }
0x208d   :  { %v1157_v46 = vsub.f32 1.0, %v1156_v45 }
0x208f   :  { %v1158_v47 = vmul.f32 %v3118_v14, %v1157_v46 }
0x2091   :  { %v1159_v48 = vadd.f32 %v3118_v14, %v1158_v47 }
0x2093   :  { %v1163_v52 = vsel %vm1162_vm12, %v3118_v14, %v1159_v48  ;;  %vm388_vm12 = vcmask 261127  }
0x2094   :  { %v1168_v56 = vsel %vm1165_vm13, %v1167_v54, %v1163_v52  ;;  %vm309_vm13 = vcmask 258052  }
0x2095   :  { %v1174_v19 = vmul.f32 %v1172_v9, %v1168_v56 }
0x20d8   :  { %v1177_v55 = vpop.permute.xlu2 %1176 }
0x20d9   :  { %v1179_v57 = vmul.f32 %v1177_v55, %v1168_v56 }
0x20db   :  { %1181 = vrot.lane.b32.xlu0 %v1179_v57, %s3284_s21 }
0x20e3   :  { %1277 = vperm.xlu0 %2996, %v1272_v58  }
0x214d   :  { %v1182_v11 = vpop.permute.xlu0 %1181 }
0x214e   :  { %v3586_v15 = vadd.f32 %v1182_v11, %v1174_v19 }
0x2150   :  { %3119 = vtanh.f32 %v3586_v15 }
0x2155   :  { %v1278_v18 = vpop.permute.xlu0 %1277 }
0x2156   :  { %v3120_v20 = vpop.eup %3119  ;;  %vm1282_vm14 = vcmp.eq.s32.totalorder %v1278_v18, %v3589_v17 }
0x2157   :  { %v2920_v22 = vsel %vm1282_vm14, 1.0, %v3282_v7  ;;  %1187 = vrot.lane.b32.xlu1 %v3120_v20, %s3283_s20  ;;  %vm311_vm14 = vcmask 259077  }
0x2158   :  { %2922 = vmatmul.msk.f32.vlgmr.msrb.gmra.mxu0 %vm50_vm0, %v2920_v22 }
0x21c9   :  { %v1188_v23 = vpop.permute.xlu1 %1187 }
0x21ca   :  { %v3595_v24 = vmul.f32 %v1188_v23, %v1168_v56 }
0x21cc   :  { %v1197_v25 = vrot.slane %v3595_v24, 4 }
0x21ce   :  { %1198 = vrot.lane.b32.xlu2 %v1197_v25, %s3284_s21 }
0x21d5   :  { %v1315_v29 = vpop.f32.mrf.mxu0 }
0x21d6   :  { %v3599_v32 = vadd.f32 %v2999_v26, %v1315_v29 }
0x21d8   :  { %v1344_v33 = vadd.f32 %v1341_v31, %v3599_v32 }
0x21da   :  { %3121 = vtanh.f32 %v1344_v33  ;;  %v1345_v5 = vsub.f32 0.0, %v1344_v33 }
0x21dc   :  { %v1346_v35 = vmul.f32 1.442695, %v1345_v5  ;;  %v1247_v5 = vrot.slane %v3586_v15, 6 }
0x21de   :  { %3123 = vpow2.f32 %v1346_v35 }
0x21e0   :  { %v3122_v34 = vpop.eup %3121 }
0x21e1   :  { %1367 = vrot.lane.b32.xlu2 %v3122_v34, %s3283_s20 }
0x21e4   :  { %v3124_v6 = vpop.eup %3123 }
0x21e5   :  { %v1348_v36 = vadd.f32 1.0, %v3124_v6 }
0x21e7   :  { %3125 = vrcp.f32 %v1348_v36  ;;  %vm1354_vm15 = vweird.f32 %v1348_v36  ;;  %v1360_v40 = vand.u32 2147483648, %v1348_v36  ;;  %v1358_v14 = vand.u32 2147483647, %v1348_v36 }
0x21e9   :  { %v1361_v45 = vor.u32 1.1754944e-38, %v1360_v40  ;;  %vm1359_vm3 = vcmp.eq.f32.partialorder %v1358_v14, 8.507059e+37 }
0x21ed   :  { %v3126_v37 = vpop.eup %3125 }
0x21ee   :  { %v1350_v8 = vmul.f32 %v3126_v37, %v1348_v36  ;;  %vm1355_vm1 = vweird.f32 %v3126_v37 }
0x21ef   :  { %vm1356_vm2 = vmor %vm1354_vm15, %vm1355_vm1  ;;  %vm1415_vm15 = vcmask 122880  }
0x21f0   :  { %v1351_v38 = vsub.f32 1.0, %v1350_v8 }
0x21f2   :  { %v1352_v39 = vmul.f32 %v3126_v37, %v1351_v38 }
0x21f4   :  { %v1353_v42 = vadd.f32 %v3126_v37, %v1352_v39 }
0x21f6   :  { %v1357_v46 = vsel %vm1356_vm2, %v3126_v37, %v1353_v42  ;;  %vm1520_vm2 = vcmask 1040384  }
0x21f7   :  { %v3604_v47 = vsel %vm1359_vm3, %v1361_v45, %v1357_v46  ;;  %vm1321_vm3 = vcmask 523264  }
0x21f8   :  { %v1365_v22 = vmul.f32 0.0, %v3604_v47 }
0x2228   :  { %v1199_v13 = vpop.permute.xlu2 %1198 }
0x2229   :  { %2919 = vmatmul.msk.f32.vlgmr.msrb.gmra.mxu3 %vm92_vm6, %v1199_v13 }
0x223b   :  { %v1368_v48 = vpop.permute.xlu2 %1367 }
0x223c   :  { %v1370_v49 = vmul.f32 %v1368_v48, %v3604_v47 }
0x223e   :  { %1372 = vrot.lane.b32.xlu2 %v1370_v49, %s3284_s21 }
0x2246   :  { %823 = vrot.lane.b32.xlu2 %v3500_v28, %s3284_s21 }
0x224e   :  { %1117 = vrot.lane.b32.xlu2 %v3541_v2, %s3284_s21 }
0x2256   :  { %229 = vrot.lane.b32.xlu2 %v3392_v4, %s3284_s21 }
0x225e   :  { %529 = vrot.lane.b32.xlu2 %v3449_v21, %s3284_s21 }
0x2298   :  { %v1373_v51 = vpop.permute.xlu2 %1372 }
0x2299   :  { %v3627_v26 = vadd.f32 %v1373_v51, %v1365_v22 }
0x22a0   :  { %v824_v52 = vpop.permute.xlu2 %823 }
0x22a1   :  { %826 = vst.msk [vmem:[#allocation2 + $0x7] sm:$0x4] %vm232_vm4, %v824_v52 }
0x22a2   :  { %827 = vst.msk [vmem:[#allocation2 + $0x16] sm:$0x8] %vm234_vm5, %v824_v52 }
0x22a8   :  { %v1118_v54 = vpop.permute.xlu2 %1117 }
0x22a9   :  { %1120 = vst.msk [vmem:[#allocation2 + $0xb] sm:$0x4] %vm232_vm4, %v1118_v54 }
0x22aa   :  { %1121 = vst.msk [vmem:[#allocation2 + $0x1a] sm:$0x8] %vm234_vm5, %v1118_v54 }
0x22ac   :  { %v1219_v28 = vpop.f32.mrf.mxu3 }
0x22ad   :  { %v1223_v2 = vrot.slane %v1219_v28, 2 }
0x22af   :  { %v1225_v4 = vadd.f32 %v1223_v2, %v3524_v0 }
0x22b0   :  { %v230_v55 = vpop.permute.xlu2 %229 }
0x22b1   :  { %3127 = vtanh.f32 %v1225_v4  ;;  %233 = vst.msk [vmem:[#allocation2 - $0x1] sm:$0x4] %vm232_vm4, %v230_v55  ;;  %v1226_v57 = vsub.f32 0.0, %v1225_v4 }
0x22b2   :  { %235 = vst.msk [vmem:[#allocation2 + $0xe] sm:$0x8] %vm234_vm5, %v230_v55 }
0x22b3   :  { %v1227_v58 = vmul.f32 1.442695, %v1226_v57 }
0x22b5   :  { %3129 = vpow2.f32 %v1227_v58 }
0x22b7   :  { %v3128_v21 = vpop.eup %3127 }
0x22b8   :  { %1251 = vrot.lane.b32.xlu1 %v3128_v21, %s3283_s20  ;;  %v530_v56 = vpop.permute.xlu2 %529 }
0x22b9   :  { %532 = vst.msk [vmem:[#allocation2 + $0x3] sm:$0x4] %vm232_vm4, %v530_v56 }
0x22ba   :  { %533 = vst.msk [vmem:[#allocation2 + $0x12] sm:$0x8] %vm234_vm5, %v530_v56 }
0x22bb   :  { %v3130_v60 = vpop.eup %3129 }
0x22bc   :  { %v1229_v63 = vadd.f32 1.0, %v3130_v60 }
0x22be   :  { %3131 = vrcp.f32 %v1229_v63  ;;  %v1241_v18 = vand.u32 2147483648, %v1229_v63  ;;  %vm1235_vm8 = vweird.f32 %v1229_v63  ;;  %v1239_v20 = vand.u32 2147483647, %v1229_v63 }
0x22bf   :  { %3133 = vtanh.f32 %v3627_v26 }
0x22c0   :  { %v1242_v25 = vor.u32 1.1754944e-38, %v1241_v18  ;;  %vm1240_vm10 = vcmp.eq.f32.partialorder %v1239_v20, 8.507059e+37 }
0x22c4   :  { %v3132_v0 = vpop.eup %3131 }
0x22c5   :  { %v1231_v9 = vmul.f32 %v3132_v0, %v1229_v63  ;;  %vm1236_vm7 = vweird.f32 %v3132_v0  ;;  %v3134_v34 = vpop.eup %3133 }
0x22c6   :  { %vm1237_vm9 = vmor %vm1235_vm8, %vm1236_vm7 }
0x22c7   :  { %v1232_v19 = vsub.f32 1.0, %v1231_v9 }
0x22c9   :  { %v1233_v11 = vmul.f32 %v3132_v0, %v1232_v19 }
0x22cb   :  { %v1234_v30 = vadd.f32 %v3132_v0, %v1233_v11 }
0x22cd   :  { %v1238_v23 = vsel %vm1237_vm9, %v3132_v0, %v1234_v30  ;;  %v1273_v0 = vld [vmem:[%s4017_s1 + $0x8] sm:$0x3f]  ;;  %s3286_s1 = smov 96  }
0x22ce   :  { %v1243_v31 = vsel %vm1240_vm10, %v1242_v25, %v1238_v23 }
0x22cf   :  { %v1249_v35 = vmul.f32 %v1247_v5, %v1243_v31 }
0x232a   :  { %v1252_v29 = vpop.permute.xlu1 %1251 }
0x232b   :  { %v1254_v33 = vmul.f32 %v1252_v29, %v1243_v31 }
0x232d   :  { %1256 = vrot.lane.b32.xlu1 %v1254_v33, %s3284_s21 }
0x2335   :  { %1378 = vrot.lane.b32.xlu1 %v3134_v34, %s3283_s20 }
0x233d   :  { %973 = vrot.lane.b32.xlu1 %v3518_v12, %s3284_s21 }
0x2345   :  { %383 = vrot.lane.b32.xlu1 %v3420_v16, %s3284_s21 }
0x239f   :  { %v1257_v6 = vpop.permute.xlu1 %1256 }
0x23a0   :  { %v1259_v36 = vadd.f32 %v1257_v6, %v1249_v35 }
0x23a2   :  { %3135 = vtanh.f32 %v1259_v36 }
0x23a7   :  { %v1379_v37 = vpop.permute.xlu1 %1378 }
0x23a8   :  { %v3136_v8 = vpop.eup %3135  ;;  %v3638_v13 = vmul.f32 %v1379_v37, %v3604_v47 }
0x23a9   :  { %1262 = vrot.lane.b32.xlu0 %v3136_v8, %s3283_s20 }
0x23aa   :  { %1385 = vrot.lane.b32.xlu2 %v3638_v13, %s3284_s21  ;;  %v1452_v15 = vrot.slane %v3638_v13, 1 }
0x23af   :  { %v974_v12 = vpop.permute.xlu1 %973 }
0x23b0   :  { %976 = vst.msk [vmem:[#allocation2 + $0x5] sm:$0x40] %vm386_vm11, %v974_v12 }
0x23b1   :  { %977 = vst.msk [vmem:[#allocation2 + $0x14] sm:$0x80] %vm388_vm12, %v974_v12  ;;  %898 = vrot.lane.b32.xlu0 %v3509_v53, %s3284_s21 }
0x23b7   :  { %v384_v16 = vpop.permute.xlu1 %383 }
0x23b8   :  { %387 = vst.msk [vmem:[#allocation2 - $0x3] sm:$0x40] %vm386_vm11, %v384_v16 }
0x23b9   :  { %389 = vst.msk [vmem:[#allocation2 + $0xc] sm:$0x80] %vm388_vm12, %v384_v16  ;;  %1192 = vrot.lane.b32.xlu0 %v3595_v24, %s3284_s21 }
0x23c1   :  { %306 = vrot.lane.b32.xlu0 %v3407_v41, %s3284_s21 }
0x23c9   :  { %604 = vrot.lane.b32.xlu0 %v3462_v50, %s3284_s21 }
0x23d1   :  { %1453 = vrot.lane.b32.xlu0 %v1452_v15, %s3284_s21 }
0x2404   :  { %v1386_v47 = vpop.permute.xlu2 %1385 }
0x241b   :  { %v1263_v38 = vpop.permute.xlu0 %1262 }
0x241c   :  { %v1265_v53 = vmul.f32 %v1263_v38, %v1243_v31 }
0x241e   :  { %1267 = vrot.lane.b32.xlu1 %v1265_v53, %s3284_s21 }
0x2423   :  { %v899_v39 = vpop.permute.xlu0 %898 }
0x2424   :  { %901 = vst.msk [vmem:[#allocation2 + $0x6] sm:$0x10] %vm309_vm13, %v899_v39 }
0x2425   :  { %902 = vst.msk [vmem:[#allocation2 + $0x15] sm:$0x20] %vm311_vm14, %v899_v39 }
0x2426   :  { %679 = vrot.lane.b32.xlu1 %v3475_v27, %s3284_s21 }
0x242b   :  { %v1193_v41 = vpop.permute.xlu0 %1192 }
0x242c   :  { %1195 = vst.msk [vmem:[#allocation2 + $0xa] sm:$0x10] %vm309_vm13, %v1193_v41 }
0x242d   :  { %1196 = vst.msk [vmem:[#allocation2 + $0x19] sm:$0x20] %vm311_vm14, %v1193_v41 }
0x2433   :  { %v307_v50 = vpop.permute.xlu0 %306 }
0x2434   :  { %310 = vst.msk [vmem:[#allocation2 - $0x2] sm:$0x10] %vm309_vm13, %v307_v50 }
0x2435   :  { %312 = vst.msk [vmem:[#allocation2 + $0xd] sm:$0x20] %vm311_vm14, %v307_v50 }
0x243b   :  { %v605_v24 = vpop.permute.xlu0 %604 }
0x243c   :  { %607 = vst.msk [vmem:[#allocation2 + $0x2] sm:$0x10] %vm309_vm13, %v605_v24 }
0x243d   :  { %608 = vst.msk [vmem:[#allocation2 + $0x11] sm:$0x20] %vm311_vm14, %v605_v24 }
0x2443   :  { %v1454_v48 = vpop.permute.xlu0 %1453 }
0x2490   :  { %v1268_v40 = vpop.permute.xlu1 %1267 }
0x2491   :  { %1270 = vst.msk [vmem:[#allocation2 + $0x9] sm:$0x40] %vm386_vm11, %v1268_v40 }
0x2492   :  { %1271 = vst.msk [vmem:[#allocation2 + $0x18] sm:$0x80] %vm388_vm12, %v1268_v40 }
0x2498   :  { %v680_v42 = vpop.permute.xlu1 %679  ;;  %v3662_v14 = vld [vmem:[#allocation2 + $0x8] sm:$0xff] }
0x2499   :  { %682 = vst.msk [vmem:[#allocation2 + $0x1] sm:$0x40] %vm386_vm11, %v680_v42  ;;  %2924 = vmatpush.xpose.msk.msrb.mxu2 %vm92_vm6, %v3662_v14  ;;  %1444 = vmatpush.msra.mxu3 %v3662_v14  ;;  %v3668_v27 = vld [vmem:[#allocation2 + $0x18] sm:$0xff] }
0x249a   :  { %683 = vst.msk [vmem:[#allocation2 + $0x10] sm:$0x80] %vm388_vm12, %v680_v42  ;;  %2933 = vmatpush.xpose.msk.msra.mxu1 %vm92_vm6, %v3662_v14  ;;  %1733 = vmatpush.msrb.mxu0 %v3668_v27 }
0x24a0   :  { %v3674_v45 = vld [vmem:[#allocation2] sm:$0xff] }
0x24a1   :  { %2925 = vmatpush.xpose.msk.msrb.mxu2 %vm92_vm6, %v3674_v45  ;;  %1445 = vmatpush.msra.mxu3 %v3674_v45  ;;  %v3679_v46 = vld [vmem:[#allocation2 + $0x10] sm:$0xff] }
0x24a2   :  { %2934 = vmatpush.xpose.msk.msra.mxu1 %vm92_vm6, %v3674_v45  ;;  %1734 = vmatpush.msrb.mxu0 %v3679_v46 }
0x24a3   :  { %1511 = vmatpush.msrb.mxu3 %v3668_v27 }
0x24a4   :  { %2926 = vmatmul.msk.f32.vlgmr.msrb.gmra.mxu2 %vm92_vm6, %v1386_v47 }
0x24a5   :  { %2928 = vmatpush.xpose.msk.msra.mxu2 %vm92_vm6, %v3668_v27  ;;  %1512 = vmatpush.msrb.mxu3 %v3679_v46 }
0x24a6   :  { %1770 = vmatpush.msrb.mxu1 %v3548_v43 }
0x24a8   :  { %1771 = vmatpush.msrb.mxu1 %v3550_v44 }
0x24a9   :  { %2929 = vmatpush.xpose.msk.msra.mxu2 %vm92_vm6, %v3679_v46 }
0x24aa   :  { %1772 = vmatpush.msrb.mxu1 %v3558_v10 }
0x24ac   :  { %1773 = vmatpush.msrb.mxu1 %v3561_v59  ;;  %2930 = vmatmul.msk.f32.vlgmr.msra.gmra.mxu2 %vm92_vm6, %v1454_v48 }
0x24ad   :  { %1666 = vmatpush.msrb.mxu2 %v3662_v14 }
0x24ae   :  { %1774 = vmatpush.msrb.mxu1 %v3563_v61 }
0x24af   :  { %1667 = vmatpush.msrb.mxu2 %v3674_v45 }
0x24b0   :  { %1775 = vmatpush.msrb.mxu1 %v3566_v62 }
0x24b1   :  { %2942 = vmatpush.xpose.msk.msra.mxu2 %vm92_vm6, %v3662_v14 }
0x24b2   :  { %1776 = vmatpush.msrb.mxu1 %v3570_v1 }
0x24b4   :  { %1777 = vmatpush.msrb.mxu1 %v3573_v3 }
0x24b5   :  { %2943 = vmatpush.xpose.msk.msra.mxu2 %vm92_vm6, %v3674_v45 }
0x2527   :  { %v1412_v49 = vpop.f32.mrf.mxu2 }
0x2528   :  { %v1416_v51 = vsel %vm1415_vm15, %v1412_v49, -inf }
0x2529   :  { %1417 = vmax.xlane.f32.xlu1 %v1416_v51  ;;  %v1585_v51 = vrot.slane %v3627_v26, 6 }
0x252f   :  { %v1480_v52 = vpop.f32.mrf.mxu2 }
0x2530   :  { %v1483_v54 = vsel %vm1415_vm15, %v1480_v52, -inf }
0x2531   :  { %1484 = vmax.xlane.f32.xlu2 %v1483_v54 }
0x2542   :  { %1280 = vperm.xlu1 %2997, %v1273_v0  }
0x259c   :  { %v1418_v28 = vpop.xlane.xlu1 %1417 }
0x259d   :  { %v1419_v2 = vsub.f32 %v1412_v49, %v1418_v28 }
0x259f   :  { %v1420_v4 = vmul.f32 1.442695, %v1419_v2 }
0x25a1   :  { %3137 = vpow2.f32 %v1420_v4 }
0x25a4   :  { %v1485_v55 = vpop.xlane.xlu2 %1484 }
0x25a5   :  { %v1486_v21 = vsub.f32 %v1480_v52, %v1485_v55 }
0x25a7   :  { %v3138_v56 = vpop.eup %3137  ;;  %v1487_v57 = vmul.f32 1.442695, %v1486_v21 }
0x25a8   :  { %v1422_v58 = vsel %vm1415_vm15, %v3138_v56, 0.0 }
0x25a9   :  { %3139 = vpow2.f32 %v1487_v57  ;;  %1423 = vadd.xlane.f32.xlu0 %v1422_v58 }
0x25af   :  { %v3140_v60 = vpop.eup %3139 }
0x25b0   :  { %v1489_v63 = vsel %vm1415_vm15, %v3140_v60, 0.0 }
0x25b1   :  { %1490 = vadd.xlane.f32.xlu2 %v1489_v63 }
0x25b4   :  { %v1281_v22 = vpop.permute.xlu1 %1280 }
0x25b5   :  { %vm1283_vm1 = vcmp.eq.s32.totalorder %v1281_v22, %v3589_v17 }
0x25b6   :  { %v2921_v23 = vsel %vm1283_vm1, 1.0, %v3282_v7 }
0x25b7   :  { %2923 = vmatmul.msk.f32.gmra.mxu0 %vm50_vm0, %v2921_v23 }
0x25c9   :  { %1533 = vrot.lane.b32.xlu2 %v3638_v13, %s3283_s20 }
0x261c   :  { %v1424_v9 = vpop.xlane.xlu0 %1423 }
0x261d   :  { %3141 = vrcp.f32 %v1424_v9 }
0x2623   :  { %v3142_v19 = vpop.eup %3141 }
0x2624   :  { %v1426_v11 = vmul.f32 %v3142_v19, %v3138_v56  ;;  %v1491_v30 = vpop.xlane.xlu2 %1490 }
0x2625   :  { %3143 = vrcp.f32 %v1491_v30 }
0x2626   :  { %2927 = vmatmul.msk.f32.vlgmr.msra.gmra.mxu3 %vm50_vm0, %v1426_v11 }
0x2627   :  { %2937 = vmatpush.xpose.msk.msra.mxu3 %vm92_vm6, %v3668_v27 }
0x262b   :  { %v3144_v18 = vpop.eup %3143  ;;  %2938 = vmatpush.xpose.msk.msra.mxu3 %vm92_vm6, %v3679_v46 }
0x262c   :  { %v1493_v20 = vmul.f32 %v3144_v18, %v3140_v60  ;;  %v1534_v33 = vpop.permute.xlu2 %1533 }
0x262e   :  { %2931 = vmatmul.msk.f32.vlgmr.msrb.gmra.mxu3 %vm50_vm0, %v1493_v20 }
0x262f   :  { %1888 = vmatpush.msrb.mxu3 %v3662_v14 }
0x2631   :  { %1889 = vmatpush.msrb.mxu3 %v3674_v45 }
0x2634   :  { %v3736_v7 = vpop.f32.mrf.mxu0 }
0x26a9   :  { %v1447_v25 = vpop.f32.mrf.mxu3 }
0x26b1   :  { %v1514_v29 = vpop.f32.mrf.mxu3 }
0x26b2   :  { %v1518_v31 = vrot.slane %v1514_v29, 7 }
0x26b4   :  { %v3727_v34 = vsel %vm1520_vm2, %v1447_v25, %v1518_v31 }
0x26b5   :  { %v1536_v5 = vsel %vm92_vm6, %v3727_v34, %v1534_v33 }
0x26b6   :  { %2932 = vmatmul.msk.f32.vlgmr.msra.gmra.mxu0 %vm1321_vm3, %v1536_v5 }
0x26b7   :  { %2946 = vmatpush.xpose.msk.msra.mxu0 %vm92_vm6, %v3668_v27 }
0x26bb   :  { %2947 = vmatpush.xpose.msk.msra.mxu0 %vm92_vm6, %v3679_v46 }
0x2733   :  { %v1557_v17 = vpop.f32.mrf.mxu0 }
0x2734   :  { %v1561_v35 = vrot.slane %v1557_v17, 6 }
0x2736   :  { %v1563_v6 = vadd.f32 %v1561_v35, %v3599_v32 }
0x2738   :  { %3145 = vtanh.f32 %v1563_v6  ;;  %v1564_v37 = vsub.f32 0.0, %v1563_v6 }
0x273a   :  { %v1565_v8 = vmul.f32 1.442695, %v1564_v37 }
0x273c   :  { %3147 = vpow2.f32 %v1565_v8 }
0x273e   :  { %v3146_v36 = vpop.eup %3145 }
0x273f   :  { %1589 = vrot.lane.b32.xlu0 %v3146_v36, %s3283_s20 }
0x2742   :  { %v3148_v12 = vpop.eup %3147 }
0x2743   :  { %v1567_v16 = vadd.f32 1.0, %v3148_v12 }
0x2745   :  { %3149 = vrcp.f32 %v1567_v16  ;;  %v1579_v50 = vand.u32 2147483648, %v1567_v16  ;;  %vm1573_vm5 = vweird.f32 %v1567_v16  ;;  %v1577_v24 = vand.u32 2147483647, %v1567_v16 }
0x2747   :  { %v1580_v42 = vor.u32 1.1754944e-38, %v1579_v50  ;;  %vm1578_vm8 = vcmp.eq.f32.partialorder %v1577_v24, 8.507059e+37 }
0x274b   :  { %v3150_v15 = vpop.eup %3149 }
0x274c   :  { %v1569_v38 = vmul.f32 %v3150_v15, %v1567_v16  ;;  %vm1574_vm4 = vweird.f32 %v3150_v15 }
0x274d   :  { %vm1575_vm7 = vmor %vm1573_vm5, %vm1574_vm4 }
0x274e   :  { %v1570_v53 = vsub.f32 1.0, %v1569_v38 }
0x2750   :  { %v1571_v39 = vmul.f32 %v3150_v15, %v1570_v53 }
0x2752   :  { %v1572_v41 = vadd.f32 %v3150_v15, %v1571_v39 }
0x2754   :  { %v1576_v40 = vsel %vm1575_vm7, %v3150_v15, %v1572_v41 }
0x2755   :  { %v1581_v48 = vsel %vm1578_vm8, %v1580_v42, %v1576_v40 }
0x2756   :  { %v1587_v52 = vmul.f32 %v1585_v51, %v1581_v48 }
0x27b1   :  { %v1590_v47 = vpop.permute.xlu0 %1589 }
0x27b2   :  { %v1592_v49 = vmul.f32 %v1590_v47, %v1581_v48 }
0x27b4   :  { %1594 = vrot.lane.b32.xlu1 %v1592_v49, %s3284_s21 }
0x2826   :  { %v1595_v54 = vpop.permute.xlu1 %1594 }
0x2827   :  { %v3742_v28 = vadd.f32 %v1595_v54, %v1587_v52 }
0x2829   :  { %3151 = vtanh.f32 %v3742_v28 }
0x282f   :  { %v3152_v2 = vpop.eup %3151 }
0x2830   :  { %1600 = vrot.lane.b32.xlu0 %v3152_v2, %s3283_s20 }
0x28a2   :  { %v1601_v4 = vpop.permute.xlu0 %1600 }
0x28a3   :  { %v3746_v55 = vmul.f32 %v1601_v4, %v1581_v48 }
0x28a5   :  { %v1674_v21 = vrot.slane %v3746_v55, 3  ;;  %v1607_v56 = vrot.slane %v3746_v55, 2 }
0x28a7   :  { %1675 = vrot.lane.b32.xlu2 %v1674_v21, %s3284_s21  ;;  %1608 = vrot.lane.b32.xlu1 %v1607_v56, %s3284_s21 }
0x2901   :  { %v1676_v26 = vpop.permute.xlu2 %1675 }
0x2902   :  { %2939 = vmatmul.msk.f32.vlgmr.msra.gmra.mxu3 %vm92_vm6, %v1676_v26 }
0x2903   :  { %1992 = vmatpush.msra.mxu3 %v3548_v43 }
0x2905   :  { %1993 = vmatpush.msra.mxu3 %v3550_v44 }
0x2907   :  { %1994 = vmatpush.msra.mxu3 %v3558_v10 }
0x2909   :  { %1995 = vmatpush.msra.mxu3 %v3561_v59 }
0x290b   :  { %1996 = vmatpush.msra.mxu3 %v3563_v61 }
0x290d   :  { %1997 = vmatpush.msra.mxu3 %v3566_v62 }
0x290f   :  { %1998 = vmatpush.msra.mxu3 %v3570_v1 }
0x2911   :  { %1999 = vmatpush.msra.mxu3 %v3573_v3 }
0x2919   :  { %v1609_v57 = vpop.permute.xlu1 %1608 }
0x291a   :  { %2935 = vmatmul.msk.f32.vlgmr.msra.gmra.mxu1 %vm92_vm6, %v1609_v57 }
0x291b   :  { %2110 = vmatpush.msra.mxu1 %v3662_v14 }
0x291d   :  { %2111 = vmatpush.msra.mxu1 %v3674_v45 }
0x2985   :  { %v1702_v58 = vpop.f32.mrf.mxu3 }
0x2986   :  { %v1705_v60 = vsel %vm1415_vm15, %v1702_v58, -inf }
0x2987   :  { %1706 = vmax.xlane.f32.xlu2 %v1705_v60 }
0x2997   :  { %v1635_v63 = vpop.f32.mrf.mxu1 }
0x2998   :  { %v1638_v0 = vsel %vm1415_vm15, %v1635_v63, -inf }
0x2999   :  { %1639 = vmax.xlane.f32.xlu0 %v1638_v0 }
0x299f   :  { %1755 = vrot.lane.b32.xlu2 %v1607_v56, %s3283_s20 }
0x29fa   :  { %v1707_v9 = vpop.xlane.xlu2 %1706 }
0x29fb   :  { %v1708_v19 = vsub.f32 %v1702_v58, %v1707_v9  ;;  %v1807_v58 = vrot.slane %v3742_v28, 6 }
0x29fd   :  { %v1709_v11 = vmul.f32 1.442695, %v1708_v19 }
0x29ff   :  { %3153 = vpow2.f32 %v1709_v11 }
0x2a02   :  { %v1756_v12 = vpop.permute.xlu2 %1755 }
0x2a05   :  { %v3154_v30 = vpop.eup %3153 }
0x2a06   :  { %v1711_v18 = vsel %vm1415_vm15, %v3154_v30, 0.0 }
0x2a07   :  { %1712 = vadd.xlane.f32.xlu0 %v1711_v18 }
0x2a0c   :  { %v1640_v20 = vpop.xlane.xlu0 %1639 }
0x2a0d   :  { %v1641_v22 = vsub.f32 %v1635_v63, %v1640_v20 }
0x2a0f   :  { %v1642_v23 = vmul.f32 1.442695, %v1641_v22 }
0x2a11   :  { %3155 = vpow2.f32 %v1642_v23 }
0x2a17   :  { %v3156_v25 = vpop.eup %3155 }
0x2a18   :  { %v1644_v29 = vsel %vm1415_vm15, %v3156_v25, 0.0 }
0x2a19   :  { %1645 = vadd.xlane.f32.xlu1 %v1644_v29 }
0x2a7a   :  { %v1713_v31 = vpop.xlane.xlu0 %1712 }
0x2a7b   :  { %3157 = vrcp.f32 %v1713_v31 }
0x2a81   :  { %v3158_v33 = vpop.eup %3157 }
0x2a82   :  { %v1715_v5 = vmul.f32 %v3158_v33, %v3154_v30 }
0x2a84   :  { %2940 = vmatmul.msk.f32.vlgmr.msrb.gmra.mxu0 %vm50_vm0, %v1715_v5 }
0x2a85   :  { %2951 = vmatpush.xpose.msk.msrb.mxu0 %vm92_vm6, %v3662_v14 }
0x2a89   :  { %2952 = vmatpush.xpose.msk.msrb.mxu0 %vm92_vm6, %v3674_v45 }
0x2a8c   :  { %v1646_v17 = vpop.xlane.xlu1 %1645 }
0x2a8d   :  { %3159 = vrcp.f32 %v1646_v17 }
0x2a93   :  { %v3160_v35 = vpop.eup %3159 }
0x2a94   :  { %v1648_v6 = vmul.f32 %v3160_v35, %v3156_v25 }
0x2a96   :  { %2936 = vmatmul.msk.f32.vlgmr.msrb.gmra.mxu2 %vm50_vm0, %v1648_v6 }
0x2a97   :  { %1955 = vmatpush.msrb.mxu2 %v3668_v27 }
0x2a99   :  { %1956 = vmatpush.msrb.mxu2 %v3679_v46 }
0x2b01   :  { %v1736_v36 = vpop.f32.mrf.mxu0 }
0x2b02   :  { %v1740_v37 = vrot.slane %v1736_v36, 7 }
0x2b19   :  { %v1669_v8 = vpop.f32.mrf.mxu2 }
0x2b1a   :  { %v3778_v16 = vsel %vm1520_vm2, %v1669_v8, %v1740_v37 }
0x2b1b   :  { %v1758_v15 = vsel %vm92_vm6, %v3778_v16, %v1756_v12 }
0x2b1c   :  { %2941 = vmatmul.msk.f32.vlgmr.msrb.gmra.mxu1 %vm1321_vm3, %v1758_v15 }
0x2b1d   :  { %2214 = vmatpush.msrb.mxu1 %v3548_v43 }
0x2b1f   :  { %2215 = vmatpush.msrb.mxu1 %v3550_v44 }
0x2b21   :  { %2216 = vmatpush.msrb.mxu1 %v3558_v10 }
0x2b23   :  { %2217 = vmatpush.msrb.mxu1 %v3561_v59 }
0x2b25   :  { %2218 = vmatpush.msrb.mxu1 %v3563_v61 }
0x2b27   :  { %2219 = vmatpush.msrb.mxu1 %v3566_v62 }
0x2b29   :  { %2220 = vmatpush.msrb.mxu1 %v3570_v1 }
0x2b2b   :  { %2221 = vmatpush.msrb.mxu1 %v3573_v3 }
0x2b99   :  { %v1779_v38 = vpop.f32.mrf.mxu1 }
0x2b9a   :  { %v1783_v53 = vrot.slane %v1779_v38, 4 }
0x2b9c   :  { %v1785_v39 = vadd.f32 %v1783_v53, %v3599_v32 }
0x2b9e   :  { %3161 = vtanh.f32 %v1785_v39  ;;  %v1786_v50 = vsub.f32 0.0, %v1785_v39 }
0x2ba0   :  { %v1787_v24 = vmul.f32 1.442695, %v1786_v50 }
0x2ba2   :  { %3163 = vpow2.f32 %v1787_v24 }
0x2ba4   :  { %v3162_v41 = vpop.eup %3161 }
0x2ba5   :  { %1811 = vrot.lane.b32.xlu1 %v3162_v41, %s3283_s20 }
0x2ba8   :  { %v3164_v40 = vpop.eup %3163 }
0x2ba9   :  { %v1789_v42 = vadd.f32 1.0, %v3164_v40 }
0x2bab   :  { %3165 = vrcp.f32 %v1789_v42  ;;  %v1801_v54 = vand.u32 2147483648, %v1789_v42  ;;  %vm1795_vm10 = vweird.f32 %v1789_v42  ;;  %v1799_v2 = vand.u32 2147483647, %v1789_v42 }
0x2bad   :  { %v1802_v21 = vor.u32 1.1754944e-38, %v1801_v54  ;;  %vm1800_vm12 = vcmp.eq.f32.partialorder %v1799_v2, 8.507059e+37 }
0x2bb1   :  { %v3166_v47 = vpop.eup %3165 }
0x2bb2   :  { %v1791_v48 = vmul.f32 %v3166_v47, %v1789_v42  ;;  %vm1796_vm9 = vweird.f32 %v3166_v47 }
0x2bb3   :  { %vm1797_vm11 = vmor %vm1795_vm10, %vm1796_vm9 }
0x2bb4   :  { %v1792_v49 = vsub.f32 1.0, %v1791_v48 }
0x2bb6   :  { %v1793_v51 = vmul.f32 %v3166_v47, %v1792_v49 }
0x2bb8   :  { %v1794_v52 = vadd.f32 %v3166_v47, %v1793_v51 }
0x2bba   :  { %v1798_v4 = vsel %vm1797_vm11, %v3166_v47, %v1794_v52 }
0x2bbb   :  { %v1803_v26 = vsel %vm1800_vm12, %v1802_v21, %v1798_v4 }
0x2bbc   :  { %v1809_v60 = vmul.f32 %v1807_v58, %v1803_v26 }
0x2c17   :  { %v1812_v56 = vpop.permute.xlu1 %1811 }
0x2c18   :  { %v1814_v57 = vmul.f32 %v1812_v56, %v1803_v26 }
0x2c1a   :  { %1816 = vrot.lane.b32.xlu0 %v1814_v57, %s3284_s21 }
0x2c8c   :  { %v1817_v63 = vpop.permute.xlu0 %1816 }
0x2c8d   :  { %v3795_v0 = vadd.f32 %v1817_v63, %v1809_v60 }
0x2c8f   :  { %3167 = vtanh.f32 %v3795_v0  ;;  %v2029_v63 = vrot.slane %v3795_v0, 6 }
0x2c95   :  { %v3168_v9 = vpop.eup %3167 }
0x2c96   :  { %1822 = vrot.lane.b32.xlu2 %v3168_v9, %s3283_s20 }
0x2cf0   :  { %v1823_v19 = vpop.permute.xlu2 %1822 }
0x2cf1   :  { %v3799_v11 = vmul.f32 %v1823_v19, %v1803_v26 }
0x2cf3   :  { %v1896_v30 = vrot.slane %v3799_v11, 5  ;;  %v1829_v18 = vrot.slane %v3799_v11, 4 }
0x2cf5   :  { %1897 = vrot.lane.b32.xlu1 %v1896_v30, %s3284_s21  ;;  %1830 = vrot.lane.b32.xlu0 %v1829_v18, %s3284_s21 }
0x2d67   :  { %v1898_v28 = vpop.permute.xlu1 %1897  ;;  %v1831_v20 = vpop.permute.xlu0 %1830 }
0x2d68   :  { %2944 = vmatmul.msk.f32.vlgmr.msra.gmra.mxu2 %vm92_vm6, %v1831_v20  ;;  %2948 = vmatmul.msk.f32.vlgmr.msra.gmra.mxu0 %vm92_vm6, %v1898_v28 }
0x2d69   :  { %2955 = vmatpush.xpose.msk.msra.mxu2 %vm92_vm6, %v3668_v27  ;;  %2177 = vmatpush.msra.mxu0 %v3668_v27 }
0x2d6b   :  { %2178 = vmatpush.msra.mxu0 %v3679_v46 }
0x2d6d   :  { %2956 = vmatpush.xpose.msk.msra.mxu2 %vm92_vm6, %v3679_v46 }
0x2de5   :  { %v1924_v22 = vpop.f32.mrf.mxu0 }
0x2de6   :  { %v1927_v23 = vsel %vm1415_vm15, %v1924_v22, -inf }
0x2de7   :  { %1928 = vmax.xlane.f32.xlu2 %v1927_v23 }
0x2deb   :  { %v1857_v25 = vpop.f32.mrf.mxu2 }
0x2dec   :  { %v1860_v29 = vsel %vm1415_vm15, %v1857_v25, -inf }
0x2ded   :  { %1861 = vmax.xlane.f32.xlu0 %v1860_v29 }
0x2e01   :  { %1977 = vrot.lane.b32.xlu0 %v1829_v18, %s3283_s20 }
0x2e5a   :  { %v1929_v31 = vpop.xlane.xlu2 %1928 }
0x2e5b   :  { %v1930_v33 = vsub.f32 %v1924_v22, %v1929_v31 }
0x2e5d   :  { %v1931_v5 = vmul.f32 1.442695, %v1930_v33 }
0x2e5f   :  { %3169 = vpow2.f32 %v1931_v5 }
0x2e60   :  { %v1862_v17 = vpop.xlane.xlu0 %1861 }
0x2e61   :  { %v1863_v35 = vsub.f32 %v1857_v25, %v1862_v17 }
0x2e63   :  { %v1864_v6 = vmul.f32 1.442695, %v1863_v35 }
0x2e65   :  { %v3170_v36 = vpop.eup %3169  ;;  %3171 = vpow2.f32 %v1864_v6 }
0x2e66   :  { %v1933_v37 = vsel %vm1415_vm15, %v3170_v36, 0.0 }
0x2e67   :  { %1934 = vadd.xlane.f32.xlu1 %v1933_v37 }
0x2e6b   :  { %v3172_v8 = vpop.eup %3171 }
0x2e6c   :  { %v1866_v12 = vsel %vm1415_vm15, %v3172_v8, 0.0 }
0x2e6d   :  { %1867 = vadd.xlane.f32.xlu2 %v1866_v12 }
0x2e73   :  { %v1978_v47 = vpop.permute.xlu0 %1977 }
0x2eda   :  { %v1935_v15 = vpop.xlane.xlu1 %1934 }
0x2edb   :  { %3173 = vrcp.f32 %v1935_v15 }
0x2ee0   :  { %v1868_v38 = vpop.xlane.xlu2 %1867 }
0x2ee1   :  { %v3174_v53 = vpop.eup %3173  ;;  %3175 = vrcp.f32 %v1868_v38 }
0x2ee2   :  { %v1937_v39 = vmul.f32 %v3174_v53, %v3170_v36 }
0x2ee4   :  { %2949 = vmatmul.msk.f32.vlgmr.msrb.gmra.mxu2 %vm50_vm0, %v1937_v39 }
0x2ee5   :  { %2960 = vmatpush.xpose.msk.msrb.mxu2 %vm92_vm6, %v3662_v14 }
0x2ee7   :  { %v3176_v41 = vpop.eup %3175 }
0x2ee8   :  { %v1870_v50 = vmul.f32 %v3176_v41, %v3172_v8 }
0x2ee9   :  { %2961 = vmatpush.xpose.msk.msrb.mxu2 %vm92_vm6, %v3674_v45 }
0x2eea   :  { %2945 = vmatmul.msk.f32.vlgmr.msrb.gmra.mxu3 %vm50_vm0, %v1870_v50 }
0x2eeb   :  { %2328 = vmatpush.msrb.mxu3 %v3662_v14 }
0x2eed   :  { %2329 = vmatpush.msrb.mxu3 %v3674_v45 }
0x2f67   :  { %v1958_v24 = vpop.f32.mrf.mxu2 }
0x2f68   :  { %v1962_v40 = vrot.slane %v1958_v24, 7 }
0x2f6d   :  { %v1891_v42 = vpop.f32.mrf.mxu3 }
0x2f6e   :  { %v3827_v48 = vsel %vm1520_vm2, %v1891_v42, %v1962_v40 }
0x2f6f   :  { %v1980_v49 = vsel %vm92_vm6, %v3827_v48, %v1978_v47 }
0x2f70   :  { %2950 = vmatmul.msk.f32.vlgmr.msra.gmra.mxu3 %vm1321_vm3, %v1980_v49 }
0x2f71   :  { %2430 = vmatpush.msra.mxu3 %v3548_v43 }
0x2f73   :  { %2431 = vmatpush.msra.mxu3 %v3550_v44 }
0x2f75   :  { %2432 = vmatpush.msra.mxu3 %v3558_v10 }
0x2f77   :  { %2433 = vmatpush.msra.mxu3 %v3561_v59 }
0x2f79   :  { %2434 = vmatpush.msra.mxu3 %v3563_v61 }
0x2f7b   :  { %2435 = vmatpush.msra.mxu3 %v3566_v62 }
0x2f7d   :  { %2436 = vmatpush.msra.mxu3 %v3570_v1 }
0x2f7f   :  { %2437 = vmatpush.msra.mxu3 %v3573_v3 }
0x2ff3   :  { %v2001_v51 = vpop.f32.mrf.mxu3 }
0x2ff4   :  { %v2005_v52 = vrot.slane %v2001_v51, 2 }
0x2ff6   :  { %v2007_v54 = vadd.f32 %v2005_v52, %v3599_v32 }
0x2ff8   :  { %3177 = vtanh.f32 %v2007_v54  ;;  %v2008_v44 = vsub.f32 0.0, %v2007_v54 }
0x2ffa   :  { %v2009_v10 = vmul.f32 1.442695, %v2008_v44  ;;  %v3242_v44 = vld [vmem:[#allocation4 + $0x80] sm:$0xff] }
0x2ffc   :  { %3179 = vpow2.f32 %v2009_v10  ;;  %v3243_v10 = vld [vmem:[#allocation4 + $0x78] sm:$0xff] }
0x2ffe   :  { %v3178_v43 = vpop.eup %3177 }
0x2fff   :  { %2033 = vrot.lane.b32.xlu1 %v3178_v43, %s3283_s20 }
0x3002   :  { %v3180_v59 = vpop.eup %3179 }
0x3003   :  { %v2011_v2 = vadd.f32 1.0, %v3180_v59  ;;  %v3244_v59 = vld [vmem:[#allocation4 + $0x70] sm:$0xff] }
0x3005   :  { %3181 = vrcp.f32 %v2011_v2  ;;  %v2023_v3 = vand.u32 2147483648, %v2011_v2  ;;  %vm2017_vm14 = vweird.f32 %v2011_v2  ;;  %v2021_v56 = vand.u32 2147483647, %v2011_v2 }
0x3007   :  { %v2024_v26 = vor.u32 1.1754944e-38, %v2023_v3  ;;  %vm2022_vm4 = vcmp.eq.f32.partialorder %v2021_v56, 8.507059e+37 }
0x300b   :  { %v3182_v61 = vpop.eup %3181 }
0x300c   :  { %v2013_v62 = vmul.f32 %v3182_v61, %v2011_v2  ;;  %vm2018_vm13 = vweird.f32 %v3182_v61  ;;  %v3245_v2 = vld [vmem:[#allocation4 + $0x68] sm:$0xff] }
0x300d   :  { %vm2019_vm1 = vmor %vm2017_vm14, %vm2018_vm13 }
0x300e   :  { %v2014_v4 = vsub.f32 1.0, %v2013_v62  ;;  %v3247_v62 = vld [vmem:[#allocation4 + $0x58] sm:$0xff] }
0x3010   :  { %v2015_v1 = vmul.f32 %v3182_v61, %v2014_v4  ;;  %v3248_v4 = vld [vmem:[#allocation4 + $0x50] sm:$0xff] }
0x3012   :  { %v2016_v21 = vadd.f32 %v3182_v61, %v2015_v1  ;;  %v3249_v1 = vld [vmem:[#allocation4 + $0x48] sm:$0xff] }
0x3014   :  { %v2020_v32 = vsel %vm2019_vm1, %v3182_v61, %v2016_v21  ;;  %v3246_v61 = vld [vmem:[#allocation4 + $0x60] sm:$0xff]  ;;  %v3250_v21 = vld [vmem:[#allocation4 + $0x88] ss:$0 sm:$0xff] }
0x3015   :  { %v2025_v58 = vsel %vm2022_vm4, %v2024_v26, %v2020_v32  ;;  %v3882_v3 = vadd.f32 %v3250_v21, %v3736_v7 }
0x3016   :  { %v2031_v9 = vmul.f32 %v2029_v63, %v2025_v58 }
0x3071   :  { %v2034_v57 = vpop.permute.xlu1 %2033 }
0x3072   :  { %v2036_v60 = vmul.f32 %v2034_v57, %v2025_v58 }
0x3074   :  { %2038 = vrot.lane.b32.xlu2 %v2036_v60, %s3284_s21 }
0x30ce   :  { %v2039_v19 = vpop.permute.xlu2 %2038 }
0x30cf   :  { %v3844_v30 = vadd.f32 %v2039_v19, %v2031_v9 }
0x30d1   :  { %3183 = vtanh.f32 %v3844_v30 }
0x30d7   :  { %v3184_v18 = vpop.eup %3183 }
0x30d8   :  { %2044 = vrot.lane.b32.xlu0 %v3184_v18, %s3283_s20 }
0x314a   :  { %v2045_v28 = vpop.permute.xlu0 %2044 }
0x314b   :  { %v3848_v20 = vmul.f32 %v2045_v28, %v2025_v58 }
0x314d   :  { %v2118_v22 = vrot.slane %v3848_v20, 7  ;;  %v2051_v23 = vrot.slane %v3848_v20, 6 }
0x314f   :  { %2119 = vrot.lane.b32.xlu1 %v2118_v22, %s3284_s21  ;;  %2052 = vrot.lane.b32.xlu0 %v2051_v23, %s3284_s21 }
0x31c1   :  { %v2120_v0 = vpop.permute.xlu1 %2119  ;;  %v2053_v25 = vpop.permute.xlu0 %2052 }
0x31c2   :  { %2953 = vmatmul.msk.f32.vlgmr.msrb.gmra.mxu0 %vm92_vm6, %v2053_v25  ;;  %2957 = vmatmul.msk.f32.vlgmr.msra.gmra.mxu2 %vm92_vm6, %v2120_v0 }
0x31c3   :  { %2964 = vmatpush.xpose.msk.msrb.mxu0 %vm92_vm6, %v3668_v27  ;;  %2395 = vmatpush.msra.mxu2 %v3668_v27 }
0x31c5   :  { %2396 = vmatpush.msra.mxu2 %v3679_v46 }
0x31c7   :  { %2965 = vmatpush.xpose.msk.msrb.mxu0 %vm92_vm6, %v3679_v46 }
0x323f   :  { %v2079_v29 = vpop.f32.mrf.mxu0 }
0x3240   :  { %v2082_v31 = vsel %vm1415_vm15, %v2079_v29, -inf }
0x3241   :  { %2083 = vmax.xlane.f32.xlu1 %v2082_v31 }
0x3245   :  { %v2146_v33 = vpop.f32.mrf.mxu2 }
0x3246   :  { %v2149_v5 = vsel %vm1415_vm15, %v2146_v33, -inf }
0x3247   :  { %2150 = vmax.xlane.f32.xlu2 %v2149_v5  ;;  %v2248_v5 = vrot.slane %v3844_v30, 6 }
0x325a   :  { %2199 = vrot.lane.b32.xlu1 %v2051_v23, %s3283_s20 }
0x32b4   :  { %v2084_v17 = vpop.xlane.xlu1 %2083 }
0x32b5   :  { %v2085_v35 = vsub.f32 %v2079_v29, %v2084_v17 }
0x32b7   :  { %v2086_v6 = vmul.f32 1.442695, %v2085_v35 }
0x32b9   :  { %3185 = vpow2.f32 %v2086_v6 }
0x32ba   :  { %v2151_v36 = vpop.xlane.xlu2 %2150 }
0x32bb   :  { %v2152_v37 = vsub.f32 %v2146_v33, %v2151_v36 }
0x32bd   :  { %v2153_v8 = vmul.f32 1.442695, %v2152_v37 }
0x32bf   :  { %v3186_v12 = vpop.eup %3185  ;;  %3187 = vpow2.f32 %v2153_v8 }
0x32c0   :  { %v2088_v15 = vsel %vm1415_vm15, %v3186_v12, 0.0 }
0x32c1   :  { %2089 = vadd.xlane.f32.xlu2 %v2088_v15 }
0x32c5   :  { %v3188_v38 = vpop.eup %3187 }
0x32c6   :  { %v2155_v53 = vsel %vm1415_vm15, %v3188_v38, 0.0 }
0x32c7   :  { %2156 = vadd.xlane.f32.xlu0 %v2155_v53 }
0x32cc   :  { %v2200_v52 = vpop.permute.xlu1 %2199 }
0x3334   :  { %v2090_v39 = vpop.xlane.xlu2 %2089 }
0x3335   :  { %3189 = vrcp.f32 %v2090_v39 }
0x333a   :  { %v2157_v41 = vpop.xlane.xlu0 %2156 }
0x333b   :  { %v3190_v50 = vpop.eup %3189  ;;  %3191 = vrcp.f32 %v2157_v41 }
0x333c   :  { %v2092_v24 = vmul.f32 %v3190_v50, %v3186_v12 }
0x333e   :  { %2954 = vmatmul.msk.f32.vlgmr.msra.gmra.mxu1 %vm50_vm0, %v2092_v24 }
0x333f   :  { %2548 = vmatpush.msra.mxu1 %v3662_v14 }
0x3341   :  { %v3192_v40 = vpop.eup %3191  ;;  %2549 = vmatpush.msra.mxu1 %v3674_v45 }
0x3342   :  { %v2159_v42 = vmul.f32 %v3192_v40, %v3188_v38 }
0x3344   :  { %2958 = vmatmul.msk.f32.vlgmr.msra.gmra.mxu0 %vm50_vm0, %v2159_v42 }
0x3345   :  { %2969 = vmatpush.xpose.msk.msra.mxu0 %vm92_vm6, %v3662_v14 }
0x3349   :  { %2970 = vmatpush.xpose.msk.msra.mxu0 %vm92_vm6, %v3674_v45 }
0x33bb   :  { %v2113_v51 = vpop.f32.mrf.mxu1 }
0x33c1   :  { %v2180_v47 = vpop.f32.mrf.mxu0 }
0x33c2   :  { %v2184_v49 = vrot.slane %v2180_v47, 7 }
0x33c4   :  { %v3876_v54 = vsel %vm1520_vm2, %v2113_v51, %v2184_v49 }
0x33c5   :  { %v2202_v43 = vsel %vm92_vm6, %v3876_v54, %v2200_v52 }
0x33c6   :  { %2959 = vmatmul.msk.f32.vlgmr.msrb.gmra.mxu1 %vm1321_vm3, %v2202_v43 }
0x33c7   :  { %2651 = vmatpush.msrb.mxu1 %v3242_v44 }
0x33c9   :  { %2652 = vmatpush.msrb.mxu1 %v3243_v10 }
0x33cb   :  { %2653 = vmatpush.msrb.mxu1 %v3244_v59 }
0x33cd   :  { %2654 = vmatpush.msrb.mxu1 %v3245_v2 }
0x33cf   :  { %2655 = vmatpush.msrb.mxu1 %v3246_v61 }
0x33d1   :  { %2656 = vmatpush.msrb.mxu1 %v3247_v62 }
0x33d3   :  { %2657 = vmatpush.msrb.mxu1 %v3248_v4 }
0x33d5   :  { %2658 = vmatpush.msrb.mxu1 %v3249_v1 }
0x3443   :  { %v2223_v56 = vpop.f32.mrf.mxu1 }
0x3444   :  { %v2226_v32 = vadd.f32 %v2223_v56, %v3882_v3 }
0x3446   :  { %3193 = vtanh.f32 %v2226_v32  ;;  %v2227_v57 = vsub.f32 0.0, %v2226_v32 }
0x3448   :  { %v2228_v58 = vmul.f32 1.442695, %v2227_v57 }
0x344a   :  { %3195 = vpow2.f32 %v2228_v58 }
0x344c   :  { %v3194_v26 = vpop.eup %3193 }
0x344d   :  { %2252 = vrot.lane.b32.xlu0 %v3194_v26, %s3283_s20 }
0x3450   :  { %v3196_v60 = vpop.eup %3195 }
0x3451   :  { %v2230_v63 = vadd.f32 1.0, %v3196_v60 }
0x3453   :  { %3197 = vrcp.f32 %v2230_v63  ;;  %v2242_v7 = vand.u32 2147483648, %v2230_v63  ;;  %vm2236_vm7 = vweird.f32 %v2230_v63  ;;  %v2240_v23 = vand.u32 2147483647, %v2230_v63 }
0x3455   :  { %v2243_v25 = vor.u32 1.1754944e-38, %v2242_v7  ;;  %vm2241_vm9 = vcmp.eq.f32.partialorder %v2240_v23, 8.507059e+37 }
0x3459   :  { %v3198_v9 = vpop.eup %3197 }
0x345a   :  { %v2232_v19 = vmul.f32 %v3198_v9, %v2230_v63  ;;  %vm2237_vm5 = vweird.f32 %v3198_v9 }
0x345b   :  { %vm2238_vm8 = vmor %vm2236_vm7, %vm2237_vm5  ;;  %vm2197_vm5 = vcmask 261126  }
0x345c   :  { %v2233_v18 = vsub.f32 1.0, %v2232_v19 }
0x345e   :  { %v2234_v28 = vmul.f32 %v3198_v9, %v2233_v18 }
0x3460   :  { %v2235_v22 = vadd.f32 %v3198_v9, %v2234_v28 }
0x3462   :  { %v2239_v0 = vsel %vm2238_vm8, %v3198_v9, %v2235_v22 }
0x3463   :  { %v2244_v31 = vsel %vm2241_vm9, %v2243_v25, %v2239_v0 }
0x3464   :  { %v2250_v17 = vmul.f32 %v2248_v5, %v2244_v31 }
0x34bf   :  { %v2253_v29 = vpop.permute.xlu0 %2252 }
0x34c0   :  { %v2255_v33 = vmul.f32 %v2253_v29, %v2244_v31 }
0x34c2   :  { %2257 = vrot.lane.b32.xlu2 %v2255_v33, %s3284_s21 }
0x351c   :  { %v2258_v35 = vpop.permute.xlu2 %2257 }
0x351d   :  { %v3888_v6 = vadd.f32 %v2258_v35, %v2250_v17 }
0x351f   :  { %3199 = vtanh.f32 %v3888_v6  ;;  %v2467_v17 = vrot.slane %v3888_v6, 6 }
0x3525   :  { %v3200_v36 = vpop.eup %3199 }
0x3526   :  { %2263 = vrot.lane.b32.xlu0 %v3200_v36, %s3283_s20 }
0x3598   :  { %v2264_v37 = vpop.permute.xlu0 %2263 }
0x3599   :  { %v3892_v8 = vmul.f32 %v2264_v37, %v2244_v31 }
0x359b   :  { %2270 = vrot.lane.b32.xlu1 %v3892_v8, %s3284_s21  ;;  %v2336_v12 = vrot.slane %v3892_v8, 1 }
0x359d   :  { %2337 = vrot.lane.b32.xlu2 %v2336_v12, %s3284_s21 }
0x35f7   :  { %v2338_v30 = vpop.permute.xlu2 %2337 }
0x35f8   :  { %2966 = vmatmul.msk.f32.vlgmr.msrb.gmra.mxu0 %vm92_vm6, %v2338_v30 }
0x35f9   :  { %2615 = vmatpush.msrb.mxu0 %v3668_v27 }
0x35fb   :  { %2616 = vmatpush.msrb.mxu0 %v3679_v46 }
0x360d   :  { %v2271_v15 = vpop.permute.xlu1 %2270 }
0x360e   :  { %2962 = vmatmul.msk.f32.vlgmr.msrb.gmra.mxu2 %vm92_vm6, %v2271_v15 }
0x360f   :  { %2973 = vmatpush.xpose.msk.msrb.mxu2 %vm92_vm6, %v3668_v27 }
0x3613   :  { %2974 = vmatpush.xpose.msk.msrb.mxu2 %vm92_vm6, %v3679_v46 }
0x3675   :  { %v2364_v38 = vpop.f32.mrf.mxu0 }
0x3676   :  { %v2367_v53 = vsel %vm1415_vm15, %v2364_v38, -inf }
0x3677   :  { %2368 = vmax.xlane.f32.xlu0 %v2367_v53 }
0x3691   :  { %v2297_v39 = vpop.f32.mrf.mxu2 }
0x3692   :  { %v2300_v41 = vsel %vm1415_vm15, %v2297_v39, -inf }
0x3693   :  { %2301 = vmax.xlane.f32.xlu1 %v2300_v41  ;;  %v3251_v41 = vld [vmem:[#allocation2 + $0x18] sm:$0xff] }
0x36ea   :  { %v2369_v50 = vpop.xlane.xlu0 %2368 }
0x36eb   :  { %v2370_v24 = vsub.f32 %v2364_v38, %v2369_v50  ;;  %v3252_v50 = vld [vmem:[#allocation2 + $0x10] sm:$0xff] }
0x36ed   :  { %v2371_v40 = vmul.f32 1.442695, %v2370_v24 }
0x36ef   :  { %3201 = vpow2.f32 %v2371_v40 }
0x36f5   :  { %v3202_v42 = vpop.eup %3201 }
0x36f6   :  { %v2373_v47 = vsel %vm1415_vm15, %v3202_v42, 0.0 }
0x36f7   :  { %2374 = vadd.xlane.f32.xlu2 %v2373_v47 }
0x3706   :  { %v2302_v27 = vpop.xlane.xlu1 %2301 }
0x3707   :  { %v2303_v49 = vsub.f32 %v2297_v39, %v2302_v27 }
0x3709   :  { %v2304_v51 = vmul.f32 1.442695, %v2303_v49 }
0x370b   :  { %3203 = vpow2.f32 %v2304_v51 }
0x370f   :  { %2415 = vrot.lane.b32.xlu2 %v3892_v8, %s3283_s20 }
0x3711   :  { %v3204_v46 = vpop.eup %3203 }
0x3712   :  { %v2306_v52 = vsel %vm1415_vm15, %v3204_v46, 0.0 }
0x3713   :  { %2307 = vadd.xlane.f32.xlu0 %v2306_v52 }
0x376a   :  { %v2375_v43 = vpop.xlane.xlu2 %2374 }
0x376b   :  { %3205 = vrcp.f32 %v2375_v43 }
0x3771   :  { %v3206_v44 = vpop.eup %3205 }
0x3772   :  { %v2377_v10 = vmul.f32 %v3206_v44, %v3202_v42  ;;  %v2416_v21 = vpop.permute.xlu2 %2415 }
0x3774   :  { %2967 = vmatmul.msk.f32.vlgmr.msra.gmra.mxu2 %vm50_vm0, %v2377_v10 }
0x3775   :  { %2978 = vmatpush.xpose.msk.msra.mxu2 %vm92_vm6, %v3662_v14 }
0x3779   :  { %2979 = vmatpush.xpose.msk.msra.mxu2 %vm92_vm6, %v3674_v45 }
0x3786   :  { %v2308_v59 = vpop.xlane.xlu0 %2307 }
0x3787   :  { %3207 = vrcp.f32 %v2308_v59 }
0x378d   :  { %v3208_v2 = vpop.eup %3207 }
0x378e   :  { %v2310_v61 = vmul.f32 %v3208_v2, %v3204_v46 }
0x3790   :  { %2963 = vmatmul.msk.f32.vlgmr.msrb.gmra.mxu3 %vm50_vm0, %v2310_v61 }
0x3791   :  { %2769 = vmatpush.msrb.mxu3 %v3662_v14 }
0x3793   :  { %2770 = vmatpush.msrb.mxu3 %v3674_v45 }
0x37f7   :  { %v2398_v62 = vpop.f32.mrf.mxu2 }
0x37f8   :  { %v2402_v4 = vrot.slane %v2398_v62, 7 }
0x3813   :  { %v2331_v1 = vpop.f32.mrf.mxu3 }
0x3814   :  { %v3921_v56 = vsel %vm1520_vm2, %v2331_v1, %v2402_v4 }
0x3815   :  { %v2418_v32 = vsel %vm92_vm6, %v3921_v56, %v2416_v21 }
0x3816   :  { %2968 = vmatmul.msk.f32.vlgmr.msra.gmra.mxu3 %vm1321_vm3, %v2418_v32 }
0x3899   :  { %v2439_v26 = vpop.f32.mrf.mxu3 }
0x389a   :  { %v2443_v57 = vrot.slane %v2439_v26, 6 }
0x389c   :  { %v2445_v58 = vadd.f32 %v2443_v57, %v3882_v3 }
0x389e   :  { %3209 = vtanh.f32 %v2445_v58  ;;  %v2446_v45 = vsub.f32 0.0, %v2445_v58 }
0x38a0   :  { %v2447_v60 = vmul.f32 1.442695, %v2446_v45 }
0x38a2   :  { %3211 = vpow2.f32 %v2447_v60 }
0x38a4   :  { %v3210_v14 = vpop.eup %3209 }
0x38a5   :  { %2471 = vrot.lane.b32.xlu1 %v3210_v14, %s3283_s20 }
0x38a8   :  { %v3212_v63 = vpop.eup %3211 }
0x38a9   :  { %v2449_v9 = vadd.f32 1.0, %v3212_v63 }
0x38ab   :  { %3213 = vrcp.f32 %v2449_v9  ;;  %v2461_v23 = vand.u32 2147483648, %v2449_v9  ;;  %vm2455_vm11 = vweird.f32 %v2449_v9  ;;  %v2459_v0 = vand.u32 2147483647, %v2449_v9 }
0x38ad   :  { %v2462_v29 = vor.u32 1.1754944e-38, %v2461_v23  ;;  %vm2460_vm13 = vcmp.eq.f32.partialorder %v2459_v0, 8.507059e+37 }
0x38b1   :  { %v3214_v19 = vpop.eup %3213 }
0x38b2   :  { %v2451_v18 = vmul.f32 %v3214_v19, %v2449_v9  ;;  %vm2456_vm10 = vweird.f32 %v3214_v19 }
0x38b3   :  { %vm2457_vm12 = vmor %vm2455_vm11, %vm2456_vm10 }
0x38b4   :  { %v2452_v28 = vsub.f32 1.0, %v2451_v18 }
0x38b6   :  { %v2453_v22 = vmul.f32 %v3214_v19, %v2452_v28 }
0x38b8   :  { %v2454_v7 = vadd.f32 %v3214_v19, %v2453_v22 }
0x38ba   :  { %v2458_v25 = vsel %vm2457_vm12, %v3214_v19, %v2454_v7 }
0x38bb   :  { %v2463_v33 = vsel %vm2460_vm13, %v2462_v29, %v2458_v25 }
0x38bc   :  { %v2469_v35 = vmul.f32 %v2467_v17, %v2463_v33 }
0x3917   :  { %v2472_v31 = vpop.permute.xlu1 %2471 }
0x3918   :  { %v2474_v5 = vmul.f32 %v2472_v31, %v2463_v33 }
0x391a   :  { %2476 = vrot.lane.b32.xlu0 %v2474_v5, %s3284_s21 }
0x398c   :  { %v2477_v36 = vpop.permute.xlu0 %2476 }
0x398d   :  { %v3930_v37 = vadd.f32 %v2477_v36, %v2469_v35 }
0x398f   :  { %3215 = vtanh.f32 %v3930_v37 }
0x3995   :  { %v3216_v12 = vpop.eup %3215 }
0x3996   :  { %2482 = vrot.lane.b32.xlu2 %v3216_v12, %s3283_s20 }
0x39f0   :  { %v2483_v30 = vpop.permute.xlu2 %2482 }
0x39f1   :  { %v3934_v15 = vmul.f32 %v2483_v30, %v2463_v33 }
0x39f3   :  { %v2556_v38 = vrot.slane %v3934_v15, 3  ;;  %v2489_v53 = vrot.slane %v3934_v15, 2 }
0x39f5   :  { %2557 = vrot.lane.b32.xlu0 %v2556_v38, %s3284_s21  ;;  %2490 = vrot.lane.b32.xlu1 %v2489_v53, %s3284_s21  ;;  %v2688_v38 = vrot.slane %v3930_v37, 6 }
0x3a67   :  { %v2558_v6 = vpop.permute.xlu0 %2557  ;;  %v2491_v39 = vpop.permute.xlu1 %2490 }
0x3a68   :  { %2971 = vmatmul.msk.f32.vlgmr.msra.gmra.mxu0 %vm92_vm6, %v2491_v39  ;;  %2975 = vmatmul.msk.f32.vlgmr.msrb.gmra.mxu2 %vm92_vm6, %v2558_v6 }
0x3a69   :  { %2982 = vmatpush.xpose.msk.msra.mxu0 %vm92_vm6, %v3251_v41  ;;  %2836 = vmatpush.msrb.mxu2 %v3251_v41 }
0x3a6b   :  { %2837 = vmatpush.msrb.mxu2 %v3252_v50 }
0x3a6d   :  { %2983 = vmatpush.xpose.msk.msra.mxu0 %vm92_vm6, %v3252_v50 }
0x3ae5   :  { %v2517_v24 = vpop.f32.mrf.mxu0 }
0x3ae6   :  { %v2520_v40 = vsel %vm1415_vm15, %v2517_v24, -inf }
0x3ae7   :  { %2521 = vmax.xlane.f32.xlu0 %v2520_v40 }
0x3aeb   :  { %v2584_v42 = vpop.f32.mrf.mxu2 }
0x3aec   :  { %v2587_v47 = vsel %vm1415_vm15, %v2584_v42, -inf }
0x3aed   :  { %2588 = vmax.xlane.f32.xlu2 %v2587_v47 }
0x3afb   :  { %2636 = vrot.lane.b32.xlu0 %v2489_v53, %s3283_s20 }
0x3b5a   :  { %v2522_v27 = vpop.xlane.xlu0 %2521 }
0x3b5b   :  { %v2523_v49 = vsub.f32 %v2517_v24, %v2522_v27 }
0x3b5d   :  { %v2524_v51 = vmul.f32 1.442695, %v2523_v49 }
0x3b5f   :  { %3217 = vpow2.f32 %v2524_v51 }
0x3b60   :  { %v2589_v46 = vpop.xlane.xlu2 %2588 }
0x3b61   :  { %v2590_v52 = vsub.f32 %v2584_v42, %v2589_v46 }
0x3b63   :  { %v2591_v43 = vmul.f32 1.442695, %v2590_v52 }
0x3b65   :  { %v3218_v44 = vpop.eup %3217  ;;  %3219 = vpow2.f32 %v2591_v43 }
0x3b66   :  { %v2526_v10 = vsel %vm1415_vm15, %v3218_v44, 0.0 }
0x3b67   :  { %2527 = vadd.xlane.f32.xlu2 %v2526_v10 }
0x3b6b   :  { %v3220_v59 = vpop.eup %3219 }
0x3b6c   :  { %v2593_v2 = vsel %vm1415_vm15, %v3220_v59, 0.0 }
0x3b6d   :  { %2594 = vadd.xlane.f32.xlu1 %v2593_v2  ;;  %v2637_v14 = vpop.permute.xlu0 %2636 }
0x3bda   :  { %v2528_v61 = vpop.xlane.xlu2 %2527 }
0x3bdb   :  { %3221 = vrcp.f32 %v2528_v61 }
0x3be0   :  { %v2595_v62 = vpop.xlane.xlu1 %2594 }
0x3be1   :  { %v3222_v4 = vpop.eup %3221  ;;  %3223 = vrcp.f32 %v2595_v62 }
0x3be2   :  { %v2530_v1 = vmul.f32 %v3222_v4, %v3218_v44 }
0x3be4   :  { %2972 = vmatmul.msk.f32.vlgmr.msra.gmra.mxu1 %vm50_vm0, %v2530_v1 }
0x3be7   :  { %v3224_v21 = vpop.eup %3223 }
0x3be8   :  { %v2597_v32 = vmul.f32 %v3224_v21, %v3220_v59  ;;  %v1744_v21 = vrot.slane %v3778_v16, 6 }
0x3bea   :  { %2976 = vmatmul.msk.f32.vlgmr.msrb.gmra.mxu0 %vm50_vm0, %v2597_v32  ;;  %v2188_v32 = vrot.slane %v3876_v54, 2 }
0x3c61   :  { %v2551_v58 = vpop.f32.mrf.mxu1 }
0x3c67   :  { %v2618_v26 = vpop.f32.mrf.mxu0 }
0x3c68   :  { %v2622_v57 = vrot.slane %v2618_v26, 7  ;;  %v1966_v26 = vrot.slane %v3827_v48, 4 }
0x3c6a   :  { %v3952_v45 = vsel %vm1520_vm2, %v2551_v58, %v2622_v57 }
0x3c6b   :  { %v2639_v60 = vsel %vm92_vm6, %v3952_v45, %v2637_v14  ;;  %v2626_v57 = vrot.slane %v3952_v45, 6 }
0x3c6c   :  { %2977 = vmatmul.msk.f32.vlgmr.msrb.gmra.mxu1 %vm1321_vm3, %v2639_v60 }
0x3ce9   :  { %v2660_v63 = vpop.f32.mrf.mxu1 }
0x3cea   :  { %v2664_v9 = vrot.slane %v2660_v63, 4 }
0x3cec   :  { %v2666_v19 = vadd.f32 %v2664_v9, %v3882_v3 }
0x3cee   :  { %3225 = vtanh.f32 %v2666_v19  ;;  %v2667_v28 = vsub.f32 0.0, %v2666_v19 }
0x3cf0   :  { %v2668_v22 = vmul.f32 1.442695, %v2667_v28 }
0x3cf2   :  { %3227 = vpow2.f32 %v2668_v22 }
0x3cf4   :  { %v3226_v18 = vpop.eup %3225 }
0x3cf5   :  { %2692 = vrot.lane.b32.xlu1 %v3226_v18, %s3283_s20 }
0x3cf8   :  { %v3228_v7 = vpop.eup %3227 }
0x3cf9   :  { %v2670_v23 = vadd.f32 1.0, %v3228_v7 }
0x3cfb   :  { %3229 = vrcp.f32 %v2670_v23  ;;  %v2682_v5 = vand.u32 2147483648, %v2670_v23  ;;  %vm2676_vm14 = vweird.f32 %v2670_v23  ;;  %v2680_v17 = vand.u32 2147483647, %v2670_v23 }
0x3cfd   :  { %v2683_v35 = vor.u32 1.1754944e-38, %v2682_v5  ;;  %vm2681_vm4 = vcmp.eq.f32.partialorder %v2680_v17, 8.507059e+37  ;;  %v2862_v17 = vld [vmem:[#allocation4 + $0xa8] sm:$0xff] }
0x3cfe   :  { %2883 = vmatpush.msra.mxu3 %v2862_v17 }
0x3d01   :  { %v3230_v0 = vpop.eup %3229 }
0x3d02   :  { %v2672_v25 = vmul.f32 %v3230_v0, %v2670_v23  ;;  %vm2677_vm3 = vweird.f32 %v3230_v0 }
0x3d03   :  { %vm2678_vm1 = vmor %vm2676_vm14, %vm2677_vm3 }
0x3d04   :  { %v2673_v29 = vsub.f32 1.0, %v2672_v25 }
0x3d06   :  { %v2674_v31 = vmul.f32 %v3230_v0, %v2673_v29 }
0x3d08   :  { %v2675_v33 = vadd.f32 %v3230_v0, %v2674_v31 }
0x3d0a   :  { %v2679_v3 = vsel %vm2678_vm1, %v3230_v0, %v2675_v33 }
0x3d0b   :  { %v2684_v12 = vsel %vm2681_vm4, %v2683_v35, %v2679_v3  ;;  %v2861_v3 = vld [vmem:[#allocation4 + $0xa0] sm:$0xff]  ;;  %v2860_v35 = vld [vmem:[#allocation4 + $0x98] sm:$0xff] }
0x3d0c   :  { %v2690_v53 = vmul.f32 %v2688_v38, %v2684_v12  ;;  %2884 = vmatpush.msra.mxu3 %v2861_v3 }
0x3d0e   :  { %2885 = vmatpush.msra.mxu3 %v2860_v35 }
0x3d67   :  { %v2693_v36 = vpop.permute.xlu1 %2692 }
0x3d68   :  { %v2695_v30 = vmul.f32 %v2693_v36, %v2684_v12  ;;  %v2859_v36 = vld [vmem:[#allocation4 + $0x90] sm:$0xff] }
0x3d69   :  { %2886 = vmatpush.msra.mxu3 %v2859_v36 }
0x3d6a   :  { %2697 = vrot.lane.b32.xlu2 %v2695_v30, %s3284_s21 }
0x3dc4   :  { %v2698_v6 = vpop.permute.xlu2 %2697 }
0x3dc5   :  { %v2700_v39 = vadd.f32 %v2698_v6, %v2690_v53 }
0x3dc7   :  { %3231 = vtanh.f32 %v2700_v39  ;;  %v3000_v39 = vld [vmem:[#allocation4 + $0xb0] ss:$0 sm:$0xff] }
0x3dcd   :  { %v3232_v41 = vpop.eup %3231 }
0x3dce   :  { %2703 = vrot.lane.b32.xlu0 %v3232_v41, %s3283_s20 }
0x3e40   :  { %v2704_v50 = vpop.permute.xlu0 %2703 }
0x3e41   :  { %v3962_v24 = vmul.f32 %v2704_v50, %v2684_v12 }
0x3e43   :  { %v2777_v40 = vrot.slane %v3962_v24, 5  ;;  %v2710_v42 = vrot.slane %v3962_v24, 4 }
0x3e45   :  { %2778 = vrot.lane.b32.xlu0 %v2777_v40, %s3284_s21  ;;  %2711 = vrot.lane.b32.xlu1 %v2710_v42, %s3284_s21 }
0x3eb7   :  { %v2779_v47 = vpop.permute.xlu0 %2778  ;;  %v2712_v37 = vpop.permute.xlu1 %2711 }
0x3eb8   :  { %2980 = vmatmul.msk.f32.vlgmr.msra.gmra.mxu2 %vm92_vm6, %v2712_v37  ;;  %2984 = vmatmul.msk.f32.vlgmr.msra.gmra.mxu0 %vm92_vm6, %v2779_v47 }
0x3f35   :  { %v2805_v27 = vpop.f32.mrf.mxu0 }
0x3f36   :  { %v2808_v49 = vsel %vm1415_vm15, %v2805_v27, -inf }
0x3f37   :  { %2809 = vmax.xlane.f32.xlu2 %v2808_v49 }
0x3f3b   :  { %v2738_v51 = vpop.f32.mrf.mxu2 }
0x3f3c   :  { %v2741_v46 = vsel %vm1415_vm15, %v2738_v51, -inf }
0x3f3d   :  { %2742 = vmax.xlane.f32.xlu1 %v2741_v46 }
0x3f56   :  { %1523 = vrot.lane.b32.xlu1 %v3727_v34, %s3286_s1 }
0x3f5e   :  { %2406 = vrot.lane.b32.xlu1 %v3921_v56, %s3286_s1 }
0x3faa   :  { %v2810_v52 = vpop.xlane.xlu2 %2809 }
0x3fab   :  { %v2811_v43 = vsub.f32 %v2805_v27, %v2810_v52 }
0x3fad   :  { %v2812_v44 = vmul.f32 1.442695, %v2811_v43 }
0x3faf   :  { %3233 = vpow2.f32 %v2812_v44 }
0x3fb0   :  { %v2743_v10 = vpop.xlane.xlu1 %2742 }
0x3fb1   :  { %v2744_v59 = vsub.f32 %v2738_v51, %v2743_v10 }
0x3fb3   :  { %v2745_v2 = vmul.f32 1.442695, %v2744_v59 }
0x3fb5   :  { %v3234_v61 = vpop.eup %3233  ;;  %3235 = vpow2.f32 %v2745_v2 }
0x3fb6   :  { %v2814_v62 = vsel %vm1415_vm15, %v3234_v61, 0.0 }
0x3fb7   :  { %2815 = vadd.xlane.f32.xlu0 %v2814_v62 }
0x3fbb   :  { %v3236_v4 = vpop.eup %3235 }
0x3fbc   :  { %v2747_v1 = vsel %vm1415_vm15, %v3236_v4, 0.0  ;;  %vm1531_vm15 = vcmask 254976  }
0x3fbd   :  { %2748 = vadd.xlane.f32.xlu2 %v2747_v1 }
0x3fc8   :  { %v1524_v34 = vpop.permute.xlu1 %1523 }
0x3fc9   :  { %v1526_v56 = vadd.f32 %v1524_v34, %v3638_v13 }
0x3fcb   :  { %1745 = vrot.lane.b32.xlu0 %v1744_v21, %s3286_s1  ;;  %1528 = vrot.lane.b32.xlu1 %v1526_v56, %s3284_s21 }
0x3fd0   :  { %v2407_v60 = vpop.permute.xlu1 %2406 }
0x3fd1   :  { %v2409_v18 = vadd.f32 %v2407_v60, %v3892_v8 }
0x3fd3   :  { %2189 = vrot.lane.b32.xlu0 %v2188_v32, %s3286_s1 }
0x3fd5   :  { %1967 = vrot.lane.b32.xlu2 %v1966_v26, %s3286_s1 }
0x3fdd   :  { %2627 = vrot.lane.b32.xlu2 %v2626_v57, %s3286_s1 }
0x402a   :  { %v2816_v58 = vpop.xlane.xlu0 %2815 }
0x402b   :  { %3237 = vrcp.f32 %v2816_v58 }
0x4030   :  { %v2749_v16 = vpop.xlane.xlu2 %2748 }
0x4031   :  { %v3238_v13 = vpop.eup %3237  ;;  %3239 = vrcp.f32 %v2749_v16 }
0x4032   :  { %v2818_v14 = vmul.f32 %v3238_v13, %v3234_v61 }
0x4034   :  { %2985 = vmatmul.msk.f32.vlgmr.msrb.gmra.mxu2 %vm50_vm0, %v2818_v14 }
0x4037   :  { %v3240_v54 = vpop.eup %3239 }
0x4038   :  { %v2751_v63 = vmul.f32 %v3240_v54, %v3236_v4  ;;  %v1968_v22 = vpop.permute.xlu2 %1967 }
0x4039   :  { %v1970_v33 = vadd.f32 %v1968_v22, %v3799_v11 }
0x403a   :  { %2981 = vmatmul.msk.f32.vlgmr.msrb.gmra.mxu3 %vm50_vm0, %v2751_v63  ;;  %vm1753_vm0 = vcmask 257026  }
0x403d   :  { %v1746_v48 = vpop.permute.xlu0 %1745  ;;  %v1529_v9 = vpop.permute.xlu1 %1528 }
0x403e   :  { %v1748_v45 = vadd.f32 %v1746_v48, %v3746_v55  ;;  %1532 = vst.msk [vmem:[#allocation3] sm:$0x3] %vm1531_vm15, %v1529_v9 }
0x4040   :  { %1750 = vrot.lane.b32.xlu2 %v1748_v45, %s3284_s21  ;;  %v2628_v7 = vpop.permute.xlu2 %2627 }
0x4041   :  { %v2630_v5 = vadd.f32 %v2628_v7, %v3934_v15 }
0x4045   :  { %v2190_v19 = vpop.permute.xlu0 %2189 }
0x4046   :  { %v2192_v28 = vadd.f32 %v2190_v19, %v3848_v20 }
0x4048   :  { %2194 = vrot.lane.b32.xlu1 %v2192_v28, %s3284_s21  ;;  %2411 = vrot.lane.b32.xlu2 %v2409_v18, %s3284_s21 }
0x409a   :  { %v1751_v23 = vpop.permute.xlu2 %1750 }
0x409b   :  { %1754 = vst.msk [vmem:[#allocation3] sm:$0xc] %vm1753_vm0, %v1751_v23 }
0x40a2   :  { %v2412_v55 = vpop.permute.xlu2 %2411 }
0x40a3   :  { %2414 = vst.msk [vmem:[#allocation3 + $0x8] sm:$0x3] %vm1531_vm15, %v2412_v55 }
0x40b7   :  { %v2839_v0 = vpop.f32.mrf.mxu2 }
0x40b8   :  { %v2843_v8 = vrot.slane %v2839_v0, 7 }
0x40ba   :  { %v2195_v25 = vpop.permute.xlu1 %2194 }
0x40bb   :  { %2198 = vst.msk [vmem:[#allocation3] sm:$0xc0] %vm2197_vm5, %v2195_v25 }
0x40bd   :  { %v2772_v29 = vpop.f32.mrf.mxu3 }
0x40be   :  { %v2845_v20 = vsel %vm1520_vm2, %v2772_v29, %v2843_v8  ;;  %vm1975_vm2 = vcmask 259076  }
0x40bf   :  { %v2847_v31 = vrot.slane %v2845_v20, 4 }
0x40c1   :  { %2848 = vrot.lane.b32.xlu0 %v2847_v31, %s3286_s1 }
0x40c9   :  { %1972 = vrot.lane.b32.xlu0 %v1970_v33, %s3284_s21 }
0x40d1   :  { %2632 = vrot.lane.b32.xlu0 %v2630_v5, %s3284_s21 }
0x4133   :  { %v2849_v12 = vpop.permute.xlu0 %2848 }
0x4134   :  { %v2851_v30 = vadd.f32 %v2849_v12, %v3962_v24 }
0x4136   :  { %2853 = vrot.lane.b32.xlu1 %v2851_v30, %s3284_s21 }
0x413b   :  { %v1973_v11 = vpop.permute.xlu0 %1972 }
0x413c   :  { %1976 = vst.msk [vmem:[#allocation3] sm:$0x30] %vm1975_vm2, %v1973_v11 }
0x4143   :  { %v2633_v38 = vpop.permute.xlu0 %2632  ;;  %v2857_v15 = vld [vmem:[#allocation3] sm:$0xff] }
0x4144   :  { %2635 = vst.msk [vmem:[#allocation3 + $0x8] sm:$0xc] %vm1753_vm0, %v2633_v38  ;;  %2986 = vmatmul.msk.f32.vlgmr.msra.gmra.mxu3 %vm92_vm6, %v2857_v15 }
0x41a8   :  { %v2854_v53 = vpop.permute.xlu1 %2853 }
0x41a9   :  { %2856 = vst.msk [vmem:[#allocation3 + $0x8] sm:$0x30] %vm1975_vm2, %v2854_v53 }
0x41b0   :  { %v2858_v6 = vld [vmem:[#allocation3 + $0x8] sm:$0x3f] }
0x41b1   :  { %2987 = vmatmul.msk.f32.gmra.mxu3 %vm92_vm6, %v2858_v6 }
0x41c7   :  { %v2888_v41 = vpop.f32.mrf.mxu3 }
0x41c8   :  { %v2889_v50 = vadd.f32 %v3000_v39, %v2888_v41 }
0x41ca   :  { %2894 = vst [vmem:[%s4019_s3] sm:$0xff] %v2889_v50 }
0x4234   :  { %v2891_v24 = vpop.f32.mrf.mxu3 }
0x4235   :  { %v2892_v40 = vadd.f32 %v3000_v39, %v2891_v24 }
0x4237   :  { %2895 = vst [vmem:[%s4019_s3 + $0x8] sm:$0x3f] %v2892_v40 }
0x4238   :  { %2900 = vsyncpa [#allocation5], 1 }

</bundles_post_ra>
